<compile_context>
chip_gen: v7x
topology: tpu7x:2x2x1
jax: 0.10.0
libtpu: 0.0.40
codegen_flags: <defaults>
</compile_context>

<pallas_src>
import math
from functools import partial

import jax
import jax.numpy as jnp
from jax import lax
from jax.experimental import pallas as pl
from jax.experimental.pallas import tpu as pltpu

VMEM = pltpu.MemorySpace.VMEM

# Matmul operand dtype (accumulation is always f32).  Use jnp.float32 for exact
# parity with an f32 reference; bf16 is the fast path on v6e/v7x MXU.
MXU_DTYPE = jnp.bfloat16
LN_EPS = 1e-5


# ---------------------------- shared math helpers ----------------------------

def _hardswish(x):
    return x * jnp.clip(x + 3.0, 0.0, 6.0) * (1.0 / 6.0)


def _layernorm(x, g, b, eps=LN_EPS):
    mu = jnp.mean(x, axis=-1, keepdims=True)
    var = jnp.mean(jnp.square(x - mu), axis=-1, keepdims=True)
    return (x - mu) * lax.rsqrt(var + eps) * g + b


def _mm(a, w):
    # MXU matmul: bf16 (or f32) operands, f32 accumulation.
    return jnp.dot(a.astype(MXU_DTYPE), w.astype(MXU_DTYPE),
                   preferred_element_type=jnp.float32)


# ---------------------------- fused forward kernel ----------------------------

def _fused_forward_kernel(
    src_ref, pe_ref,
    t2v_w_ref, t2v_b_ref, lin_w_ref, lin_b_ref,
    in_w_ref, in_b_ref, out_w_ref, out_b_ref,
    ff1_w_ref, ff1_b_ref, ff2_w_ref, ff2_b_ref,
    n1_g_ref, n1_b_ref, n2_g_ref, n2_b_ref,
    nf_g_ref, nf_b_ref, proj_w_ref, proj_b_ref,
    out_ref,
    head_buf, qkv_buf,
    *, NB, S, ntf, d_te, d_model, H, dh, L, t2v_scale, use_pe):
    f32 = jnp.float32

    # ---- embeddings (weights are lane-padded to d_model, so concat == add) ----
    time_feat = src_ref[:, :ntf]              # (NS, ntf)
    lin_feat = src_ref[:, ntf:]               # (NS, nlf)

    z = _mm(time_feat, t2v_w_ref[...]) + t2v_b_ref[...]         # lanes >= d_te are exactly 0
    col = lax.broadcasted_iota(jnp.int32, z.shape, 1)
    t_emb = jnp.where(col == 0, z, jnp.sin(z)) * t2v_scale      # Time2Vec * sqrt(d_te)
    if use_pe:
        t_emb = t_emb + pe_ref[...]                             # positional enc (lane-padded)

    lin_proj = _mm(lin_feat, lin_w_ref[...]) + lin_b_ref[...]   # lanes < d_te are exactly 0

    x = _hardswish(t_emb + lin_proj)                            # (NS, d_model) in registers

    # ---- encoder layers (post-norm, ReLU FFN, dropout == identity) ----------
    for i in range(L):
        # QKV projection (q-scale folded into weights at prep time)
        qkv_buf[...] = (_mm(x, in_w_ref[i]) + in_b_ref[i]).astype(f32)

        # per-(batch, head) attention; head outputs merged lane-wise into head_buf
        for n in range(NB):
            r0 = n * S
            for h in range(H):
                c0 = h * dh
                q = qkv_buf[r0:r0 + S, c0:c0 + dh]
                k = qkv_buf[r0:r0 + S, d_model + c0:d_model + c0 + dh]
                v = qkv_buf[r0:r0 + S, 2 * d_model + c0:2 * d_model + c0 + dh]

                s = lax.dot_general(
                    q.astype(MXU_DTYPE), k.astype(MXU_DTYPE),
                    (((1,), (1,)), ((), ())),
                    preferred_element_type=jnp.float32)          # (S, S) = q @ k^T
                m = jnp.max(s, axis=-1, keepdims=True)
                p = jnp.exp(s - m)
                denom = jnp.sum(p, axis=-1, keepdims=True)
                p = p * pl.reciprocal(denom, approx=True)        # EUP reciprocal
                o = _mm(p, v)                                    # (S, dh)
                head_buf[r0:r0 + S, c0:c0 + dh] = o.astype(f32)

        att = _mm(head_buf[...], out_w_ref[i]) + out_b_ref[i]
        x = _layernorm(att + x, n1_g_ref[i], n1_b_ref[i])

        hmid = jnp.maximum(_mm(x, ff1_w_ref[i]) + ff1_b_ref[i], 0.0)
        hout = _mm(hmid, ff2_w_ref[i]) + ff2_b_ref[i]
        x = _layernorm(hout + x, n2_g_ref[i], n2_b_ref[i])

    # ---- final norm, double hardswish, projection ---------------------------
    x = _layernorm(x, nf_g_ref[...], nf_b_ref[...])   # TransformerEncoder final norm
    x = _hardswish(x)                                 # F.hardswish(encoder(x))
    x = _hardswish(x)                                 # projection head nn.Hardswish()
    out = _mm(x, proj_w_ref[...]) + proj_b_ref[...]   # lane-padded (128) projection
    out_ref[...] = out.astype(out_ref.dtype)


# ---------------------------- parameters ----------------------------

def init_params(key, cfg):
    def dense(k, fan_in, fan_out):
        kw, kb = jax.random.split(k)
        lim = 1.0 / math.sqrt(fan_in)
        w = jax.random.uniform(kw, (fan_in, fan_out), jnp.float32, -lim, lim)
        b = jax.random.uniform(kb, (fan_out,), jnp.float32, -lim, lim)
        return w, b

    d_model = cfg["d_time_embed"] + cfg["d_linear_embed"]
    keys = jax.random.split(key, 3 + cfg["n_encoder_layers"])

    p = {}
    p["t2v_w"], p["t2v_b"] = dense(keys[0], cfg["n_time_features"], cfg["d_time_embed"])
    p["lin_w"], p["lin_b"] = dense(keys[1], cfg["n_linear_features"], cfg["d_linear_embed"])

    layers = []
    for i in range(cfg["n_encoder_layers"]):
        lk = jax.random.split(keys[2 + i], 4)
        lp = {}
        lp["in_proj_w"], lp["in_proj_b"] = dense(lk[0], d_model, 3 * d_model)
        lp["out_proj_w"], lp["out_proj_b"] = dense(lk[1], d_model, d_model)
        lp["ff1_w"], lp["ff1_b"] = dense(lk[2], d_model, cfg["dim_feedforward"])
        lp["ff2_w"], lp["ff2_b"] = dense(lk[3], cfg["dim_feedforward"], d_model)
        lp["norm1_g"] = jnp.ones((d_model,), jnp.float32)
        lp["norm1_b"] = jnp.zeros((d_model,), jnp.float32)
        lp["norm2_g"] = jnp.ones((d_model,), jnp.float32)
        lp["norm2_b"] = jnp.zeros((d_model,), jnp.float32)
        layers.append(lp)
    p["layers"] = layers

    p["norm_g"] = jnp.ones((d_model,), jnp.float32)
    p["norm_b"] = jnp.zeros((d_model,), jnp.float32)
    p["proj_w"], p["proj_b"] = dense(keys[-1], d_model, cfg["n_out_features"])
    return p


def prepare_params(params, cfg):
    """Stack per-layer weights, fold attention q-scale, lane-pad the embedding
    weights to d_model and the projection to 128 lanes, pre-cast matmul weights
    to the MXU dtype."""
    d_te = cfg["d_time_embed"]
    d_le = cfg["d_linear_embed"]
    d_model = d_te + d_le
    H = cfg["n_head"]
    assert d_model % H == 0
    dh = d_model // H
    qscale = 1.0 / math.sqrt(dh)
    wdt = MXU_DTYPE

    def stack(name):
        return jnp.stack([lp[name] for lp in params["layers"]])

    # Embedding weights zero-padded to full d_model lane width: the "concat" of
    # time and linear embeddings becomes an add of lane-disjoint matmul outputs.
    t2v_w = jnp.zeros((params["t2v_w"].shape[0], d_model), jnp.float32
                      ).at[:, :d_te].set(params["t2v_w"])
    t2v_b = jnp.zeros((d_model,), jnp.float32).at[:d_te].set(params["t2v_b"])
    lin_w = jnp.zeros((params["lin_w"].shape[0], d_model), jnp.float32
                      ).at[:, d_te:].set(params["lin_w"])
    lin_b = jnp.zeros((d_model,), jnp.float32).at[d_te:].set(params["lin_b"])

    in_w = stack("in_proj_w")                              # (L, d_model, 3*d_model)
    in_b = stack("in_proj_b")                              # (L, 3*d_model)
    in_w = in_w.at[:, :, :d_model].multiply(qscale)        # fold 1/sqrt(dh) into q
    in_b = in_b.at[:, :d_model].multiply(qscale)

    n_out = cfg["n_out_features"]
    n_out_pad = max(128, 128 * ((n_out + 127) // 128))     # lane-dense output store
    proj_w = jnp.zeros((d_model, n_out_pad), jnp.float32).at[:, :n_out].set(params["proj_w"])
    proj_b = jnp.zeros((n_out_pad,), jnp.float32).at[:n_out].set(params["proj_b"])

    return dict(
        t2v_w=t2v_w.astype(wdt), t2v_b=t2v_b.reshape(1, -1),
        lin_w=lin_w.astype(wdt), lin_b=lin_b.reshape(1, -1),
        in_w=in_w.astype(wdt), in_b=in_b[:, None, :],
        out_w=stack("out_proj_w").astype(wdt), out_b=stack("out_proj_b")[:, None, :],
        ff1_w=stack("ff1_w").astype(wdt), ff1_b=stack("ff1_b")[:, None, :],
        ff2_w=stack("ff2_w").astype(wdt), ff2_b=stack("ff2_b")[:, None, :],
        n1_g=stack("norm1_g")[:, None, :], n1_b=stack("norm1_b")[:, None, :],
        n2_g=stack("norm2_g")[:, None, :], n2_b=stack("norm2_b")[:, None, :],
        nf_g=params["norm_g"].reshape(1, -1), nf_b=params["norm_b"].reshape(1, -1),
        proj_w=proj_w.astype(wdt), proj_b=proj_b.reshape(1, -1),
    )


def _positional_encoding_table(S, d_model):
    position = jnp.arange(S, dtype=jnp.float32)[:, None]
    div_term = jnp.exp(jnp.arange(0, d_model, 2, dtype=jnp.float32)
                       * (-math.log(10000.0) / d_model))
    pe = jnp.zeros((S, d_model), jnp.float32)
    pe = pe.at[:, 0::2].set(jnp.sin(position * div_term))
    pe = pe.at[:, 1::2].set(jnp.cos(position * div_term))
    return pe                                              # (S, d_model)


# ---------------------------- forward (Pallas) ----------------------------

def abbreviated_time_transformer_forward(src, packed, cfg):
    S, N, F = src.shape
    ntf = cfg["n_time_features"]
    nlf = cfg["n_linear_features"]
    assert F == ntf + nlf
    d_te = cfg["d_time_embed"]
    d_le = cfg["d_linear_embed"]
    d_model = d_te + d_le
    H = cfg["n_head"]
    dh = d_model // H
    L = cfg["n_encoder_layers"]
    n_out = cfg["n_out_features"]
    n_out_pad = packed["proj_w"].shape[1]
    dff = packed["ff1_w"].shape[-1]
    NS = N * S
    use_pe = bool(cfg.get("use_pos_enc", False))

    # batch-major flatten: row = n*S + s  (each attention batch contiguous on sublanes)
    src_flat = jnp.transpose(src, (1, 0, 2)).reshape(NS, F)

    if use_pe:
        pe = jnp.zeros((S, d_model), jnp.float32).at[:, :d_te].set(
            _positional_encoding_table(S, d_te))
        pe = jnp.tile(pe, (N, 1))                            # (NS, d_model), lane-padded
    else:
        pe = jnp.zeros((NS, d_model), jnp.float32)           # unused (static flag)

    # rough advisory cost estimate for the XLA scheduler
    flops = 2 * NS * (ntf * d_model + nlf * d_model + d_model * n_out_pad)
    flops += 2 * L * NS * (d_model * 3 * d_model + d_model * d_model + 2 * d_model * dff)
    flops += 4 * L * N * H * S * S * dh
    trans = NS * d_model + L * N * H * S * S
    bytes_accessed = (sum(int(v.size) * v.dtype.itemsize for v in packed.values())
                      + src_flat.size * 4 + pe.size * 4 + NS * n_out_pad * 4)

    kernel = partial(
        _fused_forward_kernel,
        NB=N, S=S, ntf=ntf, d_te=d_te, d_model=d_model, H=H, dh=dh, L=L,
        t2v_scale=math.sqrt(d_te), use_pe=use_pe)

    out = pl.pallas_call(
        kernel,
        out_shape=jax.ShapeDtypeStruct((NS, n_out_pad), jnp.float32),
        in_specs=[pl.BlockSpec(memory_space=VMEM)] * 22,
        out_specs=pl.BlockSpec(memory_space=VMEM),
        scratch_shapes=[
            pltpu.VMEM((NS, d_model), jnp.float32),      # per-head attention merge buffer
            pltpu.VMEM((NS, 3 * d_model), jnp.float32),  # QKV buffer
        ],
        cost_estimate=pl.CostEstimate(flops=int(flops),
                                      transcendentals=int(trans),
                                      bytes_accessed=int(bytes_accessed)),
    )(src_flat, pe,
      packed["t2v_w"], packed["t2v_b"], packed["lin_w"], packed["lin_b"],
      packed["in_w"], packed["in_b"], packed["out_w"], packed["out_b"],
      packed["ff1_w"], packed["ff1_b"], packed["ff2_w"], packed["ff2_b"],
      packed["n1_g"], packed["n1_b"], packed["n2_g"], packed["n2_b"],
      packed["nf_g"], packed["nf_b"], packed["proj_w"], packed["proj_b"])

    out = out[:, :n_out].reshape(N, S, n_out).transpose(1, 0, 2)   # back to (S, N, P)
    return out


# ---------------------------- pure-JAX reference ----------------------------

def reference_forward(src, params, cfg):
    """Faithful JAX port of the PyTorch forward (eval mode).  Uses the same
    bf16-operand / f32-accumulate matmul helper as the kernel so the comparison
    isolates structural correctness rather than dtype choice."""
    S, N, _ = src.shape
    ntf = cfg["n_time_features"]
    d_te = cfg["d_time_embed"]
    d_model = d_te + cfg["d_linear_embed"]
    H = cfg["n_head"]
    dh = d_model // H
    scale = 1.0 / math.sqrt(dh)

    tf = src[..., :ntf]
    lf = src[..., ntf:]
    z = _mm(tf, params["t2v_w"]) + params["t2v_b"]
    t_emb = jnp.concatenate([z[..., :1], jnp.sin(z[..., 1:])], -1) * math.sqrt(d_te)
    if cfg.get("use_pos_enc", False):
        t_emb = t_emb + _positional_encoding_table(S, d_te)[:, None, :]
    lin = _mm(lf, params["lin_w"]) + params["lin_b"]
    x = _hardswish(jnp.concatenate([t_emb, lin], -1))            # (S, N, d_model)

    for lp in params["layers"]:
        qkv = _mm(x, lp["in_proj_w"]) + lp["in_proj_b"]
        q, k, v = jnp.split(qkv, 3, axis=-1)

        def heads(t):                                            # (S,N,d) -> (N,H,S,dh)
            return t.reshape(S, N, H, dh).transpose(1, 2, 0, 3)

        qh, kh, vh = heads(q) * scale, heads(k), heads(v)
        s = jnp.einsum('nhsd,nhtd->nhst', qh.astype(MXU_DTYPE), kh.astype(MXU_DTYPE),
                       preferred_element_type=jnp.float32)
        p = jax.nn.softmax(s, axis=-1)
        o = jnp.einsum('nhst,nhtd->nhsd', p.astype(MXU_DTYPE), vh.astype(MXU_DTYPE),
                       preferred_element_type=jnp.float32)
        o = o.transpose(2, 0, 1, 3).reshape(S, N, d_model)
        att = _mm(o, lp["out_proj_w"]) + lp["out_proj_b"]
        x = _layernorm(x + att, lp["norm1_g"], lp["norm1_b"])
        h = jnp.maximum(_mm(x, lp["ff1_w"]) + lp["ff1_b"], 0.0)
        ff = _mm(h, lp["ff2_w"]) + lp["ff2_b"]
        x = _layernorm(x + ff, lp["norm2_g"], lp["norm2_b"])

    x = _layernorm(x, params["norm_g"], params["norm_b"])
    x = _hardswish(_hardswish(x))
    return _mm(x, params["proj_w"]) + params["proj_b"]


# ---------------------------- main ----------------------------

if __name__ == "__main__":
    cfg = dict(
        n_time_features=2,
        n_linear_features=2,
        n_out_features=4,
        d_time_embed=8,
        d_linear_embed=24,
        n_head=4,
        n_encoder_layers=2,
        dim_feedforward=2048,   # nn.TransformerEncoderLayer default
        use_pos_enc=False,
    )
    S, N = 8, 2
    key = jax.random.PRNGKey(0)
    kp, kx = jax.random.split(key)
    params = init_params(kp, cfg)
    packed = prepare_params(params, cfg)
    src = jax.random.normal(
        kx, (S, N, cfg["n_time_features"] + cfg["n_linear_features"]), jnp.float32)

    fwd = jax.jit(lambda s, p: abbreviated_time_transformer_forward(s, p, cfg))
    out = jax.block_until_ready(fwd(src, packed))
    assert out.shape == (S, N, cfg["n_out_features"])
    assert bool(jnp.all(jnp.isfinite(out)))

    ref = jax.block_until_ready(
        jax.jit(lambda s, p: reference_forward(s, p, cfg))(src, params))
    max_err = float(jnp.max(jnp.abs(out - ref)))
    assert max_err < 5e-2, f"kernel deviates from reference: max |diff| = {max_err}"

    print("KERNEL_OK")
</pallas_src>

<mosaic_0001>
module attributes {stable_mosaic.version = 11 : i64} {
  func.func @_fused_forward_kernel(%arg0: memref<16x4xf32, #tpu.memory_space<vmem>>, %arg1: memref<16x32xf32, #tpu.memory_space<vmem>>, %arg2: memref<2x32xbf16, #tpu.memory_space<vmem>>, %arg3: memref<1x32xf32, #tpu.memory_space<vmem>>, %arg4: memref<2x32xbf16, #tpu.memory_space<vmem>>, %arg5: memref<1x32xf32, #tpu.memory_space<vmem>>, %arg6: memref<2x32x96xbf16, #tpu.memory_space<vmem>>, %arg7: memref<2x1x96xf32, #tpu.memory_space<vmem>>, %arg8: memref<2x32x32xbf16, #tpu.memory_space<vmem>>, %arg9: memref<2x1x32xf32, #tpu.memory_space<vmem>>, %arg10: memref<2x32x2048xbf16, #tpu.memory_space<vmem>>, %arg11: memref<2x1x2048xf32, #tpu.memory_space<vmem>>, %arg12: memref<2x2048x32xbf16, #tpu.memory_space<vmem>>, %arg13: memref<2x1x32xf32, #tpu.memory_space<vmem>>, %arg14: memref<2x1x32xf32, #tpu.memory_space<vmem>>, %arg15: memref<2x1x32xf32, #tpu.memory_space<vmem>>, %arg16: memref<2x1x32xf32, #tpu.memory_space<vmem>>, %arg17: memref<2x1x32xf32, #tpu.memory_space<vmem>>, %arg18: memref<1x32xf32, #tpu.memory_space<vmem>>, %arg19: memref<1x32xf32, #tpu.memory_space<vmem>>, %arg20: memref<32x128xbf16, #tpu.memory_space<vmem>>, %arg21: memref<1x128xf32, #tpu.memory_space<vmem>>, %arg22: memref<16x128xf32, #tpu.memory_space<vmem>>, %arg23: memref<16x32xf32, #tpu.memory_space<vmem>>, %arg24: memref<16x96xf32, #tpu.memory_space<vmem>>) attributes {dimension_semantics = [], scalar_prefetch = 0 : i64, scratch_operands = 2 : i64, tpu.core_type = #tpu.core_type<tc>} {
    %c0 = arith.constant 0 : index
    %c0_0 = arith.constant 0 : index
    %0 = vector.load %arg0[%c0, %c0_0] : memref<16x4xf32, #tpu.memory_space<vmem>>, vector<16x2xf32>
    %c0_1 = arith.constant 0 : index
    %c2 = arith.constant 2 : index
    %1 = vector.load %arg0[%c0_1, %c2] : memref<16x4xf32, #tpu.memory_space<vmem>>, vector<16x2xf32>
    %c0_2 = arith.constant 0 : index
    %c0_3 = arith.constant 0 : index
    %2 = vector.load %arg2[%c0_2, %c0_3] : memref<2x32xbf16, #tpu.memory_space<vmem>>, vector<2x32xbf16>
    %3 = arith.truncf %0 : vector<16x2xf32> to vector<16x2xbf16>
    %cst = arith.constant dense<0.000000e+00> : vector<16x32xf32>
    %4 = tpu.matmul %3, %2, %cst {dimension_numbers = #tpu.dot_dimension_numbers<[1], [0], [0], [1], [0, 0, 1, 1], [], []>} : vector<16x2xbf16>, vector<2x32xbf16>, vector<16x32xf32> -> vector<16x32xf32>
    %c0_4 = arith.constant 0 : index
    %c0_5 = arith.constant 0 : index
    %5 = vector.load %arg3[%c0_4, %c0_5] : memref<1x32xf32, #tpu.memory_space<vmem>>, vector<1x32xf32>
    %6 = vector.broadcast %5 : vector<1x32xf32> to vector<16x32xf32>
    %7 = arith.addf %4, %6 : vector<16x32xf32>
    %8 = tpu.iota {dimensions = array<i32: 1>} : vector<16x32xi32>
    %c0_i32 = arith.constant 0 : i32
    %9 = vector.broadcast %c0_i32 : i32 to vector<16x32xi32>
    %10 = arith.cmpi eq, %8, %9 : vector<16x32xi32>
    %11 = math.sin %7 : vector<16x32xf32>
    %12 = arith.select %10, %7, %11 : vector<16x32xi1>, vector<16x32xf32>
    %cst_6 = arith.constant 2.82842708 : f32
    %13 = vector.broadcast %cst_6 : f32 to vector<16x32xf32>
    %14 = arith.mulf %12, %13 : vector<16x32xf32>
    %c0_7 = arith.constant 0 : index
    %c0_8 = arith.constant 0 : index
    %15 = vector.load %arg4[%c0_7, %c0_8] : memref<2x32xbf16, #tpu.memory_space<vmem>>, vector<2x32xbf16>
    %16 = arith.truncf %1 : vector<16x2xf32> to vector<16x2xbf16>
    %cst_9 = arith.constant dense<0.000000e+00> : vector<16x32xf32>
    %17 = tpu.matmul %16, %15, %cst_9 {dimension_numbers = #tpu.dot_dimension_numbers<[1], [0], [0], [1], [0, 0, 1, 1], [], []>} : vector<16x2xbf16>, vector<2x32xbf16>, vector<16x32xf32> -> vector<16x32xf32>
    %c0_10 = arith.constant 0 : index
    %c0_11 = arith.constant 0 : index
    %18 = vector.load %arg5[%c0_10, %c0_11] : memref<1x32xf32, #tpu.memory_space<vmem>>, vector<1x32xf32>
    %19 = vector.broadcast %18 : vector<1x32xf32> to vector<16x32xf32>
    %20 = arith.addf %17, %19 : vector<16x32xf32>
    %21 = arith.addf %14, %20 : vector<16x32xf32>
    %cst_12 = arith.constant 3.000000e+00 : f32
    %22 = vector.broadcast %cst_12 : f32 to vector<16x32xf32>
    %23 = arith.addf %21, %22 : vector<16x32xf32>
    %cst_13 = arith.constant 0.000000e+00 : f32
    %cst_14 = arith.constant 6.000000e+00 : f32
    %24 = vector.broadcast %cst_13 : f32 to vector<16x32xf32>
    %25 = arith.maximumf %24, %23 : vector<16x32xf32>
    %26 = vector.broadcast %cst_14 : f32 to vector<16x32xf32>
    %27 = arith.minimumf %26, %25 : vector<16x32xf32>
    %28 = arith.mulf %21, %27 : vector<16x32xf32>
    %cst_15 = arith.constant 0.166666672 : f32
    %29 = vector.broadcast %cst_15 : f32 to vector<16x32xf32>
    %30 = arith.mulf %28, %29 : vector<16x32xf32>
    %c0_16 = arith.constant 0 : index
    %c0_17 = arith.constant 0 : index
    %c0_18 = arith.constant 0 : index
    %31 = vector.load %arg6[%c0_16, %c0_17, %c0_18] : memref<2x32x96xbf16, #tpu.memory_space<vmem>>, vector<1x32x96xbf16>
    %32 = vector.shape_cast %31 : vector<1x32x96xbf16> to vector<32x96xbf16>
    %33 = arith.truncf %30 : vector<16x32xf32> to vector<16x32xbf16>
    %cst_19 = arith.constant dense<0.000000e+00> : vector<16x96xf32>
    %34 = tpu.matmul %33, %32, %cst_19 {dimension_numbers = #tpu.dot_dimension_numbers<[1], [0], [0], [1], [0, 0, 1, 1], [], []>} : vector<16x32xbf16>, vector<32x96xbf16>, vector<16x96xf32> -> vector<16x96xf32>
    %c0_20 = arith.constant 0 : index
    %c0_21 = arith.constant 0 : index
    %c0_22 = arith.constant 0 : index
    %35 = vector.load %arg7[%c0_20, %c0_21, %c0_22] : memref<2x1x96xf32, #tpu.memory_space<vmem>>, vector<1x1x96xf32>
    %36 = vector.shape_cast %35 : vector<1x1x96xf32> to vector<1x96xf32>
    %37 = vector.broadcast %36 : vector<1x96xf32> to vector<16x96xf32>
    %38 = arith.addf %34, %37 : vector<16x96xf32>
    %c0_23 = arith.constant 0 : index
    %c0_24 = arith.constant 0 : index
    %39 = vector.load %arg24[%c0_23, %c0_24] : memref<16x96xf32, #tpu.memory_space<vmem>>, vector<16x96xf32>
    tpu.vector_store %arg24[%c0_23, %c0_24], %38 {strides = array<i32>} : memref<16x96xf32, #tpu.memory_space<vmem>>, vector<16x96xf32>,
    %c0_25 = arith.constant 0 : index
    %c0_26 = arith.constant 0 : index
    %40 = vector.load %arg24[%c0_25, %c0_26] : memref<16x96xf32, #tpu.memory_space<vmem>>, vector<8x8xf32>
    %c0_27 = arith.constant 0 : index
    %c32 = arith.constant 32 : index
    %41 = vector.load %arg24[%c0_27, %c32] : memref<16x96xf32, #tpu.memory_space<vmem>>, vector<8x8xf32>
    %c0_28 = arith.constant 0 : index
    %c64 = arith.constant 64 : index
    %42 = vector.load %arg24[%c0_28, %c64] : memref<16x96xf32, #tpu.memory_space<vmem>>, vector<8x8xf32>
    %43 = arith.truncf %40 : vector<8x8xf32> to vector<8x8xbf16>
    %44 = arith.truncf %41 : vector<8x8xf32> to vector<8x8xbf16>
    %cst_29 = arith.constant dense<0.000000e+00> : vector<8x8xf32>
    %45 = tpu.matmul %43, %44, %cst_29 {dimension_numbers = #tpu.dot_dimension_numbers<[1], [1], [0], [0], [0, 0, 1, 0], [], []>} : vector<8x8xbf16>, vector<8x8xbf16>, vector<8x8xf32> -> vector<8x8xf32>
    %cst_30 = arith.constant dense<0xFF800000> : vector<8xf32>
    %46 = vector.multi_reduction <maximumf>, %45, %cst_30 [1] : vector<8x8xf32> to vector<8xf32>
    %47 = vector.shape_cast %46 : vector<8xf32> to vector<8x1xf32>
    %48 = vector.broadcast %47 : vector<8x1xf32> to vector<8x8xf32>
    %49 = arith.subf %45, %48 : vector<8x8xf32>
    %50 = math.exp %49 : vector<8x8xf32>
    %cst_31 = arith.constant dense<0.000000e+00> : vector<8xf32>
    %51 = vector.multi_reduction <add>, %50, %cst_31 [1] : vector<8x8xf32> to vector<8xf32>
    %52 = vector.shape_cast %51 : vector<8xf32> to vector<8x1xf32>
    %53 = tpu.reciprocal %52 {approx = true} : vector<8x1xf32> -> vector<8x1xf32>
    %54 = vector.broadcast %53 : vector<8x1xf32> to vector<8x8xf32>
    %55 = arith.mulf %50, %54 : vector<8x8xf32>
    %56 = arith.truncf %55 : vector<8x8xf32> to vector<8x8xbf16>
    %57 = arith.truncf %42 : vector<8x8xf32> to vector<8x8xbf16>
    %cst_32 = arith.constant dense<0.000000e+00> : vector<8x8xf32>
    %58 = tpu.matmul %56, %57, %cst_32 {dimension_numbers = #tpu.dot_dimension_numbers<[1], [0], [0], [1], [0, 0, 1, 1], [], []>} : vector<8x8xbf16>, vector<8x8xbf16>, vector<8x8xf32> -> vector<8x8xf32>
    %c0_33 = arith.constant 0 : index
    %c0_34 = arith.constant 0 : index
    %59 = vector.load %arg23[%c0_33, %c0_34] : memref<16x32xf32, #tpu.memory_space<vmem>>, vector<8x8xf32>
    tpu.vector_store %arg23[%c0_33, %c0_34], %58 {strides = array<i32>} : memref<16x32xf32, #tpu.memory_space<vmem>>, vector<8x8xf32>,
    %c0_35 = arith.constant 0 : index
    %c8 = arith.constant 8 : index
    %60 = vector.load %arg24[%c0_35, %c8] : memref<16x96xf32, #tpu.memory_space<vmem>>, vector<8x8xf32>
    %c0_36 = arith.constant 0 : index
    %c40 = arith.constant 40 : index
    %61 = vector.load %arg24[%c0_36, %c40] : memref<16x96xf32, #tpu.memory_space<vmem>>, vector<8x8xf32>
    %c0_37 = arith.constant 0 : index
    %c72 = arith.constant 72 : index
    %62 = vector.load %arg24[%c0_37, %c72] : memref<16x96xf32, #tpu.memory_space<vmem>>, vector<8x8xf32>
    %63 = arith.truncf %60 : vector<8x8xf32> to vector<8x8xbf16>
    %64 = arith.truncf %61 : vector<8x8xf32> to vector<8x8xbf16>
    %cst_38 = arith.constant dense<0.000000e+00> : vector<8x8xf32>
    %65 = tpu.matmul %63, %64, %cst_38 {dimension_numbers = #tpu.dot_dimension_numbers<[1], [1], [0], [0], [0, 0, 1, 0], [], []>} : vector<8x8xbf16>, vector<8x8xbf16>, vector<8x8xf32> -> vector<8x8xf32>
    %cst_39 = arith.constant dense<0xFF800000> : vector<8xf32>
    %66 = vector.multi_reduction <maximumf>, %65, %cst_39 [1] : vector<8x8xf32> to vector<8xf32>
    %67 = vector.shape_cast %66 : vector<8xf32> to vector<8x1xf32>
    %68 = vector.broadcast %67 : vector<8x1xf32> to vector<8x8xf32>
    %69 = arith.subf %65, %68 : vector<8x8xf32>
    %70 = math.exp %69 : vector<8x8xf32>
    %cst_40 = arith.constant dense<0.000000e+00> : vector<8xf32>
    %71 = vector.multi_reduction <add>, %70, %cst_40 [1] : vector<8x8xf32> to vector<8xf32>
    %72 = vector.shape_cast %71 : vector<8xf32> to vector<8x1xf32>
    %73 = tpu.reciprocal %72 {approx = true} : vector<8x1xf32> -> vector<8x1xf32>
    %74 = vector.broadcast %73 : vector<8x1xf32> to vector<8x8xf32>
    %75 = arith.mulf %70, %74 : vector<8x8xf32>
    %76 = arith.truncf %75 : vector<8x8xf32> to vector<8x8xbf16>
    %77 = arith.truncf %62 : vector<8x8xf32> to vector<8x8xbf16>
    %cst_41 = arith.constant dense<0.000000e+00> : vector<8x8xf32>
    %78 = tpu.matmul %76, %77, %cst_41 {dimension_numbers = #tpu.dot_dimension_numbers<[1], [0], [0], [1], [0, 0, 1, 1], [], []>} : vector<8x8xbf16>, vector<8x8xbf16>, vector<8x8xf32> -> vector<8x8xf32>
    %c0_42 = arith.constant 0 : index
    %c8_43 = arith.constant 8 : index
    %79 = vector.load %arg23[%c0_42, %c8_43] : memref<16x32xf32, #tpu.memory_space<vmem>>, vector<8x8xf32>
    tpu.vector_store %arg23[%c0_42, %c8_43], %78 {strides = array<i32>} : memref<16x32xf32, #tpu.memory_space<vmem>>, vector<8x8xf32>,
    %c0_44 = arith.constant 0 : index
    %c16 = arith.constant 16 : index
    %80 = vector.load %arg24[%c0_44, %c16] : memref<16x96xf32, #tpu.memory_space<vmem>>, vector<8x8xf32>
    %c0_45 = arith.constant 0 : index
    %c48 = arith.constant 48 : index
    %81 = vector.load %arg24[%c0_45, %c48] : memref<16x96xf32, #tpu.memory_space<vmem>>, vector<8x8xf32>
    %c0_46 = arith.constant 0 : index
    %c80 = arith.constant 80 : index
    %82 = vector.load %arg24[%c0_46, %c80] : memref<16x96xf32, #tpu.memory_space<vmem>>, vector<8x8xf32>
    %83 = arith.truncf %80 : vector<8x8xf32> to vector<8x8xbf16>
    %84 = arith.truncf %81 : vector<8x8xf32> to vector<8x8xbf16>
    %cst_47 = arith.constant dense<0.000000e+00> : vector<8x8xf32>
    %85 = tpu.matmul %83, %84, %cst_47 {dimension_numbers = #tpu.dot_dimension_numbers<[1], [1], [0], [0], [0, 0, 1, 0], [], []>} : vector<8x8xbf16>, vector<8x8xbf16>, vector<8x8xf32> -> vector<8x8xf32>
    %cst_48 = arith.constant dense<0xFF800000> : vector<8xf32>
    %86 = vector.multi_reduction <maximumf>, %85, %cst_48 [1] : vector<8x8xf32> to vector<8xf32>
    %87 = vector.shape_cast %86 : vector<8xf32> to vector<8x1xf32>
    %88 = vector.broadcast %87 : vector<8x1xf32> to vector<8x8xf32>
    %89 = arith.subf %85, %88 : vector<8x8xf32>
    %90 = math.exp %89 : vector<8x8xf32>
    %cst_49 = arith.constant dense<0.000000e+00> : vector<8xf32>
    %91 = vector.multi_reduction <add>, %90, %cst_49 [1] : vector<8x8xf32> to vector<8xf32>
    %92 = vector.shape_cast %91 : vector<8xf32> to vector<8x1xf32>
    %93 = tpu.reciprocal %92 {approx = true} : vector<8x1xf32> -> vector<8x1xf32>
    %94 = vector.broadcast %93 : vector<8x1xf32> to vector<8x8xf32>
    %95 = arith.mulf %90, %94 : vector<8x8xf32>
    %96 = arith.truncf %95 : vector<8x8xf32> to vector<8x8xbf16>
    %97 = arith.truncf %82 : vector<8x8xf32> to vector<8x8xbf16>
    %cst_50 = arith.constant dense<0.000000e+00> : vector<8x8xf32>
    %98 = tpu.matmul %96, %97, %cst_50 {dimension_numbers = #tpu.dot_dimension_numbers<[1], [0], [0], [1], [0, 0, 1, 1], [], []>} : vector<8x8xbf16>, vector<8x8xbf16>, vector<8x8xf32> -> vector<8x8xf32>
    %c0_51 = arith.constant 0 : index
    %c16_52 = arith.constant 16 : index
    %99 = vector.load %arg23[%c0_51, %c16_52] : memref<16x32xf32, #tpu.memory_space<vmem>>, vector<8x8xf32>
    tpu.vector_store %arg23[%c0_51, %c16_52], %98 {strides = array<i32>} : memref<16x32xf32, #tpu.memory_space<vmem>>, vector<8x8xf32>,
    %c0_53 = arith.constant 0 : index
    %c24 = arith.constant 24 : index
    %100 = vector.load %arg24[%c0_53, %c24] : memref<16x96xf32, #tpu.memory_space<vmem>>, vector<8x8xf32>
    %c0_54 = arith.constant 0 : index
    %c56 = arith.constant 56 : index
    %101 = vector.load %arg24[%c0_54, %c56] : memref<16x96xf32, #tpu.memory_space<vmem>>, vector<8x8xf32>
    %c0_55 = arith.constant 0 : index
    %c88 = arith.constant 88 : index
    %102 = vector.load %arg24[%c0_55, %c88] : memref<16x96xf32, #tpu.memory_space<vmem>>, vector<8x8xf32>
    %103 = arith.truncf %100 : vector<8x8xf32> to vector<8x8xbf16>
    %104 = arith.truncf %101 : vector<8x8xf32> to vector<8x8xbf16>
    %cst_56 = arith.constant dense<0.000000e+00> : vector<8x8xf32>
    %105 = tpu.matmul %103, %104, %cst_56 {dimension_numbers = #tpu.dot_dimension_numbers<[1], [1], [0], [0], [0, 0, 1, 0], [], []>} : vector<8x8xbf16>, vector<8x8xbf16>, vector<8x8xf32> -> vector<8x8xf32>
    %cst_57 = arith.constant dense<0xFF800000> : vector<8xf32>
    %106 = vector.multi_reduction <maximumf>, %105, %cst_57 [1] : vector<8x8xf32> to vector<8xf32>
    %107 = vector.shape_cast %106 : vector<8xf32> to vector<8x1xf32>
    %108 = vector.broadcast %107 : vector<8x1xf32> to vector<8x8xf32>
    %109 = arith.subf %105, %108 : vector<8x8xf32>
    %110 = math.exp %109 : vector<8x8xf32>
    %cst_58 = arith.constant dense<0.000000e+00> : vector<8xf32>
    %111 = vector.multi_reduction <add>, %110, %cst_58 [1] : vector<8x8xf32> to vector<8xf32>
    %112 = vector.shape_cast %111 : vector<8xf32> to vector<8x1xf32>
    %113 = tpu.reciprocal %112 {approx = true} : vector<8x1xf32> -> vector<8x1xf32>
    %114 = vector.broadcast %113 : vector<8x1xf32> to vector<8x8xf32>
    %115 = arith.mulf %110, %114 : vector<8x8xf32>
    %116 = arith.truncf %115 : vector<8x8xf32> to vector<8x8xbf16>
    %117 = arith.truncf %102 : vector<8x8xf32> to vector<8x8xbf16>
    %cst_59 = arith.constant dense<0.000000e+00> : vector<8x8xf32>
    %118 = tpu.matmul %116, %117, %cst_59 {dimension_numbers = #tpu.dot_dimension_numbers<[1], [0], [0], [1], [0, 0, 1, 1], [], []>} : vector<8x8xbf16>, vector<8x8xbf16>, vector<8x8xf32> -> vector<8x8xf32>
    %c0_60 = arith.constant 0 : index
    %c24_61 = arith.constant 24 : index
    %119 = vector.load %arg23[%c0_60, %c24_61] : memref<16x32xf32, #tpu.memory_space<vmem>>, vector<8x8xf32>
    tpu.vector_store %arg23[%c0_60, %c24_61], %118 {strides = array<i32>} : memref<16x32xf32, #tpu.memory_space<vmem>>, vector<8x8xf32>,
    %c8_62 = arith.constant 8 : index
    %c0_63 = arith.constant 0 : index
    %120 = vector.load %arg24[%c8_62, %c0_63] : memref<16x96xf32, #tpu.memory_space<vmem>>, vector<8x8xf32>
    %c8_64 = arith.constant 8 : index
    %c32_65 = arith.constant 32 : index
    %121 = vector.load %arg24[%c8_64, %c32_65] : memref<16x96xf32, #tpu.memory_space<vmem>>, vector<8x8xf32>
    %c8_66 = arith.constant 8 : index
    %c64_67 = arith.constant 64 : index
    %122 = vector.load %arg24[%c8_66, %c64_67] : memref<16x96xf32, #tpu.memory_space<vmem>>, vector<8x8xf32>
    %123 = arith.truncf %120 : vector<8x8xf32> to vector<8x8xbf16>
    %124 = arith.truncf %121 : vector<8x8xf32> to vector<8x8xbf16>
    %cst_68 = arith.constant dense<0.000000e+00> : vector<8x8xf32>
    %125 = tpu.matmul %123, %124, %cst_68 {dimension_numbers = #tpu.dot_dimension_numbers<[1], [1], [0], [0], [0, 0, 1, 0], [], []>} : vector<8x8xbf16>, vector<8x8xbf16>, vector<8x8xf32> -> vector<8x8xf32>
    %cst_69 = arith.constant dense<0xFF800000> : vector<8xf32>
    %126 = vector.multi_reduction <maximumf>, %125, %cst_69 [1] : vector<8x8xf32> to vector<8xf32>
    %127 = vector.shape_cast %126 : vector<8xf32> to vector<8x1xf32>
    %128 = vector.broadcast %127 : vector<8x1xf32> to vector<8x8xf32>
    %129 = arith.subf %125, %128 : vector<8x8xf32>
    %130 = math.exp %129 : vector<8x8xf32>
    %cst_70 = arith.constant dense<0.000000e+00> : vector<8xf32>
    %131 = vector.multi_reduction <add>, %130, %cst_70 [1] : vector<8x8xf32> to vector<8xf32>
    %132 = vector.shape_cast %131 : vector<8xf32> to vector<8x1xf32>
    %133 = tpu.reciprocal %132 {approx = true} : vector<8x1xf32> -> vector<8x1xf32>
    %134 = vector.broadcast %133 : vector<8x1xf32> to vector<8x8xf32>
    %135 = arith.mulf %130, %134 : vector<8x8xf32>
    %136 = arith.truncf %135 : vector<8x8xf32> to vector<8x8xbf16>
    %137 = arith.truncf %122 : vector<8x8xf32> to vector<8x8xbf16>
    %cst_71 = arith.constant dense<0.000000e+00> : vector<8x8xf32>
    %138 = tpu.matmul %136, %137, %cst_71 {dimension_numbers = #tpu.dot_dimension_numbers<[1], [0], [0], [1], [0, 0, 1, 1], [], []>} : vector<8x8xbf16>, vector<8x8xbf16>, vector<8x8xf32> -> vector<8x8xf32>
    %c8_72 = arith.constant 8 : index
    %c0_73 = arith.constant 0 : index
    %139 = vector.load %arg23[%c8_72, %c0_73] : memref<16x32xf32, #tpu.memory_space<vmem>>, vector<8x8xf32>
    tpu.vector_store %arg23[%c8_72, %c0_73], %138 {strides = array<i32>} : memref<16x32xf32, #tpu.memory_space<vmem>>, vector<8x8xf32>,
    %c8_74 = arith.constant 8 : index
    %c8_75 = arith.constant 8 : index
    %140 = vector.load %arg24[%c8_74, %c8_75] : memref<16x96xf32, #tpu.memory_space<vmem>>, vector<8x8xf32>
    %c8_76 = arith.constant 8 : index
    %c40_77 = arith.constant 40 : index
    %141 = vector.load %arg24[%c8_76, %c40_77] : memref<16x96xf32, #tpu.memory_space<vmem>>, vector<8x8xf32>
    %c8_78 = arith.constant 8 : index
    %c72_79 = arith.constant 72 : index
    %142 = vector.load %arg24[%c8_78, %c72_79] : memref<16x96xf32, #tpu.memory_space<vmem>>, vector<8x8xf32>
    %143 = arith.truncf %140 : vector<8x8xf32> to vector<8x8xbf16>
    %144 = arith.truncf %141 : vector<8x8xf32> to vector<8x8xbf16>
    %cst_80 = arith.constant dense<0.000000e+00> : vector<8x8xf32>
    %145 = tpu.matmul %143, %144, %cst_80 {dimension_numbers = #tpu.dot_dimension_numbers<[1], [1], [0], [0], [0, 0, 1, 0], [], []>} : vector<8x8xbf16>, vector<8x8xbf16>, vector<8x8xf32> -> vector<8x8xf32>
    %cst_81 = arith.constant dense<0xFF800000> : vector<8xf32>
    %146 = vector.multi_reduction <maximumf>, %145, %cst_81 [1] : vector<8x8xf32> to vector<8xf32>
    %147 = vector.shape_cast %146 : vector<8xf32> to vector<8x1xf32>
    %148 = vector.broadcast %147 : vector<8x1xf32> to vector<8x8xf32>
    %149 = arith.subf %145, %148 : vector<8x8xf32>
    %150 = math.exp %149 : vector<8x8xf32>
    %cst_82 = arith.constant dense<0.000000e+00> : vector<8xf32>
    %151 = vector.multi_reduction <add>, %150, %cst_82 [1] : vector<8x8xf32> to vector<8xf32>
    %152 = vector.shape_cast %151 : vector<8xf32> to vector<8x1xf32>
    %153 = tpu.reciprocal %152 {approx = true} : vector<8x1xf32> -> vector<8x1xf32>
    %154 = vector.broadcast %153 : vector<8x1xf32> to vector<8x8xf32>
    %155 = arith.mulf %150, %154 : vector<8x8xf32>
    %156 = arith.truncf %155 : vector<8x8xf32> to vector<8x8xbf16>
    %157 = arith.truncf %142 : vector<8x8xf32> to vector<8x8xbf16>
    %cst_83 = arith.constant dense<0.000000e+00> : vector<8x8xf32>
    %158 = tpu.matmul %156, %157, %cst_83 {dimension_numbers = #tpu.dot_dimension_numbers<[1], [0], [0], [1], [0, 0, 1, 1], [], []>} : vector<8x8xbf16>, vector<8x8xbf16>, vector<8x8xf32> -> vector<8x8xf32>
    %c8_84 = arith.constant 8 : index
    %c8_85 = arith.constant 8 : index
    %159 = vector.load %arg23[%c8_84, %c8_85] : memref<16x32xf32, #tpu.memory_space<vmem>>, vector<8x8xf32>
    tpu.vector_store %arg23[%c8_84, %c8_85], %158 {strides = array<i32>} : memref<16x32xf32, #tpu.memory_space<vmem>>, vector<8x8xf32>,
    %c8_86 = arith.constant 8 : index
    %c16_87 = arith.constant 16 : index
    %160 = vector.load %arg24[%c8_86, %c16_87] : memref<16x96xf32, #tpu.memory_space<vmem>>, vector<8x8xf32>
    %c8_88 = arith.constant 8 : index
    %c48_89 = arith.constant 48 : index
    %161 = vector.load %arg24[%c8_88, %c48_89] : memref<16x96xf32, #tpu.memory_space<vmem>>, vector<8x8xf32>
    %c8_90 = arith.constant 8 : index
    %c80_91 = arith.constant 80 : index
    %162 = vector.load %arg24[%c8_90, %c80_91] : memref<16x96xf32, #tpu.memory_space<vmem>>, vector<8x8xf32>
    %163 = arith.truncf %160 : vector<8x8xf32> to vector<8x8xbf16>
    %164 = arith.truncf %161 : vector<8x8xf32> to vector<8x8xbf16>
    %cst_92 = arith.constant dense<0.000000e+00> : vector<8x8xf32>
    %165 = tpu.matmul %163, %164, %cst_92 {dimension_numbers = #tpu.dot_dimension_numbers<[1], [1], [0], [0], [0, 0, 1, 0], [], []>} : vector<8x8xbf16>, vector<8x8xbf16>, vector<8x8xf32> -> vector<8x8xf32>
    %cst_93 = arith.constant dense<0xFF800000> : vector<8xf32>
    %166 = vector.multi_reduction <maximumf>, %165, %cst_93 [1] : vector<8x8xf32> to vector<8xf32>
    %167 = vector.shape_cast %166 : vector<8xf32> to vector<8x1xf32>
    %168 = vector.broadcast %167 : vector<8x1xf32> to vector<8x8xf32>
    %169 = arith.subf %165, %168 : vector<8x8xf32>
    %170 = math.exp %169 : vector<8x8xf32>
    %cst_94 = arith.constant dense<0.000000e+00> : vector<8xf32>
    %171 = vector.multi_reduction <add>, %170, %cst_94 [1] : vector<8x8xf32> to vector<8xf32>
    %172 = vector.shape_cast %171 : vector<8xf32> to vector<8x1xf32>
    %173 = tpu.reciprocal %172 {approx = true} : vector<8x1xf32> -> vector<8x1xf32>
    %174 = vector.broadcast %173 : vector<8x1xf32> to vector<8x8xf32>
    %175 = arith.mulf %170, %174 : vector<8x8xf32>
    %176 = arith.truncf %175 : vector<8x8xf32> to vector<8x8xbf16>
    %177 = arith.truncf %162 : vector<8x8xf32> to vector<8x8xbf16>
    %cst_95 = arith.constant dense<0.000000e+00> : vector<8x8xf32>
    %178 = tpu.matmul %176, %177, %cst_95 {dimension_numbers = #tpu.dot_dimension_numbers<[1], [0], [0], [1], [0, 0, 1, 1], [], []>} : vector<8x8xbf16>, vector<8x8xbf16>, vector<8x8xf32> -> vector<8x8xf32>
    %c8_96 = arith.constant 8 : index
    %c16_97 = arith.constant 16 : index
    %179 = vector.load %arg23[%c8_96, %c16_97] : memref<16x32xf32, #tpu.memory_space<vmem>>, vector<8x8xf32>
    tpu.vector_store %arg23[%c8_96, %c16_97], %178 {strides = array<i32>} : memref<16x32xf32, #tpu.memory_space<vmem>>, vector<8x8xf32>,
    %c8_98 = arith.constant 8 : index
    %c24_99 = arith.constant 24 : index
    %180 = vector.load %arg24[%c8_98, %c24_99] : memref<16x96xf32, #tpu.memory_space<vmem>>, vector<8x8xf32>
    %c8_100 = arith.constant 8 : index
    %c56_101 = arith.constant 56 : index
    %181 = vector.load %arg24[%c8_100, %c56_101] : memref<16x96xf32, #tpu.memory_space<vmem>>, vector<8x8xf32>
    %c8_102 = arith.constant 8 : index
    %c88_103 = arith.constant 88 : index
    %182 = vector.load %arg24[%c8_102, %c88_103] : memref<16x96xf32, #tpu.memory_space<vmem>>, vector<8x8xf32>
    %183 = arith.truncf %180 : vector<8x8xf32> to vector<8x8xbf16>
    %184 = arith.truncf %181 : vector<8x8xf32> to vector<8x8xbf16>
    %cst_104 = arith.constant dense<0.000000e+00> : vector<8x8xf32>
    %185 = tpu.matmul %183, %184, %cst_104 {dimension_numbers = #tpu.dot_dimension_numbers<[1], [1], [0], [0], [0, 0, 1, 0], [], []>} : vector<8x8xbf16>, vector<8x8xbf16>, vector<8x8xf32> -> vector<8x8xf32>
    %cst_105 = arith.constant dense<0xFF800000> : vector<8xf32>
    %186 = vector.multi_reduction <maximumf>, %185, %cst_105 [1] : vector<8x8xf32> to vector<8xf32>
    %187 = vector.shape_cast %186 : vector<8xf32> to vector<8x1xf32>
    %188 = vector.broadcast %187 : vector<8x1xf32> to vector<8x8xf32>
    %189 = arith.subf %185, %188 : vector<8x8xf32>
    %190 = math.exp %189 : vector<8x8xf32>
    %cst_106 = arith.constant dense<0.000000e+00> : vector<8xf32>
    %191 = vector.multi_reduction <add>, %190, %cst_106 [1] : vector<8x8xf32> to vector<8xf32>
    %192 = vector.shape_cast %191 : vector<8xf32> to vector<8x1xf32>
    %193 = tpu.reciprocal %192 {approx = true} : vector<8x1xf32> -> vector<8x1xf32>
    %194 = vector.broadcast %193 : vector<8x1xf32> to vector<8x8xf32>
    %195 = arith.mulf %190, %194 : vector<8x8xf32>
    %196 = arith.truncf %195 : vector<8x8xf32> to vector<8x8xbf16>
    %197 = arith.truncf %182 : vector<8x8xf32> to vector<8x8xbf16>
    %cst_107 = arith.constant dense<0.000000e+00> : vector<8x8xf32>
    %198 = tpu.matmul %196, %197, %cst_107 {dimension_numbers = #tpu.dot_dimension_numbers<[1], [0], [0], [1], [0, 0, 1, 1], [], []>} : vector<8x8xbf16>, vector<8x8xbf16>, vector<8x8xf32> -> vector<8x8xf32>
    %c8_108 = arith.constant 8 : index
    %c24_109 = arith.constant 24 : index
    %199 = vector.load %arg23[%c8_108, %c24_109] : memref<16x32xf32, #tpu.memory_space<vmem>>, vector<8x8xf32>
    tpu.vector_store %arg23[%c8_108, %c24_109], %198 {strides = array<i32>} : memref<16x32xf32, #tpu.memory_space<vmem>>, vector<8x8xf32>,
    %c0_110 = arith.constant 0 : index
    %c0_111 = arith.constant 0 : index
    %200 = vector.load %arg23[%c0_110, %c0_111] : memref<16x32xf32, #tpu.memory_space<vmem>>, vector<16x32xf32>
    %c0_112 = arith.constant 0 : index
    %c0_113 = arith.constant 0 : index
    %c0_114 = arith.constant 0 : index
    %201 = vector.load %arg8[%c0_112, %c0_113, %c0_114] : memref<2x32x32xbf16, #tpu.memory_space<vmem>>, vector<1x32x32xbf16>
    %202 = vector.shape_cast %201 : vector<1x32x32xbf16> to vector<32x32xbf16>
    %203 = arith.truncf %200 : vector<16x32xf32> to vector<16x32xbf16>
    %cst_115 = arith.constant dense<0.000000e+00> : vector<16x32xf32>
    %204 = tpu.matmul %203, %202, %cst_115 {dimension_numbers = #tpu.dot_dimension_numbers<[1], [0], [0], [1], [0, 0, 1, 1], [], []>} : vector<16x32xbf16>, vector<32x32xbf16>, vector<16x32xf32> -> vector<16x32xf32>
    %c0_116 = arith.constant 0 : index
    %c0_117 = arith.constant 0 : index
    %c0_118 = arith.constant 0 : index
    %205 = vector.load %arg9[%c0_116, %c0_117, %c0_118] : memref<2x1x32xf32, #tpu.memory_space<vmem>>, vector<1x1x32xf32>
    %206 = vector.shape_cast %205 : vector<1x1x32xf32> to vector<1x32xf32>
    %207 = vector.broadcast %206 : vector<1x32xf32> to vector<16x32xf32>
    %208 = arith.addf %204, %207 : vector<16x32xf32>
    %209 = arith.addf %208, %30 : vector<16x32xf32>
    %c0_119 = arith.constant 0 : index
    %c0_120 = arith.constant 0 : index
    %c0_121 = arith.constant 0 : index
    %210 = vector.load %arg14[%c0_119, %c0_120, %c0_121] : memref<2x1x32xf32, #tpu.memory_space<vmem>>, vector<1x1x32xf32>
    %211 = vector.shape_cast %210 : vector<1x1x32xf32> to vector<1x32xf32>
    %c0_122 = arith.constant 0 : index
    %c0_123 = arith.constant 0 : index
    %c0_124 = arith.constant 0 : index
    %212 = vector.load %arg15[%c0_122, %c0_123, %c0_124] : memref<2x1x32xf32, #tpu.memory_space<vmem>>, vector<1x1x32xf32>
    %213 = vector.shape_cast %212 : vector<1x1x32xf32> to vector<1x32xf32>
    %cst_125 = arith.constant dense<0.000000e+00> : vector<16xf32>
    %214 = vector.multi_reduction <add>, %209, %cst_125 [1] : vector<16x32xf32> to vector<16xf32>
    %215 = vector.shape_cast %214 : vector<16xf32> to vector<16x1xf32>
    %cst_126 = arith.constant 3.200000e+01 : f32
    %216 = vector.broadcast %cst_126 : f32 to vector<16x1xf32>
    %217 = arith.divf %215, %216 : vector<16x1xf32>
    %218 = vector.broadcast %217 : vector<16x1xf32> to vector<16x32xf32>
    %219 = arith.subf %209, %218 : vector<16x32xf32>
    %220 = arith.mulf %219, %219 : vector<16x32xf32>
    %cst_127 = arith.constant dense<0.000000e+00> : vector<16xf32>
    %221 = vector.multi_reduction <add>, %220, %cst_127 [1] : vector<16x32xf32> to vector<16xf32>
    %222 = vector.shape_cast %221 : vector<16xf32> to vector<16x1xf32>
    %cst_128 = arith.constant 3.200000e+01 : f32
    %223 = vector.broadcast %cst_128 : f32 to vector<16x1xf32>
    %224 = arith.divf %222, %223 : vector<16x1xf32>
    %225 = vector.broadcast %217 : vector<16x1xf32> to vector<16x32xf32>
    %226 = arith.subf %209, %225 : vector<16x32xf32>
    %cst_129 = arith.constant 9.99999974E-6 : f32
    %227 = vector.broadcast %cst_129 : f32 to vector<16x1xf32>
    %228 = arith.addf %224, %227 : vector<16x1xf32>
    %229 = math.rsqrt %228 : vector<16x1xf32>
    %230 = vector.broadcast %229 : vector<16x1xf32> to vector<16x32xf32>
    %231 = arith.mulf %226, %230 : vector<16x32xf32>
    %232 = vector.broadcast %211 : vector<1x32xf32> to vector<16x32xf32>
    %233 = arith.mulf %231, %232 : vector<16x32xf32>
    %234 = vector.broadcast %213 : vector<1x32xf32> to vector<16x32xf32>
    %235 = arith.addf %233, %234 : vector<16x32xf32>
    %c0_130 = arith.constant 0 : index
    %c0_131 = arith.constant 0 : index
    %c0_132 = arith.constant 0 : index
    %236 = vector.load %arg10[%c0_130, %c0_131, %c0_132] : memref<2x32x2048xbf16, #tpu.memory_space<vmem>>, vector<1x32x2048xbf16>
    %237 = vector.shape_cast %236 : vector<1x32x2048xbf16> to vector<32x2048xbf16>
    %238 = arith.truncf %235 : vector<16x32xf32> to vector<16x32xbf16>
    %cst_133 = arith.constant dense<0.000000e+00> : vector<16x2048xf32>
    %239 = tpu.matmul %238, %237, %cst_133 {dimension_numbers = #tpu.dot_dimension_numbers<[1], [0], [0], [1], [0, 0, 1, 1], [], []>} : vector<16x32xbf16>, vector<32x2048xbf16>, vector<16x2048xf32> -> vector<16x2048xf32>
    %c0_134 = arith.constant 0 : index
    %c0_135 = arith.constant 0 : index
    %c0_136 = arith.constant 0 : index
    %240 = vector.load %arg11[%c0_134, %c0_135, %c0_136] : memref<2x1x2048xf32, #tpu.memory_space<vmem>>, vector<1x1x2048xf32>
    %241 = vector.shape_cast %240 : vector<1x1x2048xf32> to vector<1x2048xf32>
    %242 = vector.broadcast %241 : vector<1x2048xf32> to vector<16x2048xf32>
    %243 = arith.addf %239, %242 : vector<16x2048xf32>
    %cst_137 = arith.constant 0.000000e+00 : f32
    %244 = vector.broadcast %cst_137 : f32 to vector<16x2048xf32>
    %245 = arith.maximumf %243, %244 : vector<16x2048xf32>
    %c0_138 = arith.constant 0 : index
    %c0_139 = arith.constant 0 : index
    %c0_140 = arith.constant 0 : index
    %246 = vector.load %arg12[%c0_138, %c0_139, %c0_140] : memref<2x2048x32xbf16, #tpu.memory_space<vmem>>, vector<1x2048x32xbf16>
    %247 = vector.shape_cast %246 : vector<1x2048x32xbf16> to vector<2048x32xbf16>
    %248 = arith.truncf %245 : vector<16x2048xf32> to vector<16x2048xbf16>
    %cst_141 = arith.constant dense<0.000000e+00> : vector<16x32xf32>
    %249 = tpu.matmul %248, %247, %cst_141 {dimension_numbers = #tpu.dot_dimension_numbers<[1], [0], [0], [1], [0, 0, 1, 1], [], []>} : vector<16x2048xbf16>, vector<2048x32xbf16>, vector<16x32xf32> -> vector<16x32xf32>
    %c0_142 = arith.constant 0 : index
    %c0_143 = arith.constant 0 : index
    %c0_144 = arith.constant 0 : index
    %250 = vector.load %arg13[%c0_142, %c0_143, %c0_144] : memref<2x1x32xf32, #tpu.memory_space<vmem>>, vector<1x1x32xf32>
    %251 = vector.shape_cast %250 : vector<1x1x32xf32> to vector<1x32xf32>
    %252 = vector.broadcast %251 : vector<1x32xf32> to vector<16x32xf32>
    %253 = arith.addf %249, %252 : vector<16x32xf32>
    %254 = arith.addf %253, %235 : vector<16x32xf32>
    %c0_145 = arith.constant 0 : index
    %c0_146 = arith.constant 0 : index
    %c0_147 = arith.constant 0 : index
    %255 = vector.load %arg16[%c0_145, %c0_146, %c0_147] : memref<2x1x32xf32, #tpu.memory_space<vmem>>, vector<1x1x32xf32>
    %256 = vector.shape_cast %255 : vector<1x1x32xf32> to vector<1x32xf32>
    %c0_148 = arith.constant 0 : index
    %c0_149 = arith.constant 0 : index
    %c0_150 = arith.constant 0 : index
    %257 = vector.load %arg17[%c0_148, %c0_149, %c0_150] : memref<2x1x32xf32, #tpu.memory_space<vmem>>, vector<1x1x32xf32>
    %258 = vector.shape_cast %257 : vector<1x1x32xf32> to vector<1x32xf32>
    %cst_151 = arith.constant dense<0.000000e+00> : vector<16xf32>
    %259 = vector.multi_reduction <add>, %254, %cst_151 [1] : vector<16x32xf32> to vector<16xf32>
    %260 = vector.shape_cast %259 : vector<16xf32> to vector<16x1xf32>
    %cst_152 = arith.constant 3.200000e+01 : f32
    %261 = vector.broadcast %cst_152 : f32 to vector<16x1xf32>
    %262 = arith.divf %260, %261 : vector<16x1xf32>
    %263 = vector.broadcast %262 : vector<16x1xf32> to vector<16x32xf32>
    %264 = arith.subf %254, %263 : vector<16x32xf32>
    %265 = arith.mulf %264, %264 : vector<16x32xf32>
    %cst_153 = arith.constant dense<0.000000e+00> : vector<16xf32>
    %266 = vector.multi_reduction <add>, %265, %cst_153 [1] : vector<16x32xf32> to vector<16xf32>
    %267 = vector.shape_cast %266 : vector<16xf32> to vector<16x1xf32>
    %cst_154 = arith.constant 3.200000e+01 : f32
    %268 = vector.broadcast %cst_154 : f32 to vector<16x1xf32>
    %269 = arith.divf %267, %268 : vector<16x1xf32>
    %270 = vector.broadcast %262 : vector<16x1xf32> to vector<16x32xf32>
    %271 = arith.subf %254, %270 : vector<16x32xf32>
    %cst_155 = arith.constant 9.99999974E-6 : f32
    %272 = vector.broadcast %cst_155 : f32 to vector<16x1xf32>
    %273 = arith.addf %269, %272 : vector<16x1xf32>
    %274 = math.rsqrt %273 : vector<16x1xf32>
    %275 = vector.broadcast %274 : vector<16x1xf32> to vector<16x32xf32>
    %276 = arith.mulf %271, %275 : vector<16x32xf32>
    %277 = vector.broadcast %256 : vector<1x32xf32> to vector<16x32xf32>
    %278 = arith.mulf %276, %277 : vector<16x32xf32>
    %279 = vector.broadcast %258 : vector<1x32xf32> to vector<16x32xf32>
    %280 = arith.addf %278, %279 : vector<16x32xf32>
    %c1 = arith.constant 1 : index
    %c0_156 = arith.constant 0 : index
    %c0_157 = arith.constant 0 : index
    %281 = vector.load %arg6[%c1, %c0_156, %c0_157] : memref<2x32x96xbf16, #tpu.memory_space<vmem>>, vector<1x32x96xbf16>
    %282 = vector.shape_cast %281 : vector<1x32x96xbf16> to vector<32x96xbf16>
    %283 = arith.truncf %280 : vector<16x32xf32> to vector<16x32xbf16>
    %cst_158 = arith.constant dense<0.000000e+00> : vector<16x96xf32>
    %284 = tpu.matmul %283, %282, %cst_158 {dimension_numbers = #tpu.dot_dimension_numbers<[1], [0], [0], [1], [0, 0, 1, 1], [], []>} : vector<16x32xbf16>, vector<32x96xbf16>, vector<16x96xf32> -> vector<16x96xf32>
    %c1_159 = arith.constant 1 : index
    %c0_160 = arith.constant 0 : index
    %c0_161 = arith.constant 0 : index
    %285 = vector.load %arg7[%c1_159, %c0_160, %c0_161] : memref<2x1x96xf32, #tpu.memory_space<vmem>>, vector<1x1x96xf32>
    %286 = vector.shape_cast %285 : vector<1x1x96xf32> to vector<1x96xf32>
    %287 = vector.broadcast %286 : vector<1x96xf32> to vector<16x96xf32>
    %288 = arith.addf %284, %287 : vector<16x96xf32>
    %c0_162 = arith.constant 0 : index
    %c0_163 = arith.constant 0 : index
    %289 = vector.load %arg24[%c0_162, %c0_163] : memref<16x96xf32, #tpu.memory_space<vmem>>, vector<16x96xf32>
    tpu.vector_store %arg24[%c0_162, %c0_163], %288 {strides = array<i32>} : memref<16x96xf32, #tpu.memory_space<vmem>>, vector<16x96xf32>,
    %c0_164 = arith.constant 0 : index
    %c0_165 = arith.constant 0 : index
    %290 = vector.load %arg24[%c0_164, %c0_165] : memref<16x96xf32, #tpu.memory_space<vmem>>, vector<8x8xf32>
    %c0_166 = arith.constant 0 : index
    %c32_167 = arith.constant 32 : index
    %291 = vector.load %arg24[%c0_166, %c32_167] : memref<16x96xf32, #tpu.memory_space<vmem>>, vector<8x8xf32>
    %c0_168 = arith.constant 0 : index
    %c64_169 = arith.constant 64 : index
    %292 = vector.load %arg24[%c0_168, %c64_169] : memref<16x96xf32, #tpu.memory_space<vmem>>, vector<8x8xf32>
    %293 = arith.truncf %290 : vector<8x8xf32> to vector<8x8xbf16>
    %294 = arith.truncf %291 : vector<8x8xf32> to vector<8x8xbf16>
    %cst_170 = arith.constant dense<0.000000e+00> : vector<8x8xf32>
    %295 = tpu.matmul %293, %294, %cst_170 {dimension_numbers = #tpu.dot_dimension_numbers<[1], [1], [0], [0], [0, 0, 1, 0], [], []>} : vector<8x8xbf16>, vector<8x8xbf16>, vector<8x8xf32> -> vector<8x8xf32>
    %cst_171 = arith.constant dense<0xFF800000> : vector<8xf32>
    %296 = vector.multi_reduction <maximumf>, %295, %cst_171 [1] : vector<8x8xf32> to vector<8xf32>
    %297 = vector.shape_cast %296 : vector<8xf32> to vector<8x1xf32>
    %298 = vector.broadcast %297 : vector<8x1xf32> to vector<8x8xf32>
    %299 = arith.subf %295, %298 : vector<8x8xf32>
    %300 = math.exp %299 : vector<8x8xf32>
    %cst_172 = arith.constant dense<0.000000e+00> : vector<8xf32>
    %301 = vector.multi_reduction <add>, %300, %cst_172 [1] : vector<8x8xf32> to vector<8xf32>
    %302 = vector.shape_cast %301 : vector<8xf32> to vector<8x1xf32>
    %303 = tpu.reciprocal %302 {approx = true} : vector<8x1xf32> -> vector<8x1xf32>
    %304 = vector.broadcast %303 : vector<8x1xf32> to vector<8x8xf32>
    %305 = arith.mulf %300, %304 : vector<8x8xf32>
    %306 = arith.truncf %305 : vector<8x8xf32> to vector<8x8xbf16>
    %307 = arith.truncf %292 : vector<8x8xf32> to vector<8x8xbf16>
    %cst_173 = arith.constant dense<0.000000e+00> : vector<8x8xf32>
    %308 = tpu.matmul %306, %307, %cst_173 {dimension_numbers = #tpu.dot_dimension_numbers<[1], [0], [0], [1], [0, 0, 1, 1], [], []>} : vector<8x8xbf16>, vector<8x8xbf16>, vector<8x8xf32> -> vector<8x8xf32>
    %c0_174 = arith.constant 0 : index
    %c0_175 = arith.constant 0 : index
    %309 = vector.load %arg23[%c0_174, %c0_175] : memref<16x32xf32, #tpu.memory_space<vmem>>, vector<8x8xf32>
    tpu.vector_store %arg23[%c0_174, %c0_175], %308 {strides = array<i32>} : memref<16x32xf32, #tpu.memory_space<vmem>>, vector<8x8xf32>,
    %c0_176 = arith.constant 0 : index
    %c8_177 = arith.constant 8 : index
    %310 = vector.load %arg24[%c0_176, %c8_177] : memref<16x96xf32, #tpu.memory_space<vmem>>, vector<8x8xf32>
    %c0_178 = arith.constant 0 : index
    %c40_179 = arith.constant 40 : index
    %311 = vector.load %arg24[%c0_178, %c40_179] : memref<16x96xf32, #tpu.memory_space<vmem>>, vector<8x8xf32>
    %c0_180 = arith.constant 0 : index
    %c72_181 = arith.constant 72 : index
    %312 = vector.load %arg24[%c0_180, %c72_181] : memref<16x96xf32, #tpu.memory_space<vmem>>, vector<8x8xf32>
    %313 = arith.truncf %310 : vector<8x8xf32> to vector<8x8xbf16>
    %314 = arith.truncf %311 : vector<8x8xf32> to vector<8x8xbf16>
    %cst_182 = arith.constant dense<0.000000e+00> : vector<8x8xf32>
    %315 = tpu.matmul %313, %314, %cst_182 {dimension_numbers = #tpu.dot_dimension_numbers<[1], [1], [0], [0], [0, 0, 1, 0], [], []>} : vector<8x8xbf16>, vector<8x8xbf16>, vector<8x8xf32> -> vector<8x8xf32>
    %cst_183 = arith.constant dense<0xFF800000> : vector<8xf32>
    %316 = vector.multi_reduction <maximumf>, %315, %cst_183 [1] : vector<8x8xf32> to vector<8xf32>
    %317 = vector.shape_cast %316 : vector<8xf32> to vector<8x1xf32>
    %318 = vector.broadcast %317 : vector<8x1xf32> to vector<8x8xf32>
    %319 = arith.subf %315, %318 : vector<8x8xf32>
    %320 = math.exp %319 : vector<8x8xf32>
    %cst_184 = arith.constant dense<0.000000e+00> : vector<8xf32>
    %321 = vector.multi_reduction <add>, %320, %cst_184 [1] : vector<8x8xf32> to vector<8xf32>
    %322 = vector.shape_cast %321 : vector<8xf32> to vector<8x1xf32>
    %323 = tpu.reciprocal %322 {approx = true} : vector<8x1xf32> -> vector<8x1xf32>
    %324 = vector.broadcast %323 : vector<8x1xf32> to vector<8x8xf32>
    %325 = arith.mulf %320, %324 : vector<8x8xf32>
    %326 = arith.truncf %325 : vector<8x8xf32> to vector<8x8xbf16>
    %327 = arith.truncf %312 : vector<8x8xf32> to vector<8x8xbf16>
    %cst_185 = arith.constant dense<0.000000e+00> : vector<8x8xf32>
    %328 = tpu.matmul %326, %327, %cst_185 {dimension_numbers = #tpu.dot_dimension_numbers<[1], [0], [0], [1], [0, 0, 1, 1], [], []>} : vector<8x8xbf16>, vector<8x8xbf16>, vector<8x8xf32> -> vector<8x8xf32>
    %c0_186 = arith.constant 0 : index
    %c8_187 = arith.constant 8 : index
    %329 = vector.load %arg23[%c0_186, %c8_187] : memref<16x32xf32, #tpu.memory_space<vmem>>, vector<8x8xf32>
    tpu.vector_store %arg23[%c0_186, %c8_187], %328 {strides = array<i32>} : memref<16x32xf32, #tpu.memory_space<vmem>>, vector<8x8xf32>,
    %c0_188 = arith.constant 0 : index
    %c16_189 = arith.constant 16 : index
    %330 = vector.load %arg24[%c0_188, %c16_189] : memref<16x96xf32, #tpu.memory_space<vmem>>, vector<8x8xf32>
    %c0_190 = arith.constant 0 : index
    %c48_191 = arith.constant 48 : index
    %331 = vector.load %arg24[%c0_190, %c48_191] : memref<16x96xf32, #tpu.memory_space<vmem>>, vector<8x8xf32>
    %c0_192 = arith.constant 0 : index
    %c80_193 = arith.constant 80 : index
    %332 = vector.load %arg24[%c0_192, %c80_193] : memref<16x96xf32, #tpu.memory_space<vmem>>, vector<8x8xf32>
    %333 = arith.truncf %330 : vector<8x8xf32> to vector<8x8xbf16>
    %334 = arith.truncf %331 : vector<8x8xf32> to vector<8x8xbf16>
    %cst_194 = arith.constant dense<0.000000e+00> : vector<8x8xf32>
    %335 = tpu.matmul %333, %334, %cst_194 {dimension_numbers = #tpu.dot_dimension_numbers<[1], [1], [0], [0], [0, 0, 1, 0], [], []>} : vector<8x8xbf16>, vector<8x8xbf16>, vector<8x8xf32> -> vector<8x8xf32>
    %cst_195 = arith.constant dense<0xFF800000> : vector<8xf32>
    %336 = vector.multi_reduction <maximumf>, %335, %cst_195 [1] : vector<8x8xf32> to vector<8xf32>
    %337 = vector.shape_cast %336 : vector<8xf32> to vector<8x1xf32>
    %338 = vector.broadcast %337 : vector<8x1xf32> to vector<8x8xf32>
    %339 = arith.subf %335, %338 : vector<8x8xf32>
    %340 = math.exp %339 : vector<8x8xf32>
    %cst_196 = arith.constant dense<0.000000e+00> : vector<8xf32>
    %341 = vector.multi_reduction <add>, %340, %cst_196 [1] : vector<8x8xf32> to vector<8xf32>
    %342 = vector.shape_cast %341 : vector<8xf32> to vector<8x1xf32>
    %343 = tpu.reciprocal %342 {approx = true} : vector<8x1xf32> -> vector<8x1xf32>
    %344 = vector.broadcast %343 : vector<8x1xf32> to vector<8x8xf32>
    %345 = arith.mulf %340, %344 : vector<8x8xf32>
    %346 = arith.truncf %345 : vector<8x8xf32> to vector<8x8xbf16>
    %347 = arith.truncf %332 : vector<8x8xf32> to vector<8x8xbf16>
    %cst_197 = arith.constant dense<0.000000e+00> : vector<8x8xf32>
    %348 = tpu.matmul %346, %347, %cst_197 {dimension_numbers = #tpu.dot_dimension_numbers<[1], [0], [0], [1], [0, 0, 1, 1], [], []>} : vector<8x8xbf16>, vector<8x8xbf16>, vector<8x8xf32> -> vector<8x8xf32>
    %c0_198 = arith.constant 0 : index
    %c16_199 = arith.constant 16 : index
    %349 = vector.load %arg23[%c0_198, %c16_199] : memref<16x32xf32, #tpu.memory_space<vmem>>, vector<8x8xf32>
    tpu.vector_store %arg23[%c0_198, %c16_199], %348 {strides = array<i32>} : memref<16x32xf32, #tpu.memory_space<vmem>>, vector<8x8xf32>,
    %c0_200 = arith.constant 0 : index
    %c24_201 = arith.constant 24 : index
    %350 = vector.load %arg24[%c0_200, %c24_201] : memref<16x96xf32, #tpu.memory_space<vmem>>, vector<8x8xf32>
    %c0_202 = arith.constant 0 : index
    %c56_203 = arith.constant 56 : index
    %351 = vector.load %arg24[%c0_202, %c56_203] : memref<16x96xf32, #tpu.memory_space<vmem>>, vector<8x8xf32>
    %c0_204 = arith.constant 0 : index
    %c88_205 = arith.constant 88 : index
    %352 = vector.load %arg24[%c0_204, %c88_205] : memref<16x96xf32, #tpu.memory_space<vmem>>, vector<8x8xf32>
    %353 = arith.truncf %350 : vector<8x8xf32> to vector<8x8xbf16>
    %354 = arith.truncf %351 : vector<8x8xf32> to vector<8x8xbf16>
    %cst_206 = arith.constant dense<0.000000e+00> : vector<8x8xf32>
    %355 = tpu.matmul %353, %354, %cst_206 {dimension_numbers = #tpu.dot_dimension_numbers<[1], [1], [0], [0], [0, 0, 1, 0], [], []>} : vector<8x8xbf16>, vector<8x8xbf16>, vector<8x8xf32> -> vector<8x8xf32>
    %cst_207 = arith.constant dense<0xFF800000> : vector<8xf32>
    %356 = vector.multi_reduction <maximumf>, %355, %cst_207 [1] : vector<8x8xf32> to vector<8xf32>
    %357 = vector.shape_cast %356 : vector<8xf32> to vector<8x1xf32>
    %358 = vector.broadcast %357 : vector<8x1xf32> to vector<8x8xf32>
    %359 = arith.subf %355, %358 : vector<8x8xf32>
    %360 = math.exp %359 : vector<8x8xf32>
    %cst_208 = arith.constant dense<0.000000e+00> : vector<8xf32>
    %361 = vector.multi_reduction <add>, %360, %cst_208 [1] : vector<8x8xf32> to vector<8xf32>
    %362 = vector.shape_cast %361 : vector<8xf32> to vector<8x1xf32>
    %363 = tpu.reciprocal %362 {approx = true} : vector<8x1xf32> -> vector<8x1xf32>
    %364 = vector.broadcast %363 : vector<8x1xf32> to vector<8x8xf32>
    %365 = arith.mulf %360, %364 : vector<8x8xf32>
    %366 = arith.truncf %365 : vector<8x8xf32> to vector<8x8xbf16>
    %367 = arith.truncf %352 : vector<8x8xf32> to vector<8x8xbf16>
    %cst_209 = arith.constant dense<0.000000e+00> : vector<8x8xf32>
    %368 = tpu.matmul %366, %367, %cst_209 {dimension_numbers = #tpu.dot_dimension_numbers<[1], [0], [0], [1], [0, 0, 1, 1], [], []>} : vector<8x8xbf16>, vector<8x8xbf16>, vector<8x8xf32> -> vector<8x8xf32>
    %c0_210 = arith.constant 0 : index
    %c24_211 = arith.constant 24 : index
    %369 = vector.load %arg23[%c0_210, %c24_211] : memref<16x32xf32, #tpu.memory_space<vmem>>, vector<8x8xf32>
    tpu.vector_store %arg23[%c0_210, %c24_211], %368 {strides = array<i32>} : memref<16x32xf32, #tpu.memory_space<vmem>>, vector<8x8xf32>,
    %c8_212 = arith.constant 8 : index
    %c0_213 = arith.constant 0 : index
    %370 = vector.load %arg24[%c8_212, %c0_213] : memref<16x96xf32, #tpu.memory_space<vmem>>, vector<8x8xf32>
    %c8_214 = arith.constant 8 : index
    %c32_215 = arith.constant 32 : index
    %371 = vector.load %arg24[%c8_214, %c32_215] : memref<16x96xf32, #tpu.memory_space<vmem>>, vector<8x8xf32>
    %c8_216 = arith.constant 8 : index
    %c64_217 = arith.constant 64 : index
    %372 = vector.load %arg24[%c8_216, %c64_217] : memref<16x96xf32, #tpu.memory_space<vmem>>, vector<8x8xf32>
    %373 = arith.truncf %370 : vector<8x8xf32> to vector<8x8xbf16>
    %374 = arith.truncf %371 : vector<8x8xf32> to vector<8x8xbf16>
    %cst_218 = arith.constant dense<0.000000e+00> : vector<8x8xf32>
    %375 = tpu.matmul %373, %374, %cst_218 {dimension_numbers = #tpu.dot_dimension_numbers<[1], [1], [0], [0], [0, 0, 1, 0], [], []>} : vector<8x8xbf16>, vector<8x8xbf16>, vector<8x8xf32> -> vector<8x8xf32>
    %cst_219 = arith.constant dense<0xFF800000> : vector<8xf32>
    %376 = vector.multi_reduction <maximumf>, %375, %cst_219 [1] : vector<8x8xf32> to vector<8xf32>
    %377 = vector.shape_cast %376 : vector<8xf32> to vector<8x1xf32>
    %378 = vector.broadcast %377 : vector<8x1xf32> to vector<8x8xf32>
    %379 = arith.subf %375, %378 : vector<8x8xf32>
    %380 = math.exp %379 : vector<8x8xf32>
    %cst_220 = arith.constant dense<0.000000e+00> : vector<8xf32>
    %381 = vector.multi_reduction <add>, %380, %cst_220 [1] : vector<8x8xf32> to vector<8xf32>
    %382 = vector.shape_cast %381 : vector<8xf32> to vector<8x1xf32>
    %383 = tpu.reciprocal %382 {approx = true} : vector<8x1xf32> -> vector<8x1xf32>
    %384 = vector.broadcast %383 : vector<8x1xf32> to vector<8x8xf32>
    %385 = arith.mulf %380, %384 : vector<8x8xf32>
    %386 = arith.truncf %385 : vector<8x8xf32> to vector<8x8xbf16>
    %387 = arith.truncf %372 : vector<8x8xf32> to vector<8x8xbf16>
    %cst_221 = arith.constant dense<0.000000e+00> : vector<8x8xf32>
    %388 = tpu.matmul %386, %387, %cst_221 {dimension_numbers = #tpu.dot_dimension_numbers<[1], [0], [0], [1], [0, 0, 1, 1], [], []>} : vector<8x8xbf16>, vector<8x8xbf16>, vector<8x8xf32> -> vector<8x8xf32>
    %c8_222 = arith.constant 8 : index
    %c0_223 = arith.constant 0 : index
    %389 = vector.load %arg23[%c8_222, %c0_223] : memref<16x32xf32, #tpu.memory_space<vmem>>, vector<8x8xf32>
    tpu.vector_store %arg23[%c8_222, %c0_223], %388 {strides = array<i32>} : memref<16x32xf32, #tpu.memory_space<vmem>>, vector<8x8xf32>,
    %c8_224 = arith.constant 8 : index
    %c8_225 = arith.constant 8 : index
    %390 = vector.load %arg24[%c8_224, %c8_225] : memref<16x96xf32, #tpu.memory_space<vmem>>, vector<8x8xf32>
    %c8_226 = arith.constant 8 : index
    %c40_227 = arith.constant 40 : index
    %391 = vector.load %arg24[%c8_226, %c40_227] : memref<16x96xf32, #tpu.memory_space<vmem>>, vector<8x8xf32>
    %c8_228 = arith.constant 8 : index
    %c72_229 = arith.constant 72 : index
    %392 = vector.load %arg24[%c8_228, %c72_229] : memref<16x96xf32, #tpu.memory_space<vmem>>, vector<8x8xf32>
    %393 = arith.truncf %390 : vector<8x8xf32> to vector<8x8xbf16>
    %394 = arith.truncf %391 : vector<8x8xf32> to vector<8x8xbf16>
    %cst_230 = arith.constant dense<0.000000e+00> : vector<8x8xf32>
    %395 = tpu.matmul %393, %394, %cst_230 {dimension_numbers = #tpu.dot_dimension_numbers<[1], [1], [0], [0], [0, 0, 1, 0], [], []>} : vector<8x8xbf16>, vector<8x8xbf16>, vector<8x8xf32> -> vector<8x8xf32>
    %cst_231 = arith.constant dense<0xFF800000> : vector<8xf32>
    %396 = vector.multi_reduction <maximumf>, %395, %cst_231 [1] : vector<8x8xf32> to vector<8xf32>
    %397 = vector.shape_cast %396 : vector<8xf32> to vector<8x1xf32>
    %398 = vector.broadcast %397 : vector<8x1xf32> to vector<8x8xf32>
    %399 = arith.subf %395, %398 : vector<8x8xf32>
    %400 = math.exp %399 : vector<8x8xf32>
    %cst_232 = arith.constant dense<0.000000e+00> : vector<8xf32>
    %401 = vector.multi_reduction <add>, %400, %cst_232 [1] : vector<8x8xf32> to vector<8xf32>
    %402 = vector.shape_cast %401 : vector<8xf32> to vector<8x1xf32>
    %403 = tpu.reciprocal %402 {approx = true} : vector<8x1xf32> -> vector<8x1xf32>
    %404 = vector.broadcast %403 : vector<8x1xf32> to vector<8x8xf32>
    %405 = arith.mulf %400, %404 : vector<8x8xf32>
    %406 = arith.truncf %405 : vector<8x8xf32> to vector<8x8xbf16>
    %407 = arith.truncf %392 : vector<8x8xf32> to vector<8x8xbf16>
    %cst_233 = arith.constant dense<0.000000e+00> : vector<8x8xf32>
    %408 = tpu.matmul %406, %407, %cst_233 {dimension_numbers = #tpu.dot_dimension_numbers<[1], [0], [0], [1], [0, 0, 1, 1], [], []>} : vector<8x8xbf16>, vector<8x8xbf16>, vector<8x8xf32> -> vector<8x8xf32>
    %c8_234 = arith.constant 8 : index
    %c8_235 = arith.constant 8 : index
    %409 = vector.load %arg23[%c8_234, %c8_235] : memref<16x32xf32, #tpu.memory_space<vmem>>, vector<8x8xf32>
    tpu.vector_store %arg23[%c8_234, %c8_235], %408 {strides = array<i32>} : memref<16x32xf32, #tpu.memory_space<vmem>>, vector<8x8xf32>,
    %c8_236 = arith.constant 8 : index
    %c16_237 = arith.constant 16 : index
    %410 = vector.load %arg24[%c8_236, %c16_237] : memref<16x96xf32, #tpu.memory_space<vmem>>, vector<8x8xf32>
    %c8_238 = arith.constant 8 : index
    %c48_239 = arith.constant 48 : index
    %411 = vector.load %arg24[%c8_238, %c48_239] : memref<16x96xf32, #tpu.memory_space<vmem>>, vector<8x8xf32>
    %c8_240 = arith.constant 8 : index
    %c80_241 = arith.constant 80 : index
    %412 = vector.load %arg24[%c8_240, %c80_241] : memref<16x96xf32, #tpu.memory_space<vmem>>, vector<8x8xf32>
    %413 = arith.truncf %410 : vector<8x8xf32> to vector<8x8xbf16>
    %414 = arith.truncf %411 : vector<8x8xf32> to vector<8x8xbf16>
    %cst_242 = arith.constant dense<0.000000e+00> : vector<8x8xf32>
    %415 = tpu.matmul %413, %414, %cst_242 {dimension_numbers = #tpu.dot_dimension_numbers<[1], [1], [0], [0], [0, 0, 1, 0], [], []>} : vector<8x8xbf16>, vector<8x8xbf16>, vector<8x8xf32> -> vector<8x8xf32>
    %cst_243 = arith.constant dense<0xFF800000> : vector<8xf32>
    %416 = vector.multi_reduction <maximumf>, %415, %cst_243 [1] : vector<8x8xf32> to vector<8xf32>
    %417 = vector.shape_cast %416 : vector<8xf32> to vector<8x1xf32>
    %418 = vector.broadcast %417 : vector<8x1xf32> to vector<8x8xf32>
    %419 = arith.subf %415, %418 : vector<8x8xf32>
    %420 = math.exp %419 : vector<8x8xf32>
    %cst_244 = arith.constant dense<0.000000e+00> : vector<8xf32>
    %421 = vector.multi_reduction <add>, %420, %cst_244 [1] : vector<8x8xf32> to vector<8xf32>
    %422 = vector.shape_cast %421 : vector<8xf32> to vector<8x1xf32>
    %423 = tpu.reciprocal %422 {approx = true} : vector<8x1xf32> -> vector<8x1xf32>
    %424 = vector.broadcast %423 : vector<8x1xf32> to vector<8x8xf32>
    %425 = arith.mulf %420, %424 : vector<8x8xf32>
    %426 = arith.truncf %425 : vector<8x8xf32> to vector<8x8xbf16>
    %427 = arith.truncf %412 : vector<8x8xf32> to vector<8x8xbf16>
    %cst_245 = arith.constant dense<0.000000e+00> : vector<8x8xf32>
    %428 = tpu.matmul %426, %427, %cst_245 {dimension_numbers = #tpu.dot_dimension_numbers<[1], [0], [0], [1], [0, 0, 1, 1], [], []>} : vector<8x8xbf16>, vector<8x8xbf16>, vector<8x8xf32> -> vector<8x8xf32>
    %c8_246 = arith.constant 8 : index
    %c16_247 = arith.constant 16 : index
    %429 = vector.load %arg23[%c8_246, %c16_247] : memref<16x32xf32, #tpu.memory_space<vmem>>, vector<8x8xf32>
    tpu.vector_store %arg23[%c8_246, %c16_247], %428 {strides = array<i32>} : memref<16x32xf32, #tpu.memory_space<vmem>>, vector<8x8xf32>,
    %c8_248 = arith.constant 8 : index
    %c24_249 = arith.constant 24 : index
    %430 = vector.load %arg24[%c8_248, %c24_249] : memref<16x96xf32, #tpu.memory_space<vmem>>, vector<8x8xf32>
    %c8_250 = arith.constant 8 : index
    %c56_251 = arith.constant 56 : index
    %431 = vector.load %arg24[%c8_250, %c56_251] : memref<16x96xf32, #tpu.memory_space<vmem>>, vector<8x8xf32>
    %c8_252 = arith.constant 8 : index
    %c88_253 = arith.constant 88 : index
    %432 = vector.load %arg24[%c8_252, %c88_253] : memref<16x96xf32, #tpu.memory_space<vmem>>, vector<8x8xf32>
    %433 = arith.truncf %430 : vector<8x8xf32> to vector<8x8xbf16>
    %434 = arith.truncf %431 : vector<8x8xf32> to vector<8x8xbf16>
    %cst_254 = arith.constant dense<0.000000e+00> : vector<8x8xf32>
    %435 = tpu.matmul %433, %434, %cst_254 {dimension_numbers = #tpu.dot_dimension_numbers<[1], [1], [0], [0], [0, 0, 1, 0], [], []>} : vector<8x8xbf16>, vector<8x8xbf16>, vector<8x8xf32> -> vector<8x8xf32>
    %cst_255 = arith.constant dense<0xFF800000> : vector<8xf32>
    %436 = vector.multi_reduction <maximumf>, %435, %cst_255 [1] : vector<8x8xf32> to vector<8xf32>
    %437 = vector.shape_cast %436 : vector<8xf32> to vector<8x1xf32>
    %438 = vector.broadcast %437 : vector<8x1xf32> to vector<8x8xf32>
    %439 = arith.subf %435, %438 : vector<8x8xf32>
    %440 = math.exp %439 : vector<8x8xf32>
    %cst_256 = arith.constant dense<0.000000e+00> : vector<8xf32>
    %441 = vector.multi_reduction <add>, %440, %cst_256 [1] : vector<8x8xf32> to vector<8xf32>
    %442 = vector.shape_cast %441 : vector<8xf32> to vector<8x1xf32>
    %443 = tpu.reciprocal %442 {approx = true} : vector<8x1xf32> -> vector<8x1xf32>
    %444 = vector.broadcast %443 : vector<8x1xf32> to vector<8x8xf32>
    %445 = arith.mulf %440, %444 : vector<8x8xf32>
    %446 = arith.truncf %445 : vector<8x8xf32> to vector<8x8xbf16>
    %447 = arith.truncf %432 : vector<8x8xf32> to vector<8x8xbf16>
    %cst_257 = arith.constant dense<0.000000e+00> : vector<8x8xf32>
    %448 = tpu.matmul %446, %447, %cst_257 {dimension_numbers = #tpu.dot_dimension_numbers<[1], [0], [0], [1], [0, 0, 1, 1], [], []>} : vector<8x8xbf16>, vector<8x8xbf16>, vector<8x8xf32> -> vector<8x8xf32>
    %c8_258 = arith.constant 8 : index
    %c24_259 = arith.constant 24 : index
    %449 = vector.load %arg23[%c8_258, %c24_259] : memref<16x32xf32, #tpu.memory_space<vmem>>, vector<8x8xf32>
    tpu.vector_store %arg23[%c8_258, %c24_259], %448 {strides = array<i32>} : memref<16x32xf32, #tpu.memory_space<vmem>>, vector<8x8xf32>,
    %c0_260 = arith.constant 0 : index
    %c0_261 = arith.constant 0 : index
    %450 = vector.load %arg23[%c0_260, %c0_261] : memref<16x32xf32, #tpu.memory_space<vmem>>, vector<16x32xf32>
    %c1_262 = arith.constant 1 : index
    %c0_263 = arith.constant 0 : index
    %c0_264 = arith.constant 0 : index
    %451 = vector.load %arg8[%c1_262, %c0_263, %c0_264] : memref<2x32x32xbf16, #tpu.memory_space<vmem>>, vector<1x32x32xbf16>
    %452 = vector.shape_cast %451 : vector<1x32x32xbf16> to vector<32x32xbf16>
    %453 = arith.truncf %450 : vector<16x32xf32> to vector<16x32xbf16>
    %cst_265 = arith.constant dense<0.000000e+00> : vector<16x32xf32>
    %454 = tpu.matmul %453, %452, %cst_265 {dimension_numbers = #tpu.dot_dimension_numbers<[1], [0], [0], [1], [0, 0, 1, 1], [], []>} : vector<16x32xbf16>, vector<32x32xbf16>, vector<16x32xf32> -> vector<16x32xf32>
    %c1_266 = arith.constant 1 : index
    %c0_267 = arith.constant 0 : index
    %c0_268 = arith.constant 0 : index
    %455 = vector.load %arg9[%c1_266, %c0_267, %c0_268] : memref<2x1x32xf32, #tpu.memory_space<vmem>>, vector<1x1x32xf32>
    %456 = vector.shape_cast %455 : vector<1x1x32xf32> to vector<1x32xf32>
    %457 = vector.broadcast %456 : vector<1x32xf32> to vector<16x32xf32>
    %458 = arith.addf %454, %457 : vector<16x32xf32>
    %459 = arith.addf %458, %280 : vector<16x32xf32>
    %c1_269 = arith.constant 1 : index
    %c0_270 = arith.constant 0 : index
    %c0_271 = arith.constant 0 : index
    %460 = vector.load %arg14[%c1_269, %c0_270, %c0_271] : memref<2x1x32xf32, #tpu.memory_space<vmem>>, vector<1x1x32xf32>
    %461 = vector.shape_cast %460 : vector<1x1x32xf32> to vector<1x32xf32>
    %c1_272 = arith.constant 1 : index
    %c0_273 = arith.constant 0 : index
    %c0_274 = arith.constant 0 : index
    %462 = vector.load %arg15[%c1_272, %c0_273, %c0_274] : memref<2x1x32xf32, #tpu.memory_space<vmem>>, vector<1x1x32xf32>
    %463 = vector.shape_cast %462 : vector<1x1x32xf32> to vector<1x32xf32>
    %cst_275 = arith.constant dense<0.000000e+00> : vector<16xf32>
    %464 = vector.multi_reduction <add>, %459, %cst_275 [1] : vector<16x32xf32> to vector<16xf32>
    %465 = vector.shape_cast %464 : vector<16xf32> to vector<16x1xf32>
    %cst_276 = arith.constant 3.200000e+01 : f32
    %466 = vector.broadcast %cst_276 : f32 to vector<16x1xf32>
    %467 = arith.divf %465, %466 : vector<16x1xf32>
    %468 = vector.broadcast %467 : vector<16x1xf32> to vector<16x32xf32>
    %469 = arith.subf %459, %468 : vector<16x32xf32>
    %470 = arith.mulf %469, %469 : vector<16x32xf32>
    %cst_277 = arith.constant dense<0.000000e+00> : vector<16xf32>
    %471 = vector.multi_reduction <add>, %470, %cst_277 [1] : vector<16x32xf32> to vector<16xf32>
    %472 = vector.shape_cast %471 : vector<16xf32> to vector<16x1xf32>
    %cst_278 = arith.constant 3.200000e+01 : f32
    %473 = vector.broadcast %cst_278 : f32 to vector<16x1xf32>
    %474 = arith.divf %472, %473 : vector<16x1xf32>
    %475 = vector.broadcast %467 : vector<16x1xf32> to vector<16x32xf32>
    %476 = arith.subf %459, %475 : vector<16x32xf32>
    %cst_279 = arith.constant 9.99999974E-6 : f32
    %477 = vector.broadcast %cst_279 : f32 to vector<16x1xf32>
    %478 = arith.addf %474, %477 : vector<16x1xf32>
    %479 = math.rsqrt %478 : vector<16x1xf32>
    %480 = vector.broadcast %479 : vector<16x1xf32> to vector<16x32xf32>
    %481 = arith.mulf %476, %480 : vector<16x32xf32>
    %482 = vector.broadcast %461 : vector<1x32xf32> to vector<16x32xf32>
    %483 = arith.mulf %481, %482 : vector<16x32xf32>
    %484 = vector.broadcast %463 : vector<1x32xf32> to vector<16x32xf32>
    %485 = arith.addf %483, %484 : vector<16x32xf32>
    %c1_280 = arith.constant 1 : index
    %c0_281 = arith.constant 0 : index
    %c0_282 = arith.constant 0 : index
    %486 = vector.load %arg10[%c1_280, %c0_281, %c0_282] : memref<2x32x2048xbf16, #tpu.memory_space<vmem>>, vector<1x32x2048xbf16>
    %487 = vector.shape_cast %486 : vector<1x32x2048xbf16> to vector<32x2048xbf16>
    %488 = arith.truncf %485 : vector<16x32xf32> to vector<16x32xbf16>
    %cst_283 = arith.constant dense<0.000000e+00> : vector<16x2048xf32>
    %489 = tpu.matmul %488, %487, %cst_283 {dimension_numbers = #tpu.dot_dimension_numbers<[1], [0], [0], [1], [0, 0, 1, 1], [], []>} : vector<16x32xbf16>, vector<32x2048xbf16>, vector<16x2048xf32> -> vector<16x2048xf32>
    %c1_284 = arith.constant 1 : index
    %c0_285 = arith.constant 0 : index
    %c0_286 = arith.constant 0 : index
    %490 = vector.load %arg11[%c1_284, %c0_285, %c0_286] : memref<2x1x2048xf32, #tpu.memory_space<vmem>>, vector<1x1x2048xf32>
    %491 = vector.shape_cast %490 : vector<1x1x2048xf32> to vector<1x2048xf32>
    %492 = vector.broadcast %491 : vector<1x2048xf32> to vector<16x2048xf32>
    %493 = arith.addf %489, %492 : vector<16x2048xf32>
    %cst_287 = arith.constant 0.000000e+00 : f32
    %494 = vector.broadcast %cst_287 : f32 to vector<16x2048xf32>
    %495 = arith.maximumf %493, %494 : vector<16x2048xf32>
    %c1_288 = arith.constant 1 : index
    %c0_289 = arith.constant 0 : index
    %c0_290 = arith.constant 0 : index
    %496 = vector.load %arg12[%c1_288, %c0_289, %c0_290] : memref<2x2048x32xbf16, #tpu.memory_space<vmem>>, vector<1x2048x32xbf16>
    %497 = vector.shape_cast %496 : vector<1x2048x32xbf16> to vector<2048x32xbf16>
    %498 = arith.truncf %495 : vector<16x2048xf32> to vector<16x2048xbf16>
    %cst_291 = arith.constant dense<0.000000e+00> : vector<16x32xf32>
    %499 = tpu.matmul %498, %497, %cst_291 {dimension_numbers = #tpu.dot_dimension_numbers<[1], [0], [0], [1], [0, 0, 1, 1], [], []>} : vector<16x2048xbf16>, vector<2048x32xbf16>, vector<16x32xf32> -> vector<16x32xf32>
    %c1_292 = arith.constant 1 : index
    %c0_293 = arith.constant 0 : index
    %c0_294 = arith.constant 0 : index
    %500 = vector.load %arg13[%c1_292, %c0_293, %c0_294] : memref<2x1x32xf32, #tpu.memory_space<vmem>>, vector<1x1x32xf32>
    %501 = vector.shape_cast %500 : vector<1x1x32xf32> to vector<1x32xf32>
    %502 = vector.broadcast %501 : vector<1x32xf32> to vector<16x32xf32>
    %503 = arith.addf %499, %502 : vector<16x32xf32>
    %504 = arith.addf %503, %485 : vector<16x32xf32>
    %c1_295 = arith.constant 1 : index
    %c0_296 = arith.constant 0 : index
    %c0_297 = arith.constant 0 : index
    %505 = vector.load %arg16[%c1_295, %c0_296, %c0_297] : memref<2x1x32xf32, #tpu.memory_space<vmem>>, vector<1x1x32xf32>
    %506 = vector.shape_cast %505 : vector<1x1x32xf32> to vector<1x32xf32>
    %c1_298 = arith.constant 1 : index
    %c0_299 = arith.constant 0 : index
    %c0_300 = arith.constant 0 : index
    %507 = vector.load %arg17[%c1_298, %c0_299, %c0_300] : memref<2x1x32xf32, #tpu.memory_space<vmem>>, vector<1x1x32xf32>
    %508 = vector.shape_cast %507 : vector<1x1x32xf32> to vector<1x32xf32>
    %cst_301 = arith.constant dense<0.000000e+00> : vector<16xf32>
    %509 = vector.multi_reduction <add>, %504, %cst_301 [1] : vector<16x32xf32> to vector<16xf32>
    %510 = vector.shape_cast %509 : vector<16xf32> to vector<16x1xf32>
    %cst_302 = arith.constant 3.200000e+01 : f32
    %511 = vector.broadcast %cst_302 : f32 to vector<16x1xf32>
    %512 = arith.divf %510, %511 : vector<16x1xf32>
    %513 = vector.broadcast %512 : vector<16x1xf32> to vector<16x32xf32>
    %514 = arith.subf %504, %513 : vector<16x32xf32>
    %515 = arith.mulf %514, %514 : vector<16x32xf32>
    %cst_303 = arith.constant dense<0.000000e+00> : vector<16xf32>
    %516 = vector.multi_reduction <add>, %515, %cst_303 [1] : vector<16x32xf32> to vector<16xf32>
    %517 = vector.shape_cast %516 : vector<16xf32> to vector<16x1xf32>
    %cst_304 = arith.constant 3.200000e+01 : f32
    %518 = vector.broadcast %cst_304 : f32 to vector<16x1xf32>
    %519 = arith.divf %517, %518 : vector<16x1xf32>
    %520 = vector.broadcast %512 : vector<16x1xf32> to vector<16x32xf32>
    %521 = arith.subf %504, %520 : vector<16x32xf32>
    %cst_305 = arith.constant 9.99999974E-6 : f32
    %522 = vector.broadcast %cst_305 : f32 to vector<16x1xf32>
    %523 = arith.addf %519, %522 : vector<16x1xf32>
    %524 = math.rsqrt %523 : vector<16x1xf32>
    %525 = vector.broadcast %524 : vector<16x1xf32> to vector<16x32xf32>
    %526 = arith.mulf %521, %525 : vector<16x32xf32>
    %527 = vector.broadcast %506 : vector<1x32xf32> to vector<16x32xf32>
    %528 = arith.mulf %526, %527 : vector<16x32xf32>
    %529 = vector.broadcast %508 : vector<1x32xf32> to vector<16x32xf32>
    %530 = arith.addf %528, %529 : vector<16x32xf32>
    %c0_306 = arith.constant 0 : index
    %c0_307 = arith.constant 0 : index
    %531 = vector.load %arg18[%c0_306, %c0_307] : memref<1x32xf32, #tpu.memory_space<vmem>>, vector<1x32xf32>
    %c0_308 = arith.constant 0 : index
    %c0_309 = arith.constant 0 : index
    %532 = vector.load %arg19[%c0_308, %c0_309] : memref<1x32xf32, #tpu.memory_space<vmem>>, vector<1x32xf32>
    %cst_310 = arith.constant dense<0.000000e+00> : vector<16xf32>
    %533 = vector.multi_reduction <add>, %530, %cst_310 [1] : vector<16x32xf32> to vector<16xf32>
    %534 = vector.shape_cast %533 : vector<16xf32> to vector<16x1xf32>
    %cst_311 = arith.constant 3.200000e+01 : f32
    %535 = vector.broadcast %cst_311 : f32 to vector<16x1xf32>
    %536 = arith.divf %534, %535 : vector<16x1xf32>
    %537 = vector.broadcast %536 : vector<16x1xf32> to vector<16x32xf32>
    %538 = arith.subf %530, %537 : vector<16x32xf32>
    %539 = arith.mulf %538, %538 : vector<16x32xf32>
    %cst_312 = arith.constant dense<0.000000e+00> : vector<16xf32>
    %540 = vector.multi_reduction <add>, %539, %cst_312 [1] : vector<16x32xf32> to vector<16xf32>
    %541 = vector.shape_cast %540 : vector<16xf32> to vector<16x1xf32>
    %cst_313 = arith.constant 3.200000e+01 : f32
    %542 = vector.broadcast %cst_313 : f32 to vector<16x1xf32>
    %543 = arith.divf %541, %542 : vector<16x1xf32>
    %544 = vector.broadcast %536 : vector<16x1xf32> to vector<16x32xf32>
    %545 = arith.subf %530, %544 : vector<16x32xf32>
    %cst_314 = arith.constant 9.99999974E-6 : f32
    %546 = vector.broadcast %cst_314 : f32 to vector<16x1xf32>
    %547 = arith.addf %543, %546 : vector<16x1xf32>
    %548 = math.rsqrt %547 : vector<16x1xf32>
    %549 = vector.broadcast %548 : vector<16x1xf32> to vector<16x32xf32>
    %550 = arith.mulf %545, %549 : vector<16x32xf32>
    %551 = vector.broadcast %531 : vector<1x32xf32> to vector<16x32xf32>
    %552 = arith.mulf %550, %551 : vector<16x32xf32>
    %553 = vector.broadcast %532 : vector<1x32xf32> to vector<16x32xf32>
    %554 = arith.addf %552, %553 : vector<16x32xf32>
    %cst_315 = arith.constant 3.000000e+00 : f32
    %555 = vector.broadcast %cst_315 : f32 to vector<16x32xf32>
    %556 = arith.addf %554, %555 : vector<16x32xf32>
    %cst_316 = arith.constant 0.000000e+00 : f32
    %cst_317 = arith.constant 6.000000e+00 : f32
    %557 = vector.broadcast %cst_316 : f32 to vector<16x32xf32>
    %558 = arith.maximumf %557, %556 : vector<16x32xf32>
    %559 = vector.broadcast %cst_317 : f32 to vector<16x32xf32>
    %560 = arith.minimumf %559, %558 : vector<16x32xf32>
    %561 = arith.mulf %554, %560 : vector<16x32xf32>
    %cst_318 = arith.constant 0.166666672 : f32
    %562 = vector.broadcast %cst_318 : f32 to vector<16x32xf32>
    %563 = arith.mulf %561, %562 : vector<16x32xf32>
    %cst_319 = arith.constant 3.000000e+00 : f32
    %564 = vector.broadcast %cst_319 : f32 to vector<16x32xf32>
    %565 = arith.addf %563, %564 : vector<16x32xf32>
    %cst_320 = arith.constant 0.000000e+00 : f32
    %cst_321 = arith.constant 6.000000e+00 : f32
    %566 = vector.broadcast %cst_320 : f32 to vector<16x32xf32>
    %567 = arith.maximumf %566, %565 : vector<16x32xf32>
    %568 = vector.broadcast %cst_321 : f32 to vector<16x32xf32>
    %569 = arith.minimumf %568, %567 : vector<16x32xf32>
    %570 = arith.mulf %563, %569 : vector<16x32xf32>
    %cst_322 = arith.constant 0.166666672 : f32
    %571 = vector.broadcast %cst_322 : f32 to vector<16x32xf32>
    %572 = arith.mulf %570, %571 : vector<16x32xf32>
    %c0_323 = arith.constant 0 : index
    %c0_324 = arith.constant 0 : index
    %573 = vector.load %arg20[%c0_323, %c0_324] : memref<32x128xbf16, #tpu.memory_space<vmem>>, vector<32x128xbf16>
    %574 = arith.truncf %572 : vector<16x32xf32> to vector<16x32xbf16>
    %cst_325 = arith.constant dense<0.000000e+00> : vector<16x128xf32>
    %575 = tpu.matmul %574, %573, %cst_325 {dimension_numbers = #tpu.dot_dimension_numbers<[1], [0], [0], [1], [0, 0, 1, 1], [], []>} : vector<16x32xbf16>, vector<32x128xbf16>, vector<16x128xf32> -> vector<16x128xf32>
    %c0_326 = arith.constant 0 : index
    %c0_327 = arith.constant 0 : index
    %576 = vector.load %arg21[%c0_326, %c0_327] : memref<1x128xf32, #tpu.memory_space<vmem>>, vector<1x128xf32>
    %577 = vector.broadcast %576 : vector<1x128xf32> to vector<16x128xf32>
    %578 = arith.addf %575, %577 : vector<16x128xf32>
    %c0_328 = arith.constant 0 : index
    %c0_329 = arith.constant 0 : index
    %579 = vector.load %arg22[%c0_328, %c0_329] : memref<16x128xf32, #tpu.memory_space<vmem>>, vector<16x128xf32>
    tpu.vector_store %arg22[%c0_328, %c0_329], %578 {strides = array<i32>} : memref<16x128xf32, #tpu.memory_space<vmem>>, vector<16x128xf32>,
    return
  }
}

</mosaic_0001>

<bundles_post_ra>
// kernel: _lambda_.1
= control target key start
LH: loop header
LB: loop body
LE: loop exit
PB: predicated region body
PF: predicated region fallthrough
CT: control target
= control target key end

     0   :  { %vm87_vm0 = vcmask 1040384   ;;  %v8751_v0 = vmov 0.0   ;;  %vm8752_vm1 = vmmov 0   ;;  %vm83_vm2 = vcmask 15360   ;;  %s8753_s25 = smov 126   ;;  %s8762_s26 = smov 120   ;;  %s10727_s1 = inlined_call_operand.vmem [shape: f32[16,32], index: 1, kind: input, shape index: {}]   ;;  %s10728_s2 = inlined_call_operand.vmem [shape: bf16[2,32], index: 2, kind: input, shape index: {}]   ;;  %s10729_s0 = inlined_call_operand.vmem [shape: f32[16,4], index: 0, kind: input, shape index: {}]   ;;  %s10730_s4 = inlined_call_operand.vmem [shape: bf16[2,32], index: 4, kind: input, shape index: {}]   ;;  %s10731_s3 = inlined_call_operand.vmem [shape: f32[1,32], index: 3, kind: input, shape index: {}]   ;;  %s10732_s6 = inlined_call_operand.vmem [shape: bf16[2,32,96], index: 6, kind: input, shape index: {}]   ;;  %s10733_s5 = inlined_call_operand.vmem [shape: f32[1,32], index: 5, kind: input, shape index: {}]   ;;  %s10734_s7 = inlined_call_operand.vmem [shape: f32[2,1,96], index: 7, kind: input, shape index: {}]   ;;  %s10735_s8 = inlined_call_operand.vmem [shape: bf16[2,32,32], index: 8, kind: input, shape index: {}]   ;;  %s10736_s9 = inlined_call_operand.vmem [shape: f32[2,1,32], index: 9, kind: input, shape index: {}]   ;;  %s10737_s10 = inlined_call_operand.vmem [shape: bf16[2,32,2048], index: 10, kind: input, shape index: {}]   ;;  %s10738_s12 = inlined_call_operand.vmem [shape: bf16[2,2048,32], index: 12, kind: input, shape index: {}]   ;;  %s10739_s14 = inlined_call_operand.vmem [shape: f32[2,1,32], index: 14, kind: input, shape index: {}]   ;;  %s10740_s15 = inlined_call_operand.vmem [shape: f32[2,1,32], index: 15, kind: input, shape index: {}]   ;;  %s10741_s11 = inlined_call_operand.vmem [shape: f32[2,1,2048], index: 11, kind: input, shape index: {}]   ;;  %s10742_s13 = inlined_call_operand.vmem [shape: f32[2,1,32], index: 13, kind: input, shape index: {}]   ;;  %s10743_s16 = inlined_call_operand.vmem [shape: f32[2,1,32], index: 16, kind: input, shape index: {}]   ;;  %s10744_s17 = inlined_call_operand.vmem [shape: f32[2,1,32], index: 17, kind: input, shape index: {}]   ;;  %s10745_s20 = inlined_call_operand.vmem [shape: bf16[32,128], index: 20, kind: input, shape index: {}]   ;;  %s10746_s18 = inlined_call_operand.vmem [shape: f32[1,32], index: 18, kind: input, shape index: {}]   ;;  %s10747_s19 = inlined_call_operand.vmem [shape: f32[1,32], index: 19, kind: input, shape index: {}]   ;;  %s10748_s21 = inlined_call_operand.vmem [shape: f32[1,128], index: 21, kind: input, shape index: {}]   ;;  %s10749_s22 = inlined_call_operand.vmem [shape: f32[16,128], index: 22, kind: output, shape index: {}]  }
   0x1   :  { %10772 = sst [smem:[#allocation4_spill]] %s10728_s2  ;;  %8117 = vmatprep.subr.bf16.mxu0 %v8751_v0  ;;  %8119 = vmatprep.mubr.msk.bf16.mxu0 %vm8752_vm1, %v8751_v0  ;;  %v8754_v37 = vmov 2102212464   ;;  %v8755_v39 = vmov 920167782   ;;  %s10766_s28 = smov 104  }
   0x2   :  { %10773 = sst [smem:[#allocation5_spill]] %s10729_s0  ;;  %s10778_s29 = sld [smem:[#allocation4_spill]]  ;;  %8123 = vmatprep.subr.bf16.mxu1 %v8751_v0  ;;  %8125 = vmatprep.mubr.msk.bf16.mxu1 %vm8752_vm1, %v8751_v0  ;;  %v8756_v44 = vmov 683565275   ;;  %v8757_v47 = vmov 1326507024  }
   0x3   :  { %10774 = sst [smem:[#allocation6_spill]] %s10730_s4  ;;  %s10779_s1 = sld [smem:[#allocation5_spill]]  ;;  %v8758_v49 = vmov 2475754826   ;;  %v8759_v59 = vmov 2131351028  }
   0x4   :  { %10775 = sst [smem:[#allocation7_spill]] %s10731_s3  ;;  %s8763_s0 = smov 80  }
   0x5   :  { %10776 = sst [smem:[#allocation8_spill]] %s10732_s6  ;;  %s10781_s27 = sld [smem:[#allocation7_spill]] }
   0x6   :  { %10777 = sst [smem:[#allocation9_spill]] %s10733_s5  ;;  %s10780_s5 = sld [smem:[#allocation6_spill]] }
   0x7   :  { %s10783_s2 = sld [smem:[#allocation9_spill]]  ;;  %s10768_s4 = smov 72  }
   0x8   :  { %v74_v1 = vld [vmem:[%s10778_s29] sm:$0x1]  ;;  %s10782_s29 = sld [smem:[#allocation8_spill]]  ;;  %s10758_s30 = smov 56  }
   0x9   :  { %v72_v2 = vld [vmem:[%s10779_s1] sm:$0xff]  ;;  %v73_v3 = vld [vmem:[%s10779_s1 + $0x8] sm:$0xff]  ;;  %v89_v4 = vsel %vm87_vm0, %v74_v1, 0  ;;  %s10756_s3 = smov 64   ;;  %s10754_s1 = smov 48  }
   0xa   :  { %v75_v5 = vpack.c.bf16 %v73_v3, %v72_v2  ;;  %8118 = vmatpush3.bf16.msra.mxu0 %v89_v4  ;;  %s10752_s23 = smov 40   ;;  %s10762_s6 = smov 16  }
   0xb   :  { %8129 = vmatprep.subr.bf16.mxu0 %v8751_v0  ;;  %v6965_v9 = vld [vmem:[%s10781_s27] ss:$0 sm:$0xff]  ;;  %s10770_s27 = smov 112   ;;  %s10760_s24 = smov 24  }
   0xc   :  { %v347_v6 = vld [vmem:[%s10780_s5] sm:$0x1]  ;;  %356 = vrot.lane.b32.xlu0 %v75_v5, %s8753_s25  ;;  %s8760_s5 = smov 88   ;;  %s8761_s25 = smov 96  }
   0xd   :  { %v362_v7 = vsel %vm87_vm0, %v347_v6, 0  ;;  %8120 = vmatmul.mubr.msk.bf16.vlgmr.msra.gmra.mrb[0].mxu0 %vm83_vm2, %v75_v5 }
   0xe   :  { %8124 = vmatpush3.bf16.msra.mxu1 %v362_v7  ;;  %8133 = vmatprep.mubr.msk.bf16.mxu0 %vm8752_vm1, %v8751_v0  ;;  %v8393_v18 = vld [vmem:[%s10782_s29] sm:$0xff]   ;;  %v8394_v21 = vld [vmem:[%s10782_s29 + $0x8] sm:$0xff]  }
   0xf   :  { %8137 = vmatprep.subr.bf16.mxu1 %v8751_v0  ;;  %8130 = vmatpush3.bf16.msra.mxu0 %v8393_v18 }
  0x10   :  { %8131 = vmatprep.subr.bf16.mxu0 %v8751_v0 }
  0x13   :  { %8132 = vmatpush3.bf16.msra.mxu0 %v8394_v21 }
  0x14   :  { %8143 = vmatprep.subr.bf16.mxu0 %v8751_v0 }
  0x7e   :  { %v357_v8 = vpop.permute.xlu0 %356 }
  0x7f   :  { %8126 = vmatmul.mubr.msk.bf16.vlgmr.msra.gmra.mrb[0].mxu1 %vm83_vm2, %v357_v8 }
  0x80   :  { %8139 = vmatprep.mubr.msk.bf16.mxu1 %vm8752_vm1, %v8751_v0 }
  0xe0   :  { %v125_v10 = vpop.f32.mrb[0].mxu0 }
  0xe1   :  { %v8919_v11 = vadd.f32 %v6965_v9, %v125_v10  ;;  %v8121_v12 = vpop.f32.mrb[1].mxu0 }
  0xe2   :  { %v128_v13 = vpop.f32.mrb[2].mxu0 }
  0xe3   :  { %v138_v14 = vand.u32 2139095040, %v8919_v11  ;;  %v8922_v15 = vadd.f32 %v6965_v9, %v128_v13  ;;  %v8122_v16 = vpop.f32.mrb[3].mxu0  ;;  %v135_v17 = vand.u32 2147483647, %v8919_v11  ;;  %vm137_vm2 = vcmp.lt.s32.totalorder %v8919_v11, 0 }
  0xe5   :  { %v139_v19 = vshrl.u32 %v138_v14, 23  ;;  %v242_v20 = vand.u32 2139095040, %v8922_v15  ;;  %v142_v22 = vand.u32 8388607, %v135_v17  ;;  %v239_v25 = vand.u32 2147483647, %v8922_v15 }
  0xe7   :  { %v6967_v23 = vadd.s32 4294967169, %v139_v19  ;;  %v243_v24 = vshrl.u32 %v242_v20, 23  ;;  %v143_v28 = vor.u32 8388608, %v142_v22  ;;  %v246_v30 = vand.u32 8388607, %v239_v25 }
  0xe9   :  { %v145_v26 = vadd.s32 1, %v6967_v23  ;;  %v6971_v27 = vadd.s32 4294967169, %v243_v24  ;;  %v8939_v35 = vshll.u32 %v143_v28, 8  ;;  %v247_v41 = vor.u32 8388608, %v246_v30 }
  0xeb   :  { %vm146_vm3 = vcmp.gt.s32.totalorder %v145_v26, 0  ;;  %v249_v29 = vadd.s32 1, %v6971_v27  ;;  %v8944_v4 = vshll.u32 %v247_v41, 8 }
  0xec   :  { %v147_v31 = vsel %vm146_vm3, %v145_v26, 0  ;;  %vm241_vm3 = vcmp.lt.s32.totalorder %v8922_v15, 0 }
  0xed   :  { %v148_v32 = vshrl.u32 %v147_v31, 5  ;;  %v149_v33 = vand.u32 31, %v147_v31  ;;  %vm250_vm4 = vcmp.gt.s32.totalorder %v249_v29, 0 }
  0xee   :  { %v251_v34 = vsel %vm250_vm4, %v249_v29, 0  ;;  %vm136_vm4 = vcmp.le.f32.partialorder %v135_v17, 0.7853982 }
  0xef   :  { %v150_v36 = vsub.s32 32, %v149_v33  ;;  %v161_v38 = vshll.u32 %v8754_v37, %v149_v33  ;;  %v164_v40 = vshll.u32 %v8755_v39, %v149_v33  ;;  %vm170_vm5 = vcmp.lt.s32.totalorder %v148_v32, 4 }
  0xf0   :  { %v8941_v42 = vshrl.u32 %v251_v34, 5  ;;  %v253_v43 = vand.u32 31, %v251_v34  ;;  %v152_v45 = vshll.u32 %v8756_v44, %v149_v33  ;;  %v155_v51 = vshll.u32 %v8758_v49, %v149_v33 }
  0xf1   :  { %v162_v46 = vshrl.u32 %v8755_v39, %v150_v36  ;;  %v165_v48 = vshrl.u32 %v8757_v47, %v150_v36  ;;  %v153_v50 = vshrl.u32 %v8758_v49, %v150_v36  ;;  %v151_v55 = vshrl.u32 %v8756_v44, %v150_v36 }
  0xf2   :  { %v254_v52 = vsub.s32 32, %v253_v43  ;;  %v265_v53 = vshll.u32 %v8754_v37, %v253_v43  ;;  %v268_v54 = vshll.u32 %v8755_v39, %v253_v43  ;;  %v156_v60 = vshrl.u32 %v8759_v59, %v150_v36 }
  0xf3   :  { %v163_v56 = vor.u32 %v162_v46, %v161_v38  ;;  %v166_v57 = vor.u32 %v165_v48, %v164_v40  ;;  %v154_v58 = vor.u32 %v153_v50, %v152_v45  ;;  %v158_v63 = vshll.u32 %v8759_v59, %v149_v33 }
  0xf4   :  { %v266_v61 = vshrl.u32 %v8755_v39, %v254_v52  ;;  %v269_v62 = vshrl.u32 %v8757_v47, %v254_v52  ;;  %v159_v1 = vshrl.u32 %v8754_v37, %v150_v36  ;;  %v157_v3 = vor.u32 %v156_v60, %v155_v51 }
  0xf5   :  { %v176_v2 = vsel %vm170_vm5, %v163_v56, 920167782  ;;  %vm167_vm6 = vcmp.lt.s32.totalorder %v148_v32, 1  ;;  %v180_v5 = vsel %vm170_vm5, %v166_v57, 1326507024  ;;  %vm274_vm7 = vcmp.lt.s32.totalorder %v8941_v42, 4 }
  0xf6   :  { %v160_v6 = vor.u32 %v159_v1, %v158_v63  ;;  %vm168_vm8 = vcmp.lt.s32.totalorder %v148_v32, 2  ;;  %v270_v7 = vor.u32 %v269_v62, %v268_v54  ;;  %vm169_vm9 = vcmp.lt.s32.totalorder %v148_v32, 3 }
  0xf7   :  { %v171_v8 = vsel %vm167_vm6, %v151_v55, %v154_v58  ;;  %v175_v9 = vsel %vm167_vm6, %v154_v58, %v157_v3  ;;  %v267_v10 = vor.u32 %v266_v61, %v265_v53  ;;  %v255_v14 = vshrl.u32 %v8756_v44, %v254_v52 }
  0xf8   :  { %v172_v12 = vsel %vm170_vm5, %v160_v6, 2102212464  ;;  %v177_v13 = vsel %vm169_vm9, %v160_v6, %v176_v2  ;;  %v179_v19 = vsel %vm167_vm6, %v157_v3, %v160_v6  ;;  %v181_v20 = vsel %vm169_vm9, %v163_v56, %v180_v5 }
  0xf9   :  { %v173_v16 = vsel %vm169_vm9, %v157_v3, %v172_v12  ;;  %v178_v18 = vsel %vm168_vm8, %v175_v9, %v177_v13  ;;  %v182_v22 = vsel %vm168_vm8, %v179_v19, %v181_v20  ;;  %v284_v26 = vsel %vm274_vm7, %v270_v7, 1326507024 }
  0xfa   :  { %v174_v21 = vsel %vm168_vm8, %v171_v8, %v173_v16  ;;  %v8953_v23 = vmul.u32.u64.low %v8939_v35, %v178_v18  ;;  %v8954_v24 = vmul.u32.u64.high %v8939_v35, %v178_v18, %v8953_v23  ;;  %v256_v29 = vshll.u32 %v8756_v44, %v253_v43 }
  0xfb   :  { %v8959_v27 = vmul.u32.u64.low %v8939_v35, %v182_v22  ;;  %v8960_v28 = vmul.u32.u64.high %v8939_v35, %v182_v22, %v8959_v27  ;;  %v257_v30 = vshrl.u32 %v8758_v49, %v254_v52  ;;  %v259_v31 = vshll.u32 %v8758_v49, %v253_v43 }
  0xfc   :  { %v260_v33 = vshrl.u32 %v8759_v59, %v254_v52  ;;  %v262_v32 = vshll.u32 %v8759_v59, %v253_v43  ;;  %v190_v34 = vmul.u32 %v8939_v35, %v174_v21  ;;  %v263_v36 = vshrl.u32 %v8754_v37, %v254_v52 }
  0xfd   :  { %vm271_vm10 = vcmp.lt.s32.totalorder %v8941_v42, 1  ;;  %vm273_vm11 = vcmp.lt.s32.totalorder %v8941_v42, 3  ;;  %v280_v38 = vsel %vm274_vm7, %v267_v10, 920167782  ;;  %v193_v39 = vadd.s32 1, %v8954_v24 }
  0xfe   :  { %v258_v40 = vor.u32 %v257_v30, %v256_v29  ;;  %v261_v41 = vor.u32 %v260_v33, %v259_v31  ;;  %vm192_vm12 = vc.u32 %v8960_v28, %v8953_v23  ;;  %v264_v44 = vor.u32 %v263_v36, %v262_v32 }
  0xff   :  { %vm272_vm13 = vcmp.lt.s32.totalorder %v8941_v42, 2  ;;  %v285_v35 = vsel %vm273_vm11, %v267_v10, %v284_v26  ;;  %v194_v37 = vsel %vm192_vm12, %v193_v39, %v8954_v24  ;;  %v191_v19 = vadd.s32 %v8953_v23, %v8960_v28 }
 0x100   :  { %v275_v43 = vsel %vm271_vm10, %v255_v14, %v258_v40  ;;  %v279_v45 = vsel %vm271_vm10, %v258_v40, %v261_v41  ;;  %v195_v46 = vadd.s32 %v194_v37, %v190_v34  ;;  %v276_v47 = vsel %vm274_vm7, %v264_v44, 2102212464 }
 0x101   :  { %v281_v48 = vsel %vm273_vm11, %v264_v44, %v280_v38  ;;  %v283_v49 = vsel %vm271_vm10, %v261_v41, %v264_v44  ;;  %v277_v50 = vsel %vm273_vm11, %v261_v41, %v276_v47  ;;  %vm240_vm5 = vcmp.le.f32.partialorder %v239_v25, 0.7853982 }
 0x102   :  { %v282_v51 = vsel %vm272_vm13, %v279_v45, %v281_v48  ;;  %v286_v52 = vsel %vm272_vm13, %v283_v49, %v285_v35  ;;  %v196_v53 = vadd.s32 536870912, %v195_v46  ;;  %v278_v56 = vsel %vm272_vm13, %v275_v43, %v277_v50 }
 0x103   :  { %v8986_v54 = vmul.u32.u64.low %v8944_v4, %v286_v52  ;;  %v8987_v55 = vmul.u32.u64.high %v8944_v4, %v286_v52, %v8986_v54  ;;  %v8990_v57 = vmul.u32.u64.low %v8944_v4, %v282_v51  ;;  %v8991_v58 = vmul.u32.u64.high %v8944_v4, %v282_v51, %v8990_v57 }
 0x104   :  { %v8993_v59 = vshrl.u32 %v196_v53, 30  ;;  %v294_v61 = vmul.u32 %v8944_v4, %v278_v56  ;;  %vm227_vm12 = vweird.f32 %v8919_v11 }
 0x105   :  { %vm296_vm14 = vc.u32 %v8987_v55, %v8990_v57  ;;  %v297_v42 = vadd.s32 1, %v8991_v58  ;;  %v295_v31 = vadd.s32 %v8990_v57, %v8987_v55 }
 0x106   :  { %v198_v60 = vshll.u32 %v8993_v59, 30  ;;  %v221_v50 = vsub.s32 4, %v8993_v59 }
 0x107   :  { %v298_v63 = vsel %vm296_vm14, %v297_v42, %v8991_v58  ;;  %vm331_vm14 = vweird.f32 %v8922_v15 }
 0x108   :  { %v199_v62 = vsub.s32 %v195_v46, %v198_v60  ;;  %v299_v2 = vadd.s32 %v298_v63, %v294_v61  ;;  %v222_v53 = vsel %vm137_vm2, %v221_v50, %v8993_v59 }
 0x109   :  { %v224_v55 = vsel %vm136_vm4, 0, %v222_v53 }
 0x10a   :  { %v201_v1 = vsub.s32 0, %v199_v62  ;;  %v300_v5 = vadd.s32 536870912, %v299_v2  ;;  %v228_v56 = vadd.s32 3, %v224_v55 }
 0x10c   :  { %v6968_v3 = vmin.u32 %v201_v1, %v199_v62  ;;  %v301_v7 = vshrl.u32 %v300_v5, 30  ;;  %v229_v42 = vand.u32 3, %v228_v56 }
 0x10e   :  { %v203_v6 = vclz %v6968_v3  ;;  %v302_v9 = vshll.u32 %v301_v7, 30  ;;  %v325_v52 = vsub.s32 4, %v301_v7  ;;  %vm231_vm6 = vcmp.eq.s32.totalorder %v229_v42, 0 }
 0x10f   :  { %vm234_vm7 = vcmp.eq.s32.totalorder %v229_v42, 2  ;;  %vm230_vm10 = vcmp.lt.s32.totalorder %v229_v42, 2 }
 0x110   :  { %v6969_v8 = vadd.s32 4294967294, %v203_v6  ;;  %v303_v12 = vsub.s32 %v299_v2, %v302_v9  ;;  %v326_v54 = vsel %vm241_vm3, %v325_v52, %v301_v7  ;;  %v132_v2 = vlaneseq }
 0x111   :  { %v328_v17 = vsel %vm240_vm5, 0, %v326_v54 }
 0x112   :  { %vm6970_vm15 = vcmp.lt.s32.totalorder %v6969_v8, 0  ;;  %v305_v4 = vsub.s32 0, %v303_v12  ;;  %v332_v60 = vadd.s32 3, %v328_v17  ;;  %v133_v7 = vand.u32 127, %v132_v2 }
 0x113   :  { %v206_v10 = vsel %vm6970_vm15, 0, %v6969_v8  ;;  %vm441_vm15 = vcmask 261120  }
 0x114   :  { %v211_v13 = vsub.s32 4294967266, %v206_v10  ;;  %v207_v16 = vsub.s32 32, %v206_v10  ;;  %v6972_v18 = vmin.u32 %v305_v4, %v303_v12  ;;  %v208_v26 = vshll.u32 %v199_v62, %v206_v10 }
 0x115   :  { %v333_v1 = vand.u32 3, %v332_v60  ;;  %vm134_vm13 = vcmp.eq.s32.totalorder %v133_v7, 0 }
 0x116   :  { %v212_v14 = vadd.s32 127, %v211_v13  ;;  %v307_v21 = vclz %v6972_v18  ;;  %v209_v22 = vshrl.u32 %v191_v19, %v207_v16  ;;  %v6975_v16 = vld [vmem:[%s10783_s2] ss:$0 sm:$0xff]  ;;  %s10764_s2 = smov 8  }
 0x117   :  { %vm335_vm8 = vcmp.eq.s32.totalorder %v333_v1, 0  ;;  %vm338_vm9 = vcmp.eq.s32.totalorder %v333_v1, 2  ;;  %vm334_vm11 = vcmp.lt.s32.totalorder %v333_v1, 2 }
 0x118   :  { %v213_v20 = vshll.u32 %v212_v14, 23  ;;  %v6973_v24 = vadd.s32 4294967294, %v307_v21  ;;  %v210_v30 = vor.u32 %v209_v22, %v208_v26 }
 0x11a   :  { %v214_v27 = vor.u32 4788187, %v213_v20  ;;  %vm6974_vm0 = vcmp.lt.s32.totalorder %v6973_v24, 0  ;;  %v217_v40 = vcvt.s32.f32 %v210_v30 }
 0x11b   :  { %v310_v29 = vsel %vm6974_vm0, 0, %v6973_v24  ;;  %vm486_vm0 = vcmask 785408  }
 0x11c   :  { %v311_v33 = vsub.s32 32, %v310_v29  ;;  %v315_v32 = vsub.s32 4294967266, %v310_v29  ;;  %v215_v34 = vand.u32 2147483647, %v214_v27  ;;  %v312_v36 = vshll.u32 %v303_v12, %v310_v29 }
 0x11e   :  { %v313_v38 = vshrl.u32 %v295_v31, %v311_v33  ;;  %v316_v39 = vadd.s32 127, %v315_v32  ;;  %v218_v28 = vmul.f32 %v217_v40, %v215_v34 }
 0x120   :  { %v314_v41 = vor.u32 %v313_v38, %v312_v36  ;;  %v317_v23 = vshll.u32 %v316_v39, 23  ;;  %v219_v43 = vxor.u32 2147483648, %v218_v28 }
 0x122   :  { %v318_v44 = vor.u32 4788187, %v317_v23  ;;  %v321_v37 = vcvt.s32.f32 %v314_v41  ;;  %v220_v47 = vsel %vm137_vm2, %v219_v43, %v218_v28  ;;  %v6977_v28 = vld [vmem:[%s10734_s7] ss:$0 sm:$0xff]  ;;  %vm494_vm2 = vcmask 64512  }
 0x123   :  { %v223_v49 = vsel %vm136_vm4, %v8919_v11, %v220_v47  ;;  %vm720_vm4 = vcmask 130112  }
 0x124   :  { %v319_v35 = vand.u32 2147483647, %v318_v44  ;;  %8659 = vcosq.f32 %v223_v49 }
 0x125   :  { %8661 = vsinq.f32 %v223_v49 }
 0x126   :  { %v322_v45 = vmul.f32 %v321_v37, %v319_v35 }
 0x128   :  { %v323_v46 = vxor.u32 2147483648, %v322_v45 }
 0x12a   :  { %v324_v48 = vsel %vm241_vm3, %v323_v46, %v322_v45  ;;  %vm558_vm3 = vcmask 1043456  }
 0x12b   :  { %v327_v51 = vsel %vm240_vm5, %v8922_v15, %v324_v48  ;;  %vm839_vm5 = vcmask 195712  }
 0x12c   :  { %8663 = vcosq.f32 %v327_v51 }
 0x12d   :  { %8665 = vsinq.f32 %v327_v51 }
 0x12e   :  { %v8660_v57 = vpop.eup %8659 }
 0x12f   :  { %v8662_v58 = vpop.eup %8661  ;;  %v235_v63 = vxor.u32 2147483648, %v8660_v57 }
 0x130   :  { %v232_v62 = vxor.u32 2147483648, %v8662_v58 }
 0x131   :  { %v236_v6 = vsel %vm234_vm7, %v235_v63, %v8662_v58 }
 0x132   :  { %v233_v59 = vsel %vm231_vm6, %v8660_v57, %v232_v62  ;;  %vm958_vm6 = vcmask 261312  }
 0x133   :  { %v237_v10 = vsel %vm230_vm10, %v233_v59, %v236_v6 }
 0x134   :  { %v238_v13 = vsel %vm227_vm12, nan, %v237_v10 }
 0x135   :  { %v343_v14 = vsel %vm134_vm13, %v8919_v11, %v238_v13 }
 0x136   :  { %v8664_v61 = vpop.eup %8663  ;;  %v345_v20 = vmul.f32 2.828427, %v343_v14 }
 0x137   :  { %v8666_v25 = vpop.eup %8665  ;;  %v339_v5 = vxor.u32 2147483648, %v8664_v61 }
 0x138   :  { %v336_v3 = vxor.u32 2147483648, %v8666_v25 }
 0x139   :  { %v340_v9 = vsel %vm338_vm9, %v339_v5, %v8666_v25 }
 0x13a   :  { %v337_v8 = vsel %vm335_vm8, %v8664_v61, %v336_v3 }
 0x13b   :  { %v341_v12 = vsel %vm334_vm11, %v337_v8, %v340_v9 }
 0x13c   :  { %v342_v4 = vsel %vm331_vm14, nan, %v341_v12 }
 0x13d   :  { %v344_v19 = vsel %vm134_vm13, %v8922_v15, %v342_v4 }
 0x13e   :  { %v346_v27 = vmul.f32 2.828427, %v344_v19 }
 0x152   :  { %v398_v18 = vpop.f32.mrb[0].mxu1 }
 0x153   :  { %v399_v21 = vadd.f32 %v6975_v16, %v398_v18  ;;  %v8127_v22 = vpop.f32.mrb[1].mxu1 }
 0x154   :  { %v401_v24 = vpop.f32.mrb[2].mxu1 }
 0x155   :  { %v405_v26 = vadd.f32 %v399_v21, %v345_v20  ;;  %v402_v29 = vadd.f32 %v6975_v16, %v401_v24  ;;  %v8128_v30 = vpop.f32.mrb[3].mxu1 }
 0x157   :  { %v407_v31 = vadd.f32 3.0, %v405_v26  ;;  %v406_v33 = vadd.f32 %v402_v29, %v346_v27 }
 0x159   :  { %v409_v32 = vmax.f32 %v407_v31, 0.0  ;;  %v408_v34 = vadd.f32 3.0, %v406_v33 }
 0x15b   :  { %v411_v11 = vmin.f32 %v409_v32, 6.0  ;;  %v410_v36 = vmax.f32 %v408_v34, 0.0 }
 0x15d   :  { %v413_v38 = vmul.f32 %v411_v11, %v405_v26  ;;  %v412_v39 = vmin.f32 %v410_v36, 6.0 }
 0x15f   :  { %v414_v40 = vmul.f32 %v412_v39, %v406_v33  ;;  %v9020_v41 = vmul.f32 0.16666667, %v413_v38 }
 0x161   :  { %v9022_v15 = vmul.f32 0.16666667, %v414_v40 }
 0x163   :  { %v421_v23 = vpack.c.bf16 %v9022_v15, %v9020_v41 }
 0x165   :  { %8134 = vmatmul.mubr.msk.bf16.vlgmr.msra.gmra.mrb[4].mxu0 %vm441_vm15, %v421_v23 }
 0x166   :  { %8145 = vmatprep.mubr.msk.bf16.mxu0 %vm8752_vm1, %v8751_v0 }
 0x238   :  { %v479_v44 = vpop.f32.mrb[4].mxu0 }
 0x239   :  { %v480_v35 = vadd.f32 %v6977_v28, %v479_v44  ;;  %v8135_v37 = vpop.f32.mrb[5].mxu0 }
 0x23a   :  { %v482_v43 = vpop.f32.mrb[6].mxu0 }
 0x23b   :  { %487 = vst.msk [vmem:[#allocation3] sm:$0xff] %vm486_vm0, %v480_v35  ;;  %v483_v45 = vadd.f32 %v6977_v28, %v482_v43  ;;  %v8136_v46 = vpop.f32.mrb[7].mxu0 }
 0x23d   :  { %488 = vst.msk [vmem:[#allocation3 + $0x8] sm:$0xff] %vm486_vm0, %v483_v45 }
 0x242   :  { %v603_v47 = vld [vmem:[#allocation3] sm:$0xff] }
 0x243   :  { %v9034_v48 = vpack.c.bf16 %v603_v47, %v603_v47 }
 0x244   :  { %v960_v49 = vld [vmem:[#allocation3 + $0x8] sm:$0xff] }
 0x245   :  { %608 = vrot.lane.b32.xlu1 %v9034_v48, %s8760_s5  ;;  %492 = vrot.lane.b32.xlu0 %v9034_v48, %s8761_s25  ;;  %v9048_v50 = vpack.c.bf16 %v960_v49, %v960_v49 }
 0x249   :  { %606 = vrot.lane.b32.xlu1 %v9034_v48, %s8762_s26  ;;  %727 = vrot.lane.b32.xlu0 %v9034_v48, %s8763_s0 }
 0x24d   :  { %725 = vrot.lane.b32.xlu1 %v9034_v48, %s10770_s27  ;;  %846 = vrot.lane.b32.xlu0 %v9034_v48, %s10768_s4 }
 0x251   :  { %844 = vrot.lane.b32.xlu1 %v9034_v48, %s10766_s28  ;;  %963 = vrot.lane.b32.xlu0 %v9048_v50, %s8761_s25 }
 0x255   :  { %1077 = vrot.lane.b32.xlu1 %v9048_v50, %s8760_s5  ;;  %1075 = vrot.lane.b32.xlu0 %v9048_v50, %s8762_s26 }
 0x259   :  { %1195 = vrot.lane.b32.xlu1 %v9048_v50, %s8763_s0  ;;  %1193 = vrot.lane.b32.xlu0 %v9048_v50, %s10770_s27 }
 0x25d   :  { %1313 = vrot.lane.b32.xlu1 %v9048_v50, %s10768_s4  ;;  %1311 = vrot.lane.b32.xlu0 %v9048_v50, %s10766_s28 }
 0x2b7   :  { %v493_v51 = vpop.permute.xlu0 %492  ;;  %v609_v53 = vpop.permute.xlu1 %608 }
 0x2b8   :  { %v499_v52 = vsel %vm494_vm2, %v493_v51, 0  ;;  %v614_v54 = vsel %vm494_vm2, %v609_v53, 0 }
 0x2b9   :  { %8138 = vmatpush3.bf16.xpose.msra.mxu1 %v499_v52 }
 0x2ba   :  { %8149 = vmatprep.subr.bf16.mxu1 %v8751_v0 }
 0x2bb   :  { %v728_v55 = vpop.permute.xlu0 %727  ;;  %v607_v17 = vpop.permute.xlu1 %606 }
 0x2bc   :  { %v733_v56 = vsel %vm494_vm2, %v728_v55, 0 }
 0x2bf   :  { %v847_v57 = vpop.permute.xlu0 %846  ;;  %v726_v58 = vpop.permute.xlu1 %725 }
 0x2c0   :  { %8140 = vmatmul.mubr.msk.bf16.vlgmr.msra.gmra.mrb[4].mxu1 %vm494_vm2, %v9034_v48  ;;  %v852_v60 = vsel %vm494_vm2, %v847_v57, 0 }
 0x2c1   :  { %8150 = vmatpush3.bf16.xpose.msra.mxu1 %v614_v54  ;;  %8151 = vmatprep.mubr.msk.bf16.mxu1 %vm8752_vm1, %v8751_v0 }
 0x2c2   :  { %8161 = vmatprep.subr.bf16.mxu1 %v8751_v0 }
 0x2c3   :  { %v964_v61 = vpop.permute.xlu0 %963  ;;  %v845_v25 = vpop.permute.xlu1 %844 }
 0x2c4   :  { %v969_v42 = vsel %vm494_vm2, %v964_v61, 0 }
 0x2c7   :  { %v1078_v62 = vpop.permute.xlu1 %1077  ;;  %v1076_v3 = vpop.permute.xlu0 %1075 }
 0x2c8   :  { %8152 = vmatmul.mubr.msk.bf16.vlgmr.msra.gmra.mrb[8].mxu1 %vm494_vm2, %v607_v17  ;;  %v1083_v63 = vsel %vm494_vm2, %v1078_v62, 0 }
 0x2c9   :  { %8162 = vmatpush3.bf16.xpose.msra.mxu1 %v733_v56  ;;  %8163 = vmatprep.mubr.msk.bf16.mxu1 %vm8752_vm1, %v8751_v0 }
 0x2ca   :  { %8173 = vmatprep.subr.bf16.mxu1 %v8751_v0 }
 0x2cb   :  { %v1196_v1 = vpop.permute.xlu1 %1195  ;;  %v1194_v6 = vpop.permute.xlu0 %1193 }
 0x2cc   :  { %v1201_v5 = vsel %vm494_vm2, %v1196_v1, 0 }
 0x2cf   :  { %v1314_v59 = vpop.permute.xlu1 %1313  ;;  %v1312_v8 = vpop.permute.xlu0 %1311 }
 0x2d0   :  { %8164 = vmatmul.mubr.msk.bf16.vlgmr.msra.gmra.mrb[12].mxu1 %vm494_vm2, %v726_v58  ;;  %v1319_v7 = vsel %vm494_vm2, %v1314_v59, 0 }
 0x2d1   :  { %8174 = vmatpush3.bf16.xpose.msra.mxu1 %v852_v60  ;;  %8175 = vmatprep.mubr.msk.bf16.mxu1 %vm8752_vm1, %v8751_v0 }
 0x2d2   :  { %8185 = vmatprep.subr.bf16.mxu1 %v8751_v0 }
 0x2d8   :  { %8176 = vmatmul.mubr.msk.bf16.vlgmr.msra.gmra.mrb[16].mxu1 %vm494_vm2, %v845_v25 }
 0x2d9   :  { %8186 = vmatpush3.bf16.xpose.msra.mxu1 %v969_v42  ;;  %8187 = vmatprep.mubr.msk.bf16.mxu1 %vm8752_vm1, %v8751_v0 }
 0x2da   :  { %8197 = vmatprep.subr.bf16.mxu1 %v8751_v0 }
 0x2e0   :  { %8188 = vmatmul.mubr.msk.bf16.vlgmr.msra.gmra.mrb[20].mxu1 %vm494_vm2, %v9048_v50 }
 0x2e1   :  { %8198 = vmatpush3.bf16.xpose.msra.mxu1 %v1083_v63  ;;  %8199 = vmatprep.mubr.msk.bf16.mxu1 %vm8752_vm1, %v8751_v0 }
 0x2e2   :  { %8209 = vmatprep.subr.bf16.mxu1 %v8751_v0 }
 0x2e8   :  { %8200 = vmatmul.mubr.msk.bf16.vlgmr.msra.gmra.mrb[24].mxu1 %vm494_vm2, %v1076_v3 }
 0x2e9   :  { %8210 = vmatpush3.bf16.xpose.msra.mxu1 %v1201_v5  ;;  %8211 = vmatprep.mubr.msk.bf16.mxu1 %vm8752_vm1, %v8751_v0 }
 0x2ea   :  { %8221 = vmatprep.subr.bf16.mxu1 %v8751_v0 }
 0x2f0   :  { %8212 = vmatmul.mubr.msk.bf16.vlgmr.msra.gmra.mrb[28].mxu1 %vm494_vm2, %v1194_v6 }
 0x2f1   :  { %8222 = vmatpush3.bf16.xpose.msra.mxu1 %v1319_v7  ;;  %8223 = vmatprep.mubr.msk.bf16.mxu1 %vm8752_vm1, %v8751_v0 }
 0x2f2   :  { %8233 = vmatprep.subr.bf16.mxu1 %v8751_v0 }
 0x2f8   :  { %8224 = vmatmul.mubr.msk.bf16.vlgmr.msra.gmra.mrb[32].mxu1 %vm494_vm2, %v1312_v8 }
 0x2f9   :  { %8237 = vmatprep.mubr.msk.bf16.mxu1 %vm8752_vm1, %v8751_v0 }
 0x393   :  { %v535_v9 = vpop.f32.mrb[4].mxu1 }
 0x394   :  { %v8141_v10 = vpop.f32.mrb[5].mxu1  ;;  %v541_v12 = vsel %vm494_vm2, %v535_v9, -inf }
 0x395   :  { %v538_v13 = vpop.f32.mrb[6].mxu1  ;;  %542 = vmax.xlane.f32.xlu1 %v541_v12 }
 0x396   :  { %v8142_v4 = vpop.f32.mrb[7].mxu1 }
 0x39b   :  { %v650_v14 = vpop.f32.mrb[8].mxu1 }
 0x39c   :  { %v8153_v16 = vpop.f32.mrb[9].mxu1  ;;  %v656_v18 = vsel %vm494_vm2, %v650_v14, -inf }
 0x39d   :  { %v653_v19 = vpop.f32.mrb[10].mxu1  ;;  %657 = vmax.xlane.f32.xlu0 %v656_v18 }
 0x39e   :  { %v8154_v20 = vpop.f32.mrb[11].mxu1 }
 0x3a3   :  { %v769_v21 = vpop.f32.mrb[12].mxu1 }
 0x3a4   :  { %v8165_v22 = vpop.f32.mrb[13].mxu1  ;;  %v775_v24 = vsel %vm494_vm2, %v769_v21, -inf }
 0x3a5   :  { %v772_v26 = vpop.f32.mrb[14].mxu1  ;;  %776 = vmax.xlane.f32.xlu0 %v775_v24 }
 0x3a6   :  { %v8166_v27 = vpop.f32.mrb[15].mxu1 }
 0x3ab   :  { %v888_v29 = vpop.f32.mrb[16].mxu1 }
 0x3ac   :  { %v8177_v30 = vpop.f32.mrb[17].mxu1  ;;  %v894_v31 = vsel %vm494_vm2, %v888_v29, -inf }
 0x3ad   :  { %v891_v33 = vpop.f32.mrb[18].mxu1  ;;  %895 = vmax.xlane.f32.xlu1 %v894_v31 }
 0x3ae   :  { %v8178_v32 = vpop.f32.mrb[19].mxu1 }
 0x3b3   :  { %v1005_v34 = vpop.f32.mrb[20].mxu1 }
 0x3b4   :  { %v8189_v11 = vpop.f32.mrb[21].mxu1  ;;  %v1011_v36 = vsel %vm494_vm2, %v1005_v34, -inf }
 0x3b5   :  { %1012 = vmax.xlane.f32.xlu0 %v1011_v36  ;;  %v1008_v38 = vpop.f32.mrb[22].mxu1 }
 0x3b6   :  { %v8190_v39 = vpop.f32.mrb[23].mxu1 }
 0x3bb   :  { %v9113_v40 = vpop.f32.mrb[24].mxu1 }
 0x3bc   :  { %v8201_v23 = vpop.f32.mrb[25].mxu1  ;;  %v1125_v28 = vsel %vm494_vm2, %v9113_v40, -inf }
 0x3bd   :  { %1126 = vmax.xlane.f32.xlu1 %v1125_v28  ;;  %v1122_v44 = vpop.f32.mrb[26].mxu1 }
 0x3be   :  { %v8202_v35 = vpop.f32.mrb[27].mxu1 }
 0x3c3   :  { %v1237_v37 = vpop.f32.mrb[28].mxu1 }
 0x3c4   :  { %v8213_v43 = vpop.f32.mrb[29].mxu1  ;;  %v1243_v45 = vsel %vm494_vm2, %v1237_v37, -inf }
 0x3c5   :  { %1244 = vmax.xlane.f32.xlu0 %v1243_v45  ;;  %v1240_v46 = vpop.f32.mrb[30].mxu1 }
 0x3c6   :  { %v8214_v47 = vpop.f32.mrb[31].mxu1 }
 0x3cb   :  { %v9118_v49 = vpop.f32.mrb[32].mxu1 }
 0x3cc   :  { %v8225_v51 = vpop.f32.mrb[33].mxu1  ;;  %v1361_v54 = vsel %vm494_vm2, %v9118_v49, -inf }
 0x3cd   :  { %v1358_v52 = vpop.f32.mrb[34].mxu1 }
 0x3ce   :  { %668 = vrot.lane.b32.xlu1 %v9034_v48, %s10758_s30  ;;  %v8226_v53 = vpop.f32.mrb[35].mxu1 }
 0x3db   :  { %553 = vrot.lane.b32.xlu0 %v9034_v48, %s10756_s3 }
 0x3f2   :  { %1362 = vmax.xlane.f32.xlu1 %v1361_v54 }
 0x403   :  { %787 = vrot.lane.b32.xlu1 %v9034_v48, %s10754_s1 }
 0x422   :  { %v543_v55 = vpop.xlane.xlu1 %542 }
 0x423   :  { %v544_v17 = vsub.f32 %v535_v9, %v543_v55 }
 0x425   :  { %v545_v56 = vmul.f32 1.442695, %v544_v17 }
 0x427   :  { %8667 = vpow2.f32 %v545_v56 }
 0x42a   :  { %v658_v57 = vpop.xlane.xlu0 %657 }
 0x42b   :  { %v659_v58 = vsub.f32 %v650_v14, %v658_v57 }
 0x42d   :  { %v660_v60 = vmul.f32 1.442695, %v659_v58 }
 0x42f   :  { %8669 = vpow2.f32 %v660_v60 }
 0x431   :  { %v9128_v61 = vpop.eup %8667 }
 0x432   :  { %v777_v25 = vpop.xlane.xlu0 %776  ;;  %v547_v42 = vsel %vm494_vm2, %v9128_v61, 0.0 }
 0x433   :  { %v778_v62 = vsub.f32 %v769_v21, %v777_v25  ;;  %548 = vadd.xlane.f32.xlu0 %v547_v42 }
 0x435   :  { %v779_v63 = vmul.f32 1.442695, %v778_v62 }
 0x437   :  { %8671 = vpow2.f32 %v779_v63 }
 0x439   :  { %v9132_v1 = vpop.eup %8669 }
 0x43a   :  { %v896_v3 = vpop.xlane.xlu1 %895  ;;  %v662_v5 = vsel %vm494_vm2, %v9132_v1, 0.0 }
 0x43b   :  { %v897_v59 = vsub.f32 %v888_v29, %v896_v3  ;;  %663 = vadd.xlane.f32.xlu1 %v662_v5 }
 0x43d   :  { %v898_v6 = vmul.f32 1.442695, %v897_v59 }
 0x43f   :  { %8673 = vpow2.f32 %v898_v6 }
 0x441   :  { %v9136_v7 = vpop.eup %8671 }
 0x442   :  { %v1013_v8 = vpop.xlane.xlu0 %1012  ;;  %v781_v9 = vsel %vm494_vm2, %v9136_v7, 0.0 }
 0x443   :  { %v1014_v10 = vsub.f32 %v1005_v34, %v1013_v8  ;;  %782 = vadd.xlane.f32.xlu0 %v781_v9 }
 0x445   :  { %v1015_v12 = vmul.f32 1.442695, %v1014_v10 }
 0x447   :  { %8675 = vpow2.f32 %v1015_v12 }
 0x449   :  { %v9140_v13 = vpop.eup %8673 }
 0x44a   :  { %v900_v4 = vsel %vm494_vm2, %v9140_v13, 0.0  ;;  %v1127_v24 = vpop.xlane.xlu1 %1126 }
 0x44b   :  { %901 = vadd.xlane.f32.xlu1 %v900_v4  ;;  %v1128_v27 = vsub.f32 %v9113_v40, %v1127_v24 }
 0x44d   :  { %v1129_v30 = vmul.f32 1.442695, %v1128_v27 }
 0x451   :  { %v9144_v14 = vpop.eup %8675 }
 0x452   :  { %v1245_v16 = vpop.xlane.xlu0 %1244  ;;  %v1017_v18 = vsel %vm494_vm2, %v9144_v14, 0.0 }
 0x453   :  { %v1246_v19 = vsub.f32 %v1237_v37, %v1245_v16  ;;  %1018 = vadd.xlane.f32.xlu1 %v1017_v18 }
 0x455   :  { %v1247_v20 = vmul.f32 1.442695, %v1246_v19 }
 0x456   :  { %v554_v21 = vpop.permute.xlu0 %553 }
 0x457   :  { %8677 = vpow2.f32 %v1247_v20  ;;  %v560_v22 = vsel %vm558_vm3, %v554_v21, 0 }
 0x458   :  { %8144 = vmatpush3.bf16.msra.mxu0 %v560_v22  ;;  %8679 = vpow2.f32 %v1129_v30 }
 0x459   :  { %906 = vrot.lane.b32.xlu0 %v9034_v48, %s10752_s23  ;;  %8155 = vmatprep.subr.bf16.mxu0 %v8751_v0  ;;  %v669_v48 = vpop.permute.xlu1 %668 }
 0x45a   :  { %v674_v37 = vsel %vm558_vm3, %v669_v48, 0 }
 0x461   :  { %v9152_v26 = vpop.eup %8677 }
 0x462   :  { %v1249_v29 = vsel %vm494_vm2, %v9152_v26, 0.0  ;;  %v9157_v31 = vpop.eup %8679 }
 0x463   :  { %1250 = vadd.xlane.f32.xlu1 %v1249_v29  ;;  %v1131_v33 = vsel %vm494_vm2, %v9157_v31, 0.0 }
 0x478   :  { %1132 = vadd.xlane.f32.xlu0 %v1131_v33 }
 0x47f   :  { %v1363_v32 = vpop.xlane.xlu1 %1362 }
 0x480   :  { %v1364_v34 = vsub.f32 %v9118_v49, %v1363_v32 }
 0x482   :  { %v1365_v11 = vmul.f32 1.442695, %v1364_v34 }
 0x483   :  { %v788_v40 = vpop.permute.xlu1 %787 }
 0x484   :  { %8681 = vpow2.f32 %v1365_v11  ;;  %v793_v47 = vsel %vm558_vm3, %v788_v40, 0 }
 0x48e   :  { %v9162_v36 = vpop.eup %8681  ;;  %1137 = vrot.lane.b32.xlu0 %v9048_v50, %s10758_s30  ;;  %s10786_s30 = smov 104  }
 0x48f   :  { %v1367_v38 = vsel %vm494_vm2, %v9162_v36, 0.0 }
 0x490   :  { %1368 = vadd.xlane.f32.xlu1 %v1367_v38 }
 0x492   :  { %1255 = vrot.lane.b32.xlu0 %v9048_v50, %s10754_s1 }
 0x496   :  { %1373 = vrot.lane.b32.xlu0 %v9048_v50, %s10752_s23  ;;  %s10785_s23 = smov 72  }
 0x4a1   :  { %1023 = vrot.lane.b32.xlu1 %v9048_v50, %s10756_s3  ;;  %s10791_s3 = smov 8  }
 0x4c0   :  { %v549_v39 = vpop.xlane.xlu0 %548 }
 0x4c1   :  { %8683 = vrcp.f32 %v549_v39 }
 0x4c8   :  { %v664_v23 = vpop.xlane.xlu1 %663 }
 0x4c9   :  { %8685 = vrcp.f32 %v664_v23 }
 0x4cb   :  { %v8684_v28 = vpop.eup %8683 }
 0x4cc   :  { %v551_v44 = vmul.f32 %v8684_v28, %v9128_v61 }
 0x4ce   :  { %v552_v35 = vpack.c.bf16 %v551_v44, %v551_v44 }
 0x4d0   :  { %8146 = vmatmul.mubr.msk.bf16.vlgmr.msra.gmra.mrb[8].mxu0 %vm494_vm2, %v552_v35  ;;  %v783_v43 = vpop.xlane.xlu0 %782 }
 0x4d1   :  { %8156 = vmatpush3.bf16.msra.mxu0 %v674_v37  ;;  %8687 = vrcp.f32 %v783_v43  ;;  %8157 = vmatprep.mubr.msk.bf16.mxu0 %vm8752_vm1, %v8751_v0 }
 0x4d2   :  { %8167 = vmatprep.subr.bf16.mxu0 %v8751_v0 }
 0x4d3   :  { %v8686_v50 = vpop.eup %8685 }
 0x4d4   :  { %v666_v45 = vmul.f32 %v8686_v50, %v9132_v1  ;;  %v907_v53 = vpop.permute.xlu0 %906 }
 0x4d5   :  { %v912_v55 = vsel %vm558_vm3, %v907_v53, 0 }
 0x4d6   :  { %v667_v46 = vpack.c.bf16 %v666_v45, %v666_v45  ;;  %v8395_v45 = vld [vmem:[%s10735_s8] sm:$0xff]  }
 0x4d7   :  { %8234 = vmatpush3.bf16.msra.mxu1 %v8395_v45 }
 0x4d8   :  { %v902_v49 = vpop.xlane.xlu1 %901  ;;  %8158 = vmatmul.mubr.msk.bf16.vlgmr.msra.gmra.mrb[12].mxu0 %vm494_vm2, %v667_v46  ;;  %v8396_v46 = vld [vmem:[%s10735_s8 + $0x8] sm:$0xff]   ;;  %8235 = vmatprep.subr.bf16.mxu1 %v8751_v0 }
 0x4d9   :  { %8689 = vrcp.f32 %v902_v49  ;;  %8168 = vmatpush3.bf16.msra.mxu0 %v793_v47  ;;  %8169 = vmatprep.mubr.msk.bf16.mxu0 %vm8752_vm1, %v8751_v0 }
 0x4da   :  { %8179 = vmatprep.subr.bf16.mxu0 %v8751_v0 }
 0x4db   :  { %v8688_v51 = vpop.eup %8687  ;;  %8236 = vmatpush3.bf16.msra.mxu1 %v8396_v46 }
 0x4dc   :  { %v785_v52 = vmul.f32 %v8688_v51, %v9136_v7 }
 0x4de   :  { %v786_v54 = vpack.c.bf16 %v785_v52, %v785_v52 }
 0x4e0   :  { %8170 = vmatmul.mubr.msk.bf16.vlgmr.msra.gmra.mrb[16].mxu0 %vm494_vm2, %v786_v54  ;;  %v1019_v58 = vpop.xlane.xlu1 %1018 }
 0x4e1   :  { %8180 = vmatpush3.bf16.msra.mxu0 %v912_v55  ;;  %8181 = vmatprep.mubr.msk.bf16.mxu0 %vm8752_vm1, %v8751_v0  ;;  %8691 = vrcp.f32 %v1019_v58 }
 0x4e2   :  { %8191 = vmatprep.subr.bf16.mxu0 %v8751_v0 }
 0x4e3   :  { %v8690_v17 = vpop.eup %8689 }
 0x4e4   :  { %v904_v56 = vmul.f32 %v8690_v17, %v9140_v13 }
 0x4e6   :  { %v905_v57 = vpack.c.bf16 %v904_v56, %v904_v56 }
 0x4e8   :  { %8182 = vmatmul.mubr.msk.bf16.vlgmr.msra.gmra.mrb[20].mxu0 %vm494_vm2, %v905_v57 }
 0x4e9   :  { %8193 = vmatprep.mubr.msk.bf16.mxu0 %vm8752_vm1, %v8751_v0 }
 0x4eb   :  { %v8692_v25 = vpop.eup %8691 }
 0x4ec   :  { %v1021_v62 = vmul.f32 %v8692_v25, %v9144_v14 }
 0x4ee   :  { %v1022_v5 = vpack.c.bf16 %v1021_v62, %v1021_v62 }
 0x4f0   :  { %v1251_v61 = vpop.xlane.xlu1 %1250 }
 0x505   :  { %v1133_v60 = vpop.xlane.xlu0 %1132 }
 0x506   :  { %8693 = vrcp.f32 %v1133_v60 }
 0x507   :  { %8695 = vrcp.f32 %v1251_v61 }
 0x509   :  { %v1138_v3 = vpop.permute.xlu0 %1137 }
 0x50a   :  { %v1143_v6 = vsel %vm558_vm3, %v1138_v3, 0 }
 0x50d   :  { %v1256_v8 = vpop.permute.xlu0 %1255 }
 0x50e   :  { %v1261_v12 = vsel %vm558_vm3, %v1256_v8, 0 }
 0x510   :  { %v8694_v59 = vpop.eup %8693 }
 0x511   :  { %v1135_v7 = vmul.f32 %v8694_v59, %v9157_v31  ;;  %v8696_v10 = vpop.eup %8695  ;;  %v1374_v4 = vpop.permute.xlu0 %1373 }
 0x512   :  { %v1253_v13 = vmul.f32 %v8696_v10, %v9152_v26  ;;  %v1379_v18 = vsel %vm558_vm3, %v1374_v4, 0 }
 0x513   :  { %v1136_v9 = vpack.c.bf16 %v1135_v7, %v1135_v7 }
 0x514   :  { %v1254_v14 = vpack.c.bf16 %v1253_v13, %v1253_v13 }
 0x51d   :  { %v1369_v42 = vpop.xlane.xlu1 %1368 }
 0x51e   :  { %8697 = vrcp.f32 %v1369_v42 }
 0x521   :  { %v1024_v63 = vpop.permute.xlu1 %1023 }
 0x522   :  { %v1029_v1 = vsel %vm558_vm3, %v1024_v63, 0 }
 0x523   :  { %8192 = vmatpush3.bf16.msra.mxu0 %v1029_v1  ;;  %v6997_v1 = vld [vmem:[%s10736_s9] ss:$0 sm:$0xff] }
 0x524   :  { %8203 = vmatprep.subr.bf16.mxu0 %v8751_v0 }
 0x526   :  { %8194 = vmatmul.mubr.msk.bf16.vlgmr.msra.gmra.mrb[24].mxu0 %vm494_vm2, %v1022_v5 }
 0x527   :  { %8204 = vmatpush3.bf16.msra.mxu0 %v1143_v6  ;;  %8205 = vmatprep.mubr.msk.bf16.mxu0 %vm8752_vm1, %v8751_v0 }
 0x528   :  { %8215 = vmatprep.subr.bf16.mxu0 %v8751_v0  ;;  %v8698_v16 = vpop.eup %8697 }
 0x529   :  { %v1371_v19 = vmul.f32 %v8698_v16, %v9162_v36 }
 0x52b   :  { %v1372_v20 = vpack.c.bf16 %v1371_v19, %v1371_v19 }
 0x52e   :  { %8206 = vmatmul.mubr.msk.bf16.vlgmr.msra.gmra.mrb[28].mxu0 %vm494_vm2, %v1136_v9 }
 0x52f   :  { %8216 = vmatpush3.bf16.msra.mxu0 %v1261_v12  ;;  %8217 = vmatprep.mubr.msk.bf16.mxu0 %vm8752_vm1, %v8751_v0 }
 0x530   :  { %8227 = vmatprep.subr.bf16.mxu0 %v8751_v0 }
 0x536   :  { %8218 = vmatmul.mubr.msk.bf16.vlgmr.msra.gmra.mrb[32].mxu0 %vm494_vm2, %v1254_v14 }
 0x537   :  { %8228 = vmatpush3.bf16.msra.mxu0 %v1379_v18  ;;  %8229 = vmatprep.mubr.msk.bf16.mxu0 %vm8752_vm1, %v8751_v0 }
 0x53e   :  { %8230 = vmatmul.mubr.msk.bf16.vlgmr.msra.gmra.mrb[36].mxu0 %vm494_vm2, %v1372_v20 }
 0x5a3   :  { %v596_v21 = vpop.f32.mrb[8].mxu0 }
 0x5a4   :  { %602 = vst.msk [vmem:[#allocation2] sm:$0xff] %vm494_vm2, %v596_v21  ;;  %v8147_v22 = vpop.f32.mrb[9].mxu0 }
 0x5a5   :  { %v599_v24 = vpop.f32.mrb[10].mxu0 }
 0x5a6   :  { %v8148_v26 = vpop.f32.mrb[11].mxu0 }
 0x5a7   :  { %v1551_v26 = vld [vmem:[%s10737_s10 + $0x40] sm:$0xff] }
 0x5ab   :  { %v710_v27 = vpop.f32.mrb[12].mxu0 }
 0x5ac   :  { %717 = vrot.lane.b32.xlu1 %v710_v27, %s10764_s2  ;;  %v8159_v29 = vpop.f32.mrb[13].mxu0  ;;  %v1544_v27 = vld [vmem:[%s10737_s10 + $0x8] sm:$0xff] }
 0x5ad   :  { %v713_v30 = vpop.f32.mrb[14].mxu0  ;;  %v8774_v29 = vmov 0  }
 0x5ae   :  { %v8160_v31 = vpop.f32.mrb[15].mxu0  ;;  %1855 = vmatprep.mubr.bf16.mxu0 %v8774_v29 }
 0x5b3   :  { %v829_v33 = vpop.f32.mrb[16].mxu0 }
 0x5b4   :  { %836 = vrot.lane.b32.xlu1 %v829_v33, %s10762_s6  ;;  %v8171_v48 = vpop.f32.mrb[17].mxu0  ;;  %v1552_v33 = vld [vmem:[%s10737_s10 + $0x48] sm:$0xff] }
 0x5b5   :  { %v832_v32 = vpop.f32.mrb[18].mxu0  ;;  %v1559_v48 = vld [vmem:[%s10737_s10 + $0x80] sm:$0xff] }
 0x5b6   :  { %v8172_v34 = vpop.f32.mrb[19].mxu0  ;;  %v1567_v32 = vld [vmem:[%s10737_s10 + $0xc0] sm:$0xff] }
 0x5b7   :  { %v7005_v34 = vcombine.low %v1544_v27, %v1552_v33 }
 0x5bb   :  { %v948_v11 = vpop.f32.mrb[20].mxu0 }
 0x5bc   :  { %955 = vrot.lane.b32.xlu1 %v948_v11, %s10760_s24  ;;  %v8183_v36 = vpop.f32.mrb[21].mxu0  ;;  %v7006_v11 = vcombine.high %v1544_v27, %v1552_v33  ;;  %v1550_v27 = vld [vmem:[%s10737_s10 + $0x38] sm:$0xff] }
 0x5bd   :  { %v951_v38 = vpop.f32.mrb[22].mxu0  ;;  %v7020_v36 = vcombine.high %v1559_v48, %v1567_v32 }
 0x5be   :  { %v8184_v39 = vpop.f32.mrb[23].mxu0  ;;  %v1560_v38 = vld [vmem:[%s10737_s10 + $0x88] sm:$0xff]  ;;  %1866 = vmatprep.subr.bf16.mxu1 %v7006_v11  ;;  %v1573_v11 = vld [vmem:[%s10737_s10 + $0xf0] sm:$0xff] }
 0x5bf   :  { %v1568_v39 = vld [vmem:[%s10737_s10 + $0xc8] sm:$0xff] }
 0x5c0   :  { %v7021_v45 = vcombine.low %v1560_v38, %v1568_v39 }
 0x5f9   :  { %v1065_v40 = vpop.f32.mrb[24].mxu0 }
 0x5fa   :  { %1071 = vst.msk [vmem:[#allocation2 + $0x8] sm:$0xff] %vm494_vm2, %v1065_v40  ;;  %v8195_v23 = vpop.f32.mrb[25].mxu0  ;;  %v1545_v40 = vld [vmem:[%s10737_s10 + $0x10] sm:$0xff] }
 0x5fb   :  { %v1068_v28 = vpop.f32.mrb[26].mxu0  ;;  %v7022_v23 = vcombine.high %v1560_v38, %v1568_v39  ;;  %v1574_v38 = vld [vmem:[%s10737_s10 + $0xf8] sm:$0xff] }
 0x5fc   :  { %v8196_v44 = vpop.f32.mrb[27].mxu0  ;;  %v1553_v28 = vld [vmem:[%s10737_s10 + $0x50] sm:$0xff] }
 0x5fd   :  { %v1546_v44 = vld [vmem:[%s10737_s10 + $0x18] sm:$0xff]  ;;  %v7008_v46 = vcombine.high %v1545_v40, %v1553_v28 }
 0x601   :  { %v1179_v35 = vpop.f32.mrb[28].mxu0 }
 0x602   :  { %1186 = vrot.lane.b32.xlu0 %v1179_v35, %s10764_s2  ;;  %v8207_v37 = vpop.f32.mrb[29].mxu0  ;;  %v1554_v35 = vld [vmem:[%s10737_s10 + $0x58] sm:$0xff] }
 0x603   :  { %v1182_v43 = vpop.f32.mrb[30].mxu0  ;;  %v7019_v37 = vcombine.low %v1559_v48, %v1567_v32 }
 0x604   :  { %v8208_v50 = vpop.f32.mrb[31].mxu0  ;;  %v7007_v43 = vcombine.low %v1545_v40, %v1553_v28 }
 0x605   :  { %v7009_v50 = vcombine.low %v1546_v44, %v1554_v35 }
 0x609   :  { %v1297_v47 = vpop.f32.mrb[32].mxu0 }
 0x60a   :  { %1304 = vrot.lane.b32.xlu0 %v1297_v47, %s10762_s6  ;;  %v8219_v49 = vpop.f32.mrb[33].mxu0  ;;  %v7010_v47 = vcombine.high %v1546_v44, %v1554_v35  ;;  %s10792_s6 = smov 16  }
 0x60b   :  { %v1300_v51 = vpop.f32.mrb[34].mxu0 }
 0x60c   :  { %v8220_v52 = vpop.f32.mrb[35].mxu0 }
 0x611   :  { %v1415_v53 = vpop.f32.mrb[36].mxu0 }
 0x612   :  { %1422 = vrot.lane.b32.xlu0 %v1415_v53, %s10760_s24  ;;  %v8231_v54 = vpop.f32.mrb[37].mxu0  ;;  %s10793_s24 = smov 24  }
 0x613   :  { %v1418_v55 = vpop.f32.mrb[38].mxu0 }
 0x614   :  { %v8232_v17 = vpop.f32.mrb[39].mxu0 }
 0x615   :  { %v7001_v17 = vld [vmem:[%s10739_s14] ss:$0 sm:$0xff] }
 0x61e   :  { %v718_v56 = vpop.permute.xlu1 %717 }
 0x61f   :  { %721 = vst.msk [vmem:[#allocation2] sm:$0xff] %vm720_vm4, %v718_v56 }
 0x626   :  { %v837_v57 = vpop.permute.xlu1 %836 }
 0x627   :  { %840 = vst.msk [vmem:[#allocation2] sm:$0xff] %vm839_vm5, %v837_v57 }
 0x62e   :  { %v956_v58 = vpop.permute.xlu1 %955 }
 0x62f   :  { %959 = vst.msk [vmem:[#allocation2] sm:$0xff] %vm958_vm6, %v956_v58 }
 0x636   :  { %v1426_v42 = vld [vmem:[#allocation2] sm:$0xff] }
 0x674   :  { %v1187_v60 = vpop.permute.xlu0 %1186 }
 0x675   :  { %1189 = vst.msk [vmem:[#allocation2 + $0x8] sm:$0xff] %vm720_vm4, %v1187_v60  ;;  %v7002_v60 = vld [vmem:[%s10740_s15] ss:$0 sm:$0xff] }
 0x67c   :  { %v1305_v61 = vpop.permute.xlu0 %1304 }
 0x67d   :  { %1307 = vst.msk [vmem:[#allocation2 + $0x8] sm:$0xff] %vm839_vm5, %v1305_v61 }
 0x684   :  { %v1423_v25 = vpop.permute.xlu0 %1422 }
 0x685   :  { %1425 = vst.msk [vmem:[#allocation2 + $0x8] sm:$0xff] %vm958_vm6, %v1423_v25 }
 0x68c   :  { %v1427_v62 = vld [vmem:[#allocation2 + $0x8] sm:$0xff] }
 0x68d   :  { %v1432_v63 = vpack.c.bf16 %v1427_v62, %v1426_v42  ;;  %v1561_v42 = vld [vmem:[%s10737_s10 + $0x90] sm:$0xff] }
 0x68e   :  { %v1569_v62 = vld [vmem:[%s10737_s10 + $0xd0] sm:$0xff] }
 0x68f   :  { %8238 = vmatmul.mubr.msk.bf16.vlgmr.msra.gmra.mrb[36].mxu1 %vm441_vm15, %v1432_v63  ;;  %v1562_v63 = vld [vmem:[%s10737_s10 + $0x98] sm:$0xff] }
 0x690   :  { %1898 = vmatprep.mubr.bf16.mxu1 %v8774_v29  ;;  %1867 = vmatpush1.bf16.msra.mxu1 %v7005_v34  ;;  %v1565_v34 = vld [vmem:[%s10737_s10 + $0xb0] sm:$0xff] }
 0x691   :  { %1868 = vmatprep.subr.bf16.mxu1 %v7022_v23  ;;  %v7032_v44 = vcombine.high %v1565_v34, %v1573_v11 }
 0x694   :  { %1869 = vmatpush1.bf16.msra.mxu1 %v7021_v45 }
 0x695   :  { %1952 = vmatprep.subr.bf16.mxu1 %v7010_v47  ;;  %v8400_v47 = vld [vmem:[%s10738_s12 + $0x80] sm:$0xff]  }
 0x762   :  { %v1489_v3 = vpop.f32.mrb[36].mxu1 }
 0x763   :  { %v1490_v5 = vadd.f32 %v6997_v1, %v1489_v3  ;;  %v8239_v59 = vpop.f32.mrb[37].mxu1 }
 0x764   :  { %v1492_v6 = vpop.f32.mrb[38].mxu1 }
 0x765   :  { %v1493_v7 = vadd.f32 %v6997_v1, %v1492_v6  ;;  %v8240_v8 = vpop.f32.mrb[39].mxu1  ;;  %v1496_v9 = vadd.f32 %v1490_v5, %v9020_v41  ;;  %v1570_v1 = vld [vmem:[%s10737_s10 + $0xd8] sm:$0xff]  ;;  %v1547_v6 = vld [vmem:[%s10737_s10 + $0x20] sm:$0xff] }
 0x766   :  { %v1548_v8 = vld [vmem:[%s10737_s10 + $0x28] sm:$0xff] }
 0x767   :  { %v1500_v10 = vsel %vm441_vm15, %v1496_v9, 0.0  ;;  %v1497_v12 = vadd.f32 %v1493_v7, %v9022_v15  ;;  %v1543_v15 = vld [vmem:[%s10737_s10] sm:$0xff] }
 0x768   :  { %1501 = vadd.xlane.f32.xlu1 %v1500_v10  ;;  %v7003_v30 = vcombine.low %v1543_v15, %v1551_v26  ;;  %v7004_v31 = vcombine.high %v1543_v15, %v1551_v26  ;;  %v1555_v7 = vld [vmem:[%s10737_s10 + $0x60] sm:$0xff]  ;;  %v1549_v15 = vld [vmem:[%s10737_s10 + $0x30] sm:$0xff] }
 0x769   :  { %v1503_v13 = vsel %vm441_vm15, %v1497_v12, 0.0  ;;  %v1557_v26 = vld [vmem:[%s10737_s10 + $0x70] sm:$0xff] }
 0x76a   :  { %1504 = vadd.xlane.f32.xlu0 %v1503_v13  ;;  %1823 = vmatprep.subr.bf16.mxu0 %v7004_v31  ;;  %v7026_v13 = vcombine.high %v1562_v63, %v1570_v1  ;;  %v7016_v39 = vcombine.high %v1549_v15, %v1557_v26  ;;  %v7015_v23 = vcombine.low %v1549_v15, %v1557_v26 }
 0x76b   :  { %1824 = vmatpush1.bf16.msra.mxu0 %v7003_v30  ;;  %v1558_v30 = vld [vmem:[%s10737_s10 + $0x78] sm:$0xff] }
 0x76c   :  { %1825 = vmatprep.subr.bf16.mxu0 %v7020_v36  ;;  %v1566_v36 = vld [vmem:[%s10737_s10 + $0xb8] sm:$0xff]  ;;  %v7018_v40 = vcombine.high %v1550_v27, %v1558_v30  ;;  %v7017_v28 = vcombine.low %v1550_v27, %v1558_v30 }
 0x76d   :  { %v7034_v35 = vcombine.high %v1566_v36, %v1574_v38  ;;  %v7033_v45 = vcombine.low %v1566_v36, %v1574_v38 }
 0x76f   :  { %1826 = vmatpush1.bf16.msra.mxu0 %v7019_v37  ;;  %v8397_v37 = vld [vmem:[%s10738_s12 + $0x40] sm:$0xff]  }
 0x770   :  { %1909 = vmatprep.subr.bf16.mxu0 %v7008_v46  ;;  %v8399_v46 = vld [vmem:[%s10738_s12] sm:$0xff]  }
 0x7f5   :  { %v1502_v4 = vpop.xlane.xlu1 %1501 }
 0x7f6   :  { %v1507_v14 = vmul.f32 0.03125, %v1502_v4  ;;  %v7023_v4 = vcombine.low %v1561_v42, %v1569_v62 }
 0x7f7   :  { %v1505_v16 = vpop.xlane.xlu0 %1504 }
 0x7f8   :  { %v1509_v18 = vsub.f32 %v1496_v9, %v1507_v14  ;;  %v1508_v19 = vmul.f32 0.03125, %v1505_v16  ;;  %v1556_v9 = vld [vmem:[%s10737_s10 + $0x68] sm:$0xff]  ;;  %v7025_v14 = vcombine.low %v1562_v63, %v1570_v1  ;;  %v1563_v16 = vld [vmem:[%s10737_s10 + $0xa0] sm:$0xff] }
 0x7f9   :  { %v8416_v63 = vld [vmem:[%s10738_s12 + $0xa0] sm:$0xff]   ;;  %v8417_v1 = vld [vmem:[%s10738_s12 + $0x68] sm:$0xff]  }
 0x7fa   :  { %v1510_v20 = vsub.f32 %v1497_v12, %v1508_v19  ;;  %v1511_v21 = vmul.f32 %v1509_v18, %v1509_v18  ;;  %v7024_v12 = vcombine.high %v1561_v42, %v1569_v62  ;;  %v1564_v19 = vld [vmem:[%s10737_s10 + $0xa8] sm:$0xff]  ;;  %v8414_v42 = vld [vmem:[%s10738_s12 + $0xe0] sm:$0xff]  }
 0x7fb   :  { %v8415_v62 = vld [vmem:[%s10738_s12 + $0x20] sm:$0xff]  }
 0x7fc   :  { %v1513_v22 = vsel %vm441_vm15, %v1511_v21, 0.0  ;;  %v1512_v24 = vmul.f32 %v1510_v20, %v1510_v20  ;;  %v7012_v21 = vcombine.high %v1547_v6, %v1555_v7 }
 0x7fd   :  { %1514 = vadd.xlane.f32.xlu0 %v1513_v22  ;;  %v7014_v22 = vcombine.high %v1548_v8, %v1556_v9 }
 0x7fe   :  { %v1516_v41 = vsel %vm441_vm15, %v1512_v24, 0.0  ;;  %v7011_v24 = vcombine.low %v1547_v6, %v1555_v7  ;;  %v8419_v6 = vld [vmem:[%s10738_s12 + $0x28] sm:$0xff]  }
 0x7ff   :  { %1517 = vadd.xlane.f32.xlu1 %v1516_v41  ;;  %v7013_v41 = vcombine.low %v1548_v8, %v1556_v9  ;;  %v8420_v7 = vld [vmem:[%s10738_s12 + $0xa8] sm:$0xff]   ;;  %v8421_v8 = vld [vmem:[%s10738_s12 + $0x70] sm:$0xff]  }
 0x800   :  { %v8422_v9 = vld [vmem:[%s10738_s12 + $0xf0] sm:$0xff]  }
 0x88a   :  { %v1515_v49 = vpop.xlane.xlu0 %1514 }
 0x88b   :  { %v1519_v51 = vmul.f32 0.03125, %v1515_v49  ;;  %v8401_v49 = vld [vmem:[%s10738_s12 + $0x48] sm:$0xff]  }
 0x88c   :  { %v1518_v52 = vpop.xlane.xlu1 %1517 }
 0x88d   :  { %v1521_v53 = vadd.f32 1e-05, %v1519_v51  ;;  %v1520_v54 = vmul.f32 0.03125, %v1518_v52  ;;  %v8402_v51 = vld [vmem:[%s10738_s12 + $0xc8] sm:$0xff]  }
 0x88e   :  { %v8403_v52 = vld [vmem:[%s10738_s12 + $0x8] sm:$0xff]  }
 0x88f   :  { %8699 = vrsqrt.f32 %v1521_v53  ;;  %v1522_v55 = vadd.f32 1e-05, %v1520_v54  ;;  %v8404_v53 = vld [vmem:[%s10738_s12 + $0x88] sm:$0xff]   ;;  %v8405_v54 = vld [vmem:[%s10738_s12 + $0x50] sm:$0xff]  }
 0x891   :  { %8701 = vrsqrt.f32 %v1522_v55  ;;  %v8406_v55 = vld [vmem:[%s10738_s12 + $0xd0] sm:$0xff]  }
 0x899   :  { %v8700_v56 = vpop.eup %8699 }
 0x89a   :  { %v1525_v57 = vmul.f32 %v8700_v56, %v1509_v18  ;;  %v1571_v18 = vld [vmem:[%s10737_s10 + $0xe0] sm:$0xff]  ;;  %v8408_v56 = vld [vmem:[%s10738_s12 + $0x90] sm:$0xff]  }
 0x89b   :  { %v8702_v58 = vpop.eup %8701  ;;  %v7028_v31 = vcombine.high %v1563_v16, %v1571_v18  ;;  %v7027_v48 = vcombine.low %v1563_v16, %v1571_v18  ;;  %v8428_v16 = vld [vmem:[%s10738_s12 + $0xb8] sm:$0xff]   ;;  %v8429_v18 = vld [vmem:[%s10738_s12 + $0x140] sm:$0xff]  }
 0x89c   :  { %v1533_v61 = vmul.f32 %v7001_v17, %v1525_v57  ;;  %v1526_v25 = vmul.f32 %v8702_v58, %v1510_v20  ;;  %v1572_v20 = vld [vmem:[%s10737_s10 + $0xe8] sm:$0xff]  ;;  %v8409_v57 = vld [vmem:[%s10738_s12 + $0x58] sm:$0xff]  }
 0x89d   :  { %v7030_v33 = vcombine.high %v1564_v19, %v1572_v20  ;;  %v7029_v32 = vcombine.low %v1564_v19, %v1572_v20  ;;  %v8410_v58 = vld [vmem:[%s10738_s12 + $0xd8] sm:$0xff]   ;;  %v8430_v19 = vld [vmem:[%s10738_s12 + $0x1c0] sm:$0xff]   ;;  %v1581_v20 = vshrl.u32 %v132_v2, 7 }
 0x89e   :  { %v1534_v3 = vmul.f32 %v7001_v17, %v1526_v25  ;;  %v9304_v5 = vadd.f32 %v7002_v60, %v1533_v61  ;;  %v8407_v17 = vld [vmem:[%s10738_s12 + $0x10] sm:$0xff]   ;;  %v8412_v61 = vld [vmem:[%s10738_s12 + $0x98] sm:$0xff]   ;;  %v8413_v25 = vld [vmem:[%s10738_s12 + $0x60] sm:$0xff]  }
 0x89f   :  { %v9494_v15 = vsub.s32 3, %v1581_v20 }
 0x8a0   :  { %v9306_v59 = vadd.f32 %v7002_v60, %v1534_v3  ;;  %v8411_v60 = vld [vmem:[%s10738_s12 + $0x18] sm:$0xff]   ;;  %v8418_v3 = vld [vmem:[%s10738_s12 + $0xe8] sm:$0xff]  }
 0x8a2   :  { %v9322_v10 = vpack.c.bf16 %v9306_v59, %v9304_v5 }
 0x8a4   :  { %7035 = vmatmul.mubr.msk.bf16.vlgmr.msra.gmra.mrb[40].mxu0 %vm441_vm15, %v9322_v10  ;;  %7036 = vmatmul.mubr.msk.bf16.vlgmr.msra.gmra.mrb[40].mxu1 %vm441_vm15, %v9322_v10 }
 0x8a5   :  { %1910 = vmatpush1.bf16.msra.mxu0 %v7007_v43  ;;  %1953 = vmatpush1.bf16.msra.mxu1 %v7009_v50  ;;  %v8398_v43 = vld [vmem:[%s10738_s12 + $0xc0] sm:$0xff]   ;;  %v7031_v50 = vcombine.low %v1565_v34, %v1573_v11  ;;  %v9504_v34 = vsub.s32 5, %v1581_v20  ;;  %v9506_v11 = vsub.s32 7, %v1581_v20 }
 0x8a6   :  { %1911 = vmatprep.subr.bf16.mxu0 %v7024_v12  ;;  %1954 = vmatprep.subr.bf16.mxu1 %v7026_v13  ;;  %v8424_v12 = vld [vmem:[%s10738_s12 + $0xb0] sm:$0xff]   ;;  %v8425_v13 = vld [vmem:[%s10738_s12 + $0x78] sm:$0xff]  }
 0x8a7   :  { %1941 = vmatprep.mubr.bf16.mxu0 %v8774_v29  ;;  %1984 = vmatprep.mubr.bf16.mxu1 %v8774_v29 }
 0x8a9   :  { %1912 = vmatpush1.bf16.msra.mxu0 %v7023_v4  ;;  %1955 = vmatpush1.bf16.msra.mxu1 %v7025_v14  ;;  %v8426_v4 = vld [vmem:[%s10738_s12 + $0xf8] sm:$0xff]  }
 0x8aa   :  { %1995 = vmatprep.subr.bf16.mxu0 %v7012_v21  ;;  %2038 = vmatprep.subr.bf16.mxu1 %v7014_v22  ;;  %v8427_v14 = vld [vmem:[%s10738_s12 + $0x38] sm:$0xff]   ;;  %v9485_v21 = vsub.s32 0, %v1581_v20  ;;  %v9487_v22 = vsub.s32 2, %v1581_v20 }
 0x8ac   :  { %7037 = vmatmul.mubr.msk.bf16.vlgmr.msra.gmra.mrb[44].mxu0 %vm441_vm15, %v9322_v10  ;;  %7038 = vmatmul.mubr.msk.bf16.vlgmr.msra.gmra.mrb[44].mxu1 %vm441_vm15, %v9322_v10 }
 0x8ad   :  { %1996 = vmatpush1.bf16.msra.mxu0 %v7011_v24  ;;  %2039 = vmatpush1.bf16.msra.mxu1 %v7013_v41  ;;  %v1576_v24 = vld [vmem:[%s10741_s11] sm:$0xff]  ;;  %v9492_v41 = vsub.s32 1, %v1581_v20 }
 0x8ae   :  { %1997 = vmatprep.subr.bf16.mxu0 %v7028_v31  ;;  %2040 = vmatprep.subr.bf16.mxu1 %v7030_v33  ;;  %v1583_v26 = vrot.slane %v1576_v24, %v9485_v21  ;;  %v1591_v27 = vrot.slane %v1576_v24, %v9487_v22  ;;  %v1595_v2 = vrot.slane %v1576_v24, %v9494_v15  ;;  %v9500_v31 = vsub.s32 4, %v1581_v20 }
 0x8af   :  { %2027 = vmatprep.mubr.bf16.mxu0 %v8774_v29  ;;  %2070 = vmatprep.mubr.bf16.mxu1 %v8774_v29  ;;  %v1587_v30 = vrot.slane %v1576_v24, %v9492_v41  ;;  %v9502_v33 = vsub.s32 6, %v1581_v20 }
 0x8b1   :  { %1998 = vmatpush1.bf16.msra.mxu0 %v7027_v48  ;;  %2041 = vmatpush1.bf16.msra.mxu1 %v7029_v32 }
 0x8b2   :  { %2081 = vmatprep.subr.bf16.mxu0 %v7016_v39  ;;  %2124 = vmatprep.subr.bf16.mxu1 %v7018_v40 }
 0x8b4   :  { %7039 = vmatmul.mubr.msk.bf16.vlgmr.msra.gmra.mrb[48].mxu0 %vm441_vm15, %v9322_v10  ;;  %7040 = vmatmul.mubr.msk.bf16.vlgmr.msra.gmra.mrb[48].mxu1 %vm441_vm15, %v9322_v10 }
 0x8b5   :  { %2082 = vmatpush1.bf16.msra.mxu0 %v7015_v23  ;;  %2125 = vmatpush1.bf16.msra.mxu1 %v7017_v28 }
 0x8b6   :  { %2083 = vmatprep.subr.bf16.mxu0 %v7032_v44  ;;  %2126 = vmatprep.subr.bf16.mxu1 %v7034_v35 }
 0x8b7   :  { %2113 = vmatprep.mubr.bf16.mxu0 %v8774_v29  ;;  %2156 = vmatprep.mubr.bf16.mxu1 %v8774_v29 }
 0x8b9   :  { %2084 = vmatpush1.bf16.msra.mxu0 %v7031_v50  ;;  %2127 = vmatpush1.bf16.msra.mxu1 %v7033_v45 }
 0x8ba   :  { %7724 = vmatprep.subr.bf16.mxu0 %v8397_v37  ;;  %7746 = vmatprep.subr.bf16.mxu1 %v8398_v43 }
 0x8bc   :  { %7041 = vmatmul.mubr.msk.bf16.vlgmr.msra.gmra.mrb[52].mxu0 %vm441_vm15, %v9322_v10  ;;  %7042 = vmatmul.mubr.msk.bf16.vlgmr.msra.gmra.mrb[52].mxu1 %vm441_vm15, %v9322_v10  ;;  %v8423_v10 = vld [vmem:[%s10738_s12 + $0x30] sm:$0xff]  }
 0x8bd   :  { %7725 = vmatpush3.bf16.msra.mxu0 %v8399_v46  ;;  %7747 = vmatpush3.bf16.msra.mxu1 %v8400_v47  ;;  %v1599_v46 = vrot.slane %v1576_v24, %v9500_v31  ;;  %v1607_v47 = vrot.slane %v1576_v24, %v9502_v33 }
 0x8be   :  { %7726 = vmatprep.subr.bf16.mxu0 %v8401_v49  ;;  %7748 = vmatprep.subr.bf16.mxu1 %v8402_v51 }
 0x8c1   :  { %7727 = vmatpush3.bf16.msra.mxu0 %v8403_v52  ;;  %7749 = vmatpush3.bf16.msra.mxu1 %v8404_v53  ;;  %v1603_v52 = vrot.slane %v1576_v24, %v9504_v34  ;;  %v1611_v53 = vrot.slane %v1576_v24, %v9506_v11 }
 0x8c2   :  { %7728 = vmatprep.subr.bf16.mxu0 %v8405_v54  ;;  %7750 = vmatprep.subr.bf16.mxu1 %v8406_v55 }
 0x8c5   :  { %7729 = vmatpush3.bf16.msra.mxu0 %v8407_v17  ;;  %7751 = vmatpush3.bf16.msra.mxu1 %v8408_v56 }
 0x8c6   :  { %7730 = vmatprep.subr.bf16.mxu0 %v8409_v57  ;;  %7752 = vmatprep.subr.bf16.mxu1 %v8410_v58 }
 0x8c9   :  { %7731 = vmatpush3.bf16.msra.mxu0 %v8411_v60  ;;  %7753 = vmatpush3.bf16.msra.mxu1 %v8412_v61 }
 0x8ca   :  { %7732 = vmatprep.subr.bf16.mxu0 %v8413_v25  ;;  %7754 = vmatprep.subr.bf16.mxu1 %v8414_v42  ;;  %v9515_v25 = vld [vmem:[%s10741_s11 + $0x8] sm:$0xff] }
 0x8cd   :  { %7733 = vmatpush3.bf16.msra.mxu0 %v8415_v62  ;;  %7755 = vmatpush3.bf16.msra.mxu1 %v8416_v63 }
 0x8ce   :  { %7734 = vmatprep.subr.bf16.mxu0 %v8417_v1  ;;  %7756 = vmatprep.subr.bf16.mxu1 %v8418_v3 }
 0x8d1   :  { %7735 = vmatpush3.bf16.msra.mxu0 %v8419_v6  ;;  %7757 = vmatpush3.bf16.msra.mxu1 %v8420_v7  ;;  %v8431_v7 = vld [vmem:[%s10738_s12 + $0x100] sm:$0xff]  }
 0x8d2   :  { %7736 = vmatprep.subr.bf16.mxu0 %v8421_v8  ;;  %7758 = vmatprep.subr.bf16.mxu1 %v8422_v9  ;;  %v8432_v8 = vld [vmem:[%s10738_s12 + $0x180] sm:$0xff]  }
 0x8d5   :  { %7737 = vmatpush3.bf16.msra.mxu0 %v8423_v10  ;;  %7759 = vmatpush3.bf16.msra.mxu1 %v8424_v12 }
 0x8d6   :  { %7738 = vmatprep.subr.bf16.mxu0 %v8425_v13  ;;  %7760 = vmatprep.subr.bf16.mxu1 %v8426_v4  ;;  %v8433_v4 = vld [vmem:[%s10738_s12 + $0x148] sm:$0xff]  }
 0x8d9   :  { %7739 = vmatpush3.bf16.msra.mxu0 %v8427_v14  ;;  %7761 = vmatpush3.bf16.msra.mxu1 %v8428_v16  ;;  %v8434_v14 = vld [vmem:[%s10738_s12 + $0x1c8] sm:$0xff]   ;;  %v1615_v16 = vrot.slane %v9515_v25, %v9485_v21 }
 0x8da   :  { %7768 = vmatprep.subr.bf16.mxu0 %v8429_v18  ;;  %7790 = vmatprep.subr.bf16.mxu1 %v8430_v19 }
 0x977   :  { %v1857_v48 = vpop.f32.mrb[40].mxu0  ;;  %v1900_v32 = vpop.f32.mrb[40].mxu1 }
 0x978   :  { %v1858_v36 = vadd.f32 %v1857_v48, %v1583_v26  ;;  %v1901_v38 = vadd.f32 %v1900_v32, %v1591_v27  ;;  %v1859_v39 = vpop.f32.mrb[41].mxu0  ;;  %v1902_v40 = vpop.f32.mrb[41].mxu1  ;;  %v1619_v32 = vrot.slane %v9515_v25, %v9492_v41 }
 0x979   :  { %v1860_v23 = vadd.f32 %v1859_v39, %v1587_v30  ;;  %v1903_v28 = vadd.f32 %v1902_v40, %v1595_v2  ;;  %v1861_v44 = vpop.f32.mrb[42].mxu0  ;;  %v1904_v35 = vpop.f32.mrb[42].mxu1  ;;  %v8435_v39 = vld [vmem:[%s10738_s12 + $0x108] sm:$0xff]  }
 0x97a   :  { %v1862_v37 = vadd.f32 %v1861_v44, %v1583_v26  ;;  %v1905_v43 = vadd.f32 %v1904_v35, %v1591_v27  ;;  %v1863_v50 = vpop.f32.mrb[43].mxu0  ;;  %v1906_v45 = vpop.f32.mrb[43].mxu1  ;;  %v2167_v54 = vmax.f32 %v1858_v36, 0.0  ;;  %v2169_v55 = vmax.f32 %v1901_v38, 0.0  ;;  %v8436_v40 = vld [vmem:[%s10738_s12 + $0x188] sm:$0xff]  }
 0x97b   :  { %v1864_v49 = vadd.f32 %v1863_v50, %v1587_v30  ;;  %v1907_v51 = vadd.f32 %v1906_v45, %v1595_v2  ;;  %v2168_v57 = vmax.f32 %v1860_v23, 0.0  ;;  %v2170_v58 = vmax.f32 %v1903_v28, 0.0  ;;  %v8438_v50 = vld [vmem:[%s10738_s12 + $0x1d0] sm:$0xff]  }
 0x97c   :  { %v2183_v17 = vmax.f32 %v1862_v37, 0.0  ;;  %v2185_v56 = vmax.f32 %v1905_v43, 0.0  ;;  %v1623_v26 = vrot.slane %v9515_v25, %v9487_v22  ;;  %v1627_v23 = vrot.slane %v9515_v25, %v9494_v15  ;;  %v8437_v43 = vld [vmem:[%s10738_s12 + $0x150] sm:$0xff]  }
 0x97d   :  { %v2184_v60 = vmax.f32 %v1864_v49, 0.0  ;;  %v2186_v61 = vmax.f32 %v1907_v51, 0.0 }
 0x97e   :  { %v2455_v42 = vpack.c.bf16 %v2183_v17, %v2167_v54  ;;  %v2457_v62 = vpack.c.bf16 %v2185_v56, %v2169_v55  ;;  %v8439_v56 = vld [vmem:[%s10738_s12 + $0x110] sm:$0xff]  }
 0x97f   :  { %v2456_v63 = vpack.c.bf16 %v2184_v60, %v2168_v57  ;;  %v2458_v1 = vpack.c.bf16 %v2186_v61, %v2170_v58  ;;  %v1943_v3 = vpop.f32.mrb[44].mxu0  ;;  %v1986_v6 = vpop.f32.mrb[44].mxu1  ;;  %v8440_v57 = vld [vmem:[%s10738_s12 + $0x190] sm:$0xff]  }
 0x980   :  { %v1944_v9 = vadd.f32 %v1943_v3, %v1599_v46  ;;  %v1987_v10 = vadd.f32 %v1986_v6, %v1607_v47  ;;  %v1945_v12 = vpop.f32.mrb[45].mxu0  ;;  %v1988_v13 = vpop.f32.mrb[45].mxu1 }
 0x981   :  { %v1946_v18 = vadd.f32 %v1945_v12, %v1603_v52  ;;  %v1989_v19 = vadd.f32 %v1988_v13, %v1611_v53  ;;  %v1947_v20 = vpop.f32.mrb[46].mxu0  ;;  %v1990_v24 = vpop.f32.mrb[46].mxu1  ;;  %3278 = vmatprep.mubr.bf16.mxu0 %v2456_v63  ;;  %3319 = vmatprep.mubr.bf16.mxu1 %v2458_v1  ;;  %v8442_v63 = vld [vmem:[%s10738_s12 + $0x1d8] sm:$0xff]  }
 0x982   :  { %v1948_v27 = vadd.f32 %v1947_v20, %v1599_v46  ;;  %v1991_v30 = vadd.f32 %v1990_v24, %v1607_v47  ;;  %v1949_v2 = vpop.f32.mrb[47].mxu0  ;;  %v1992_v48 = vpop.f32.mrb[47].mxu1  ;;  %3279 = vmatmul.mubr.bf16.vlgmr.msra.gmra.mrb[56].mxu0 %v2455_v42  ;;  %3320 = vmatmul.mubr.bf16.vlgmr.msra.gmra.mrb[56].mxu1 %v2457_v62  ;;  %v2171_v28 = vmax.f32 %v1944_v9, 0.0  ;;  %v2173_v44 = vmax.f32 %v1987_v10, 0.0  ;;  %v8441_v62 = vld [vmem:[%s10738_s12 + $0x158] sm:$0xff]  }
 0x983   :  { %v1950_v36 = vadd.f32 %v1949_v2, %v1603_v52  ;;  %v1993_v38 = vadd.f32 %v1992_v48, %v1611_v53  ;;  %7769 = vmatpush3.bf16.msra.mxu0 %v8431_v7  ;;  %7791 = vmatpush3.bf16.msra.mxu1 %v8432_v8  ;;  %v2172_v45 = vmax.f32 %v1946_v18, 0.0  ;;  %v2174_v46 = vmax.f32 %v1989_v19, 0.0  ;;  %v8443_v20 = vld [vmem:[%s10738_s12 + $0x118] sm:$0xff]   ;;  %v8445_v48 = vld [vmem:[%s10738_s12 + $0x160] sm:$0xff]  }
 0x984   :  { %v2187_v35 = vmax.f32 %v1948_v27, 0.0  ;;  %v2189_v37 = vmax.f32 %v1991_v30, 0.0  ;;  %7770 = vmatprep.subr.bf16.mxu0 %v8433_v4  ;;  %7792 = vmatprep.subr.bf16.mxu1 %v8434_v14  ;;  %v1631_v8 = vrot.slane %v9515_v25, %v9500_v31  ;;  %v1639_v4 = vrot.slane %v9515_v25, %v9502_v33 }
 0x985   :  { %v2188_v47 = vmax.f32 %v1950_v36, 0.0  ;;  %v2190_v49 = vmax.f32 %v1993_v38, 0.0  ;;  %v1635_v14 = vrot.slane %v9515_v25, %v9504_v34  ;;  %v1643_v24 = vrot.slane %v9515_v25, %v9506_v11 }
 0x986   :  { %v9549_v51 = vpack.c.bf16 %v2187_v35, %v2171_v28  ;;  %v9551_v52 = vpack.c.bf16 %v2189_v37, %v2173_v44 }
 0x987   :  { %v2460_v53 = vpack.c.bf16 %v2188_v47, %v2172_v45  ;;  %v2462_v54 = vpack.c.bf16 %v2190_v49, %v2174_v46  ;;  %7771 = vmatpush3.bf16.msra.mxu0 %v8435_v39  ;;  %7793 = vmatpush3.bf16.msra.mxu1 %v8436_v40  ;;  %v2029_v55 = vpop.f32.mrb[48].mxu0  ;;  %v2072_v17 = vpop.f32.mrb[48].mxu1 }
 0x988   :  { %v2030_v58 = vadd.f32 %v2029_v55, %v1615_v16  ;;  %v2073_v60 = vadd.f32 %v2072_v17, %v1623_v26  ;;  %v2031_v61 = vpop.f32.mrb[49].mxu0  ;;  %v2074_v42 = vpop.f32.mrb[49].mxu1  ;;  %7772 = vmatprep.subr.bf16.mxu0 %v8437_v43  ;;  %7794 = vmatprep.subr.bf16.mxu1 %v8438_v50  ;;  %v8447_v43 = vld [vmem:[%s10738_s12 + $0x120] sm:$0xff]  }
 0x989   :  { %v2032_v1 = vadd.f32 %v2031_v61, %v1619_v32  ;;  %v2075_v3 = vadd.f32 %v2074_v42, %v1627_v23  ;;  %v2033_v6 = vpop.f32.mrb[50].mxu0  ;;  %v2076_v7 = vpop.f32.mrb[50].mxu1  ;;  %3360 = vmatprep.mubr.bf16.mxu0 %v2460_v53  ;;  %3401 = vmatprep.mubr.bf16.mxu1 %v2462_v54  ;;  %v8448_v50 = vld [vmem:[%s10738_s12 + $0x1a0] sm:$0xff]   ;;  %v8449_v53 = vld [vmem:[%s10738_s12 + $0x168] sm:$0xff]  }
 0x98a   :  { %v2034_v9 = vadd.f32 %v2033_v6, %v1615_v16  ;;  %v2077_v10 = vadd.f32 %v2076_v7, %v1623_v26  ;;  %v2035_v12 = vpop.f32.mrb[51].mxu0  ;;  %v2078_v13 = vpop.f32.mrb[51].mxu1  ;;  %v8444_v16 = vld [vmem:[%s10738_s12 + $0x198] sm:$0xff]   ;;  %v2175_v26 = vmax.f32 %v2030_v58, 0.0  ;;  %v2177_v27 = vmax.f32 %v2073_v60, 0.0  ;;  %v8450_v54 = vld [vmem:[%s10738_s12 + $0x1e8] sm:$0xff]  }
 0x98b   :  { %v2036_v18 = vadd.f32 %v2035_v12, %v1619_v32  ;;  %v2079_v19 = vadd.f32 %v2078_v13, %v1627_v23  ;;  %7773 = vmatpush3.bf16.msra.mxu0 %v8439_v56  ;;  %7795 = vmatpush3.bf16.msra.mxu1 %v8440_v57  ;;  %v8446_v32 = vld [vmem:[%s10738_s12 + $0x1e0] sm:$0xff]   ;;  %v2176_v36 = vmax.f32 %v2032_v1, 0.0  ;;  %v2178_v38 = vmax.f32 %v2075_v3, 0.0  ;;  %v8451_v1 = vld [vmem:[%s10738_s12 + $0x128] sm:$0xff]   ;;  %v8454_v12 = vld [vmem:[%s10738_s12 + $0x1f0] sm:$0xff]  }
 0x98c   :  { %v2191_v30 = vmax.f32 %v2034_v9, 0.0  ;;  %v2193_v2 = vmax.f32 %v2077_v10, 0.0  ;;  %7774 = vmatprep.subr.bf16.mxu0 %v8441_v62  ;;  %7796 = vmatprep.subr.bf16.mxu1 %v8442_v63  ;;  %v8452_v3 = vld [vmem:[%s10738_s12 + $0x1a8] sm:$0xff]  }
 0x98d   :  { %v2192_v39 = vmax.f32 %v2036_v18, 0.0  ;;  %v2194_v40 = vmax.f32 %v2079_v19, 0.0 }
 0x98e   :  { %v9585_v23 = vpack.c.bf16 %v2191_v30, %v2175_v26  ;;  %v9587_v25 = vpack.c.bf16 %v2193_v2, %v2177_v27  ;;  %v8455_v26 = vld [vmem:[%s10738_s12 + $0x130] sm:$0xff]   ;;  %v8457_v30 = vld [vmem:[%s10738_s12 + $0x178] sm:$0xff]  }
 0x98f   :  { %v9589_v28 = vpack.c.bf16 %v2192_v39, %v2176_v36  ;;  %v9591_v44 = vpack.c.bf16 %v2194_v40, %v2178_v38  ;;  %7775 = vmatpush3.bf16.msra.mxu0 %v8443_v20  ;;  %7797 = vmatpush3.bf16.msra.mxu1 %v8444_v16  ;;  %v2115_v35 = vpop.f32.mrb[52].mxu0  ;;  %v2158_v37 = vpop.f32.mrb[52].mxu1  ;;  %v8456_v27 = vld [vmem:[%s10738_s12 + $0x1b0] sm:$0xff]   ;;  %v8458_v2 = vld [vmem:[%s10738_s12 + $0x1f8] sm:$0xff]   ;;  %v8461_v36 = vld [vmem:[%s10738_s12 + $0x240] sm:$0xff]  }
 0x990   :  { %v2116_v45 = vadd.f32 %v2115_v35, %v1631_v8  ;;  %v2159_v46 = vadd.f32 %v2158_v37, %v1639_v4  ;;  %v2117_v47 = vpop.f32.mrb[53].mxu0  ;;  %v2160_v49 = vpop.f32.mrb[53].mxu1  ;;  %7776 = vmatprep.subr.bf16.mxu0 %v8445_v48  ;;  %7798 = vmatprep.subr.bf16.mxu1 %v8446_v32  ;;  %v8459_v48 = vld [vmem:[%s10738_s12 + $0x138] sm:$0xff]   ;;  %v8462_v38 = vld [vmem:[%s10738_s12 + $0x2c0] sm:$0xff]   ;;  %v8465_v35 = vld [vmem:[%s10738_s12 + $0x248] sm:$0xff]  }
 0x991   :  { %v2118_v55 = vadd.f32 %v2117_v47, %v1635_v14  ;;  %v2161_v17 = vadd.f32 %v2160_v49, %v1643_v24  ;;  %v2119_v56 = vpop.f32.mrb[54].mxu0  ;;  %v2162_v57 = vpop.f32.mrb[54].mxu1  ;;  %v8460_v32 = vld [vmem:[%s10738_s12 + $0x1b8] sm:$0xff]   ;;  %v8463_v39 = vld [vmem:[%s10738_s12 + $0x200] sm:$0xff]   ;;  %v8466_v37 = vld [vmem:[%s10738_s12 + $0x2c8] sm:$0xff]  }
 0x992   :  { %v2120_v58 = vadd.f32 %v2119_v56, %v1631_v8  ;;  %v2163_v60 = vadd.f32 %v2162_v57, %v1639_v4  ;;  %v2121_v61 = vpop.f32.mrb[55].mxu0  ;;  %v2164_v42 = vpop.f32.mrb[55].mxu1  ;;  %v2179_v6 = vmax.f32 %v2116_v45, 0.0  ;;  %v2181_v7 = vmax.f32 %v2159_v46, 0.0  ;;  %v8453_v8 = vld [vmem:[%s10738_s12 + $0x170] sm:$0xff]   ;;  %v8464_v40 = vld [vmem:[%s10738_s12 + $0x280] sm:$0xff]  }
 0x993   :  { %v2122_v62 = vadd.f32 %v2121_v61, %v1635_v14  ;;  %v2165_v63 = vadd.f32 %v2164_v42, %v1643_v24  ;;  %7777 = vmatpush3.bf16.msra.mxu0 %v8447_v43  ;;  %7799 = vmatpush3.bf16.msra.mxu1 %v8448_v50  ;;  %v2180_v13 = vmax.f32 %v2118_v55, 0.0  ;;  %v2182_v4 = vmax.f32 %v2161_v17, 0.0  ;;  %v8467_v43 = vld [vmem:[%s10738_s12 + $0x208] sm:$0xff]   ;;  %v8473_v45 = vld [vmem:[%s10738_s12 + $0x258] sm:$0xff]   ;;  %v8479_v55 = vld [vmem:[%s10738_s12 + $0x220] sm:$0xff]  }
 0x994   :  { %v2195_v9 = vmax.f32 %v2120_v58, 0.0  ;;  %v2197_v10 = vmax.f32 %v2163_v60, 0.0  ;;  %7778 = vmatprep.subr.bf16.mxu0 %v8449_v53  ;;  %7800 = vmatprep.subr.bf16.mxu1 %v8450_v54  ;;  %v8468_v50 = vld [vmem:[%s10738_s12 + $0x288] sm:$0xff]   ;;  %v8474_v46 = vld [vmem:[%s10738_s12 + $0x2d8] sm:$0xff]   ;;  %v8477_v53 = vld [vmem:[%s10738_s12 + $0x260] sm:$0xff]  }
 0x995   :  { %v2196_v14 = vmax.f32 %v2122_v62, 0.0  ;;  %v2198_v18 = vmax.f32 %v2165_v63, 0.0  ;;  %v8475_v47 = vld [vmem:[%s10738_s12 + $0x218] sm:$0xff]   ;;  %v8478_v54 = vld [vmem:[%s10738_s12 + $0x2e0] sm:$0xff]   ;;  %v8481_v56 = vld [vmem:[%s10738_s12 + $0x268] sm:$0xff]  }
 0x996   :  { %v9617_v19 = vpack.c.bf16 %v2195_v9, %v2179_v6  ;;  %v9619_v20 = vpack.c.bf16 %v2197_v10, %v2181_v7  ;;  %v8476_v49 = vld [vmem:[%s10738_s12 + $0x298] sm:$0xff]   ;;  %v8480_v17 = vld [vmem:[%s10738_s12 + $0x2a0] sm:$0xff]   ;;  %v8482_v57 = vld [vmem:[%s10738_s12 + $0x2e8] sm:$0xff]  }
 0x997   :  { %v9621_v16 = vpack.c.bf16 %v2196_v14, %v2180_v13  ;;  %v9623_v24 = vpack.c.bf16 %v2198_v18, %v2182_v4  ;;  %7779 = vmatpush3.bf16.msra.mxu0 %v8451_v1  ;;  %7801 = vmatpush3.bf16.msra.mxu1 %v8452_v3  ;;  %v8483_v58 = vld [vmem:[%s10738_s12 + $0x228] sm:$0xff]   ;;  %v8485_v61 = vld [vmem:[%s10738_s12 + $0x270] sm:$0xff]   ;;  %v8489_v1 = vld [vmem:[%s10738_s12 + $0x278] sm:$0xff]  }
 0x998   :  { %7780 = vmatprep.subr.bf16.mxu0 %v8453_v8  ;;  %7802 = vmatprep.subr.bf16.mxu1 %v8454_v12  ;;  %v8484_v60 = vld [vmem:[%s10738_s12 + $0x2a8] sm:$0xff]   ;;  %v8486_v42 = vld [vmem:[%s10738_s12 + $0x2f0] sm:$0xff]   ;;  %v8490_v3 = vld [vmem:[%s10738_s12 + $0x2f8] sm:$0xff]  }
 0x999   :  { %v8487_v62 = vld [vmem:[%s10738_s12 + $0x230] sm:$0xff]   ;;  %v8491_v6 = vld [vmem:[%s10738_s12 + $0x238] sm:$0xff]   ;;  %v8493_v9 = vld [vmem:[%s10738_s12 + $0x340] sm:$0xff]  }
 0x99a   :  { %v8488_v63 = vld [vmem:[%s10738_s12 + $0x2b0] sm:$0xff]   ;;  %v8492_v7 = vld [vmem:[%s10738_s12 + $0x2b8] sm:$0xff]   ;;  %v8494_v10 = vld [vmem:[%s10738_s12 + $0x3c0] sm:$0xff]  }
 0x99b   :  { %7781 = vmatpush3.bf16.msra.mxu0 %v8455_v26  ;;  %7803 = vmatpush3.bf16.msra.mxu1 %v8456_v27  ;;  %v8495_v8 = vld [vmem:[%s10738_s12 + $0x300] sm:$0xff]   ;;  %v8497_v13 = vld [vmem:[%s10738_s12 + $0x348] sm:$0xff]   ;;  %v8504_v26 = vld [vmem:[%s10738_s12 + $0x390] sm:$0xff]  }
 0x99c   :  { %7782 = vmatprep.subr.bf16.mxu0 %v8457_v30  ;;  %7804 = vmatprep.subr.bf16.mxu1 %v8458_v2  ;;  %v8496_v12 = vld [vmem:[%s10738_s12 + $0x380] sm:$0xff]   ;;  %v8498_v4 = vld [vmem:[%s10738_s12 + $0x3c8] sm:$0xff]   ;;  %v8506_v27 = vld [vmem:[%s10738_s12 + $0x3d8] sm:$0xff]  }
 0x99d   :  { %v8499_v14 = vld [vmem:[%s10738_s12 + $0x308] sm:$0xff]   ;;  %v8507_v30 = vld [vmem:[%s10738_s12 + $0x318] sm:$0xff]  }
 0x99e   :  { %v8500_v18 = vld [vmem:[%s10738_s12 + $0x388] sm:$0xff]   ;;  %v8508_v2 = vld [vmem:[%s10738_s12 + $0x398] sm:$0xff]  }
 0x99f   :  { %7783 = vmatpush3.bf16.msra.mxu0 %v8459_v48  ;;  %7805 = vmatpush3.bf16.msra.mxu1 %v8460_v32  ;;  %v8509_v48 = vld [vmem:[%s10738_s12 + $0x360] sm:$0xff]  }
 0x9a0   :  { %7812 = vmatprep.subr.bf16.mxu0 %v8461_v36  ;;  %7834 = vmatprep.subr.bf16.mxu1 %v8462_v38  ;;  %v8510_v32 = vld [vmem:[%s10738_s12 + $0x3e0] sm:$0xff]  }
 0x9a1   :  { %v8511_v36 = vld [vmem:[%s10738_s12 + $0x320] sm:$0xff]  }
 0x9a2   :  { %3361 = vmatmul.mubr.bf16.vlgmr.msra.gmra.mrb[60].mxu0 %v9549_v51  ;;  %3402 = vmatmul.mubr.bf16.vlgmr.msra.gmra.mrb[60].mxu1 %v9551_v52  ;;  %v8469_v51 = vld [vmem:[%s10738_s12 + $0x250] sm:$0xff]   ;;  %v8512_v38 = vld [vmem:[%s10738_s12 + $0x3a0] sm:$0xff]  }
 0x9a3   :  { %7813 = vmatpush3.bf16.msra.mxu0 %v8463_v39  ;;  %3442 = vmatprep.mubr.bf16.mxu0 %v9589_v28  ;;  %v8470_v52 = vld [vmem:[%s10738_s12 + $0x2d0] sm:$0xff]   ;;  %v8513_v39 = vld [vmem:[%s10738_s12 + $0x368] sm:$0xff]  }
 0x9a4   :  { %7835 = vmatpush3.bf16.msra.mxu1 %v8464_v40  ;;  %3483 = vmatprep.mubr.bf16.mxu1 %v9591_v44  ;;  %v8471_v28 = vld [vmem:[%s10738_s12 + $0x210] sm:$0xff]   ;;  %v8514_v40 = vld [vmem:[%s10738_s12 + $0x3e8] sm:$0xff]  }
 0x9a5   :  { %7814 = vmatprep.subr.bf16.mxu0 %v8465_v35  ;;  %7836 = vmatprep.subr.bf16.mxu1 %v8466_v37  ;;  %v8472_v44 = vld [vmem:[%s10738_s12 + $0x290] sm:$0xff]   ;;  %v8515_v35 = vld [vmem:[%s10738_s12 + $0x328] sm:$0xff]  }
 0x9a6   :  { %v8516_v37 = vld [vmem:[%s10738_s12 + $0x3a8] sm:$0xff]  }
 0x9a7   :  { %7815 = vmatpush3.bf16.msra.mxu0 %v8467_v43  ;;  %v8517_v43 = vld [vmem:[%s10738_s12 + $0x370] sm:$0xff]  }
 0x9a8   :  { %7837 = vmatpush3.bf16.msra.mxu1 %v8468_v50  ;;  %7816 = vmatprep.subr.bf16.mxu0 %v8469_v51  ;;  %v8518_v50 = vld [vmem:[%s10738_s12 + $0x3f0] sm:$0xff]  }
 0x9a9   :  { %7838 = vmatprep.subr.bf16.mxu1 %v8470_v52  ;;  %v8519_v51 = vld [vmem:[%s10738_s12 + $0x330] sm:$0xff]  }
 0x9aa   :  { %v8520_v52 = vld [vmem:[%s10738_s12 + $0x3b0] sm:$0xff]  }
 0x9ab   :  { %7817 = vmatpush3.bf16.msra.mxu0 %v8471_v28  ;;  %v8521_v28 = vld [vmem:[%s10738_s12 + $0x378] sm:$0xff]  }
 0x9ac   :  { %7839 = vmatpush3.bf16.msra.mxu1 %v8472_v44  ;;  %7818 = vmatprep.subr.bf16.mxu0 %v8473_v45  ;;  %v8522_v44 = vld [vmem:[%s10738_s12 + $0x3f8] sm:$0xff]  }
 0x9ad   :  { %7840 = vmatprep.subr.bf16.mxu1 %v8474_v46  ;;  %v8523_v45 = vld [vmem:[%s10738_s12 + $0x338] sm:$0xff]  }
 0x9ae   :  { %v8524_v46 = vld [vmem:[%s10738_s12 + $0x3b8] sm:$0xff]  }
 0x9af   :  { %7819 = vmatpush3.bf16.msra.mxu0 %v8475_v47 }
 0x9b0   :  { %7841 = vmatpush3.bf16.msra.mxu1 %v8476_v49  ;;  %7820 = vmatprep.subr.bf16.mxu0 %v8477_v53  ;;  %v7043_v53 = vld [vmem:[%s10742_s13] ss:$0 sm:$0xff] }
 0x9b1   :  { %7842 = vmatprep.subr.bf16.mxu1 %v8478_v54 }
 0x9b3   :  { %7821 = vmatpush3.bf16.msra.mxu0 %v8479_v55 }
 0x9b4   :  { %7843 = vmatpush3.bf16.msra.mxu1 %v8480_v17  ;;  %7822 = vmatprep.subr.bf16.mxu0 %v8481_v56 }
 0x9b5   :  { %7844 = vmatprep.subr.bf16.mxu1 %v8482_v57 }
 0x9b7   :  { %7823 = vmatpush3.bf16.msra.mxu0 %v8483_v58 }
 0x9b8   :  { %7845 = vmatpush3.bf16.msra.mxu1 %v8484_v60  ;;  %7824 = vmatprep.subr.bf16.mxu0 %v8485_v61 }
 0x9b9   :  { %7846 = vmatprep.subr.bf16.mxu1 %v8486_v42 }
 0x9bb   :  { %7825 = vmatpush3.bf16.msra.mxu0 %v8487_v62 }
 0x9bc   :  { %7847 = vmatpush3.bf16.msra.mxu1 %v8488_v63  ;;  %7826 = vmatprep.subr.bf16.mxu0 %v8489_v1 }
 0x9bd   :  { %7848 = vmatprep.subr.bf16.mxu1 %v8490_v3 }
 0x9bf   :  { %7827 = vmatpush3.bf16.msra.mxu0 %v8491_v6 }
 0x9c0   :  { %7849 = vmatpush3.bf16.msra.mxu1 %v8492_v7  ;;  %7856 = vmatprep.subr.bf16.mxu0 %v8493_v9 }
 0x9c1   :  { %7878 = vmatprep.subr.bf16.mxu1 %v8494_v10 }
 0x9c2   :  { %3443 = vmatmul.mubr.bf16.vlgmr.msra.gmra.mrb[64].mxu0 %v9585_v23  ;;  %v8501_v23 = vld [vmem:[%s10738_s12 + $0x350] sm:$0xff]  }
 0x9c3   :  { %3484 = vmatmul.mubr.bf16.vlgmr.msra.gmra.mrb[64].mxu1 %v9587_v25  ;;  %7857 = vmatpush3.bf16.msra.mxu0 %v8495_v8  ;;  %v8502_v25 = vld [vmem:[%s10738_s12 + $0x3d0] sm:$0xff]  }
 0x9c4   :  { %3524 = vmatprep.mubr.bf16.mxu0 %v9621_v16  ;;  %7879 = vmatpush3.bf16.msra.mxu1 %v8496_v12  ;;  %v8503_v16 = vld [vmem:[%s10738_s12 + $0x310] sm:$0xff]  }
 0x9c5   :  { %3565 = vmatprep.mubr.bf16.mxu1 %v9623_v24  ;;  %7858 = vmatprep.subr.bf16.mxu0 %v8497_v13  ;;  %v8505_v24 = vld [vmem:[%s10738_s12 + $0x358] sm:$0xff]  }
 0x9c6   :  { %7880 = vmatprep.subr.bf16.mxu1 %v8498_v4 }
 0x9c7   :  { %7859 = vmatpush3.bf16.msra.mxu0 %v8499_v14 }
 0x9c8   :  { %7881 = vmatpush3.bf16.msra.mxu1 %v8500_v18  ;;  %7860 = vmatprep.subr.bf16.mxu0 %v8501_v23 }
 0x9c9   :  { %7882 = vmatprep.subr.bf16.mxu1 %v8502_v25 }
 0x9cb   :  { %7861 = vmatpush3.bf16.msra.mxu0 %v8503_v16 }
 0x9cc   :  { %7883 = vmatpush3.bf16.msra.mxu1 %v8504_v26  ;;  %7862 = vmatprep.subr.bf16.mxu0 %v8505_v24 }
 0x9cd   :  { %7884 = vmatprep.subr.bf16.mxu1 %v8506_v27 }
 0x9cf   :  { %7863 = vmatpush3.bf16.msra.mxu0 %v8507_v30 }
 0x9d0   :  { %7885 = vmatpush3.bf16.msra.mxu1 %v8508_v2  ;;  %7864 = vmatprep.subr.bf16.mxu0 %v8509_v48 }
 0x9d1   :  { %7886 = vmatprep.subr.bf16.mxu1 %v8510_v32 }
 0x9d3   :  { %7865 = vmatpush3.bf16.msra.mxu0 %v8511_v36 }
 0x9d4   :  { %7887 = vmatpush3.bf16.msra.mxu1 %v8512_v38  ;;  %7866 = vmatprep.subr.bf16.mxu0 %v8513_v39 }
 0x9d5   :  { %7888 = vmatprep.subr.bf16.mxu1 %v8514_v40 }
 0x9d7   :  { %7867 = vmatpush3.bf16.msra.mxu0 %v8515_v35 }
 0x9d8   :  { %7889 = vmatpush3.bf16.msra.mxu1 %v8516_v37  ;;  %7868 = vmatprep.subr.bf16.mxu0 %v8517_v43 }
 0x9d9   :  { %7890 = vmatprep.subr.bf16.mxu1 %v8518_v50 }
 0x9db   :  { %7869 = vmatpush3.bf16.msra.mxu0 %v8519_v51 }
 0x9dc   :  { %7891 = vmatpush3.bf16.msra.mxu1 %v8520_v52  ;;  %7870 = vmatprep.subr.bf16.mxu0 %v8521_v28 }
 0x9dd   :  { %7892 = vmatprep.subr.bf16.mxu1 %v8522_v44 }
 0x9df   :  { %7871 = vmatpush3.bf16.msra.mxu0 %v8523_v45 }
 0x9e0   :  { %7893 = vmatpush3.bf16.msra.mxu1 %v8524_v46  ;;  %8241 = vmatprep.subr.bf16.mxu0 %v8751_v0 }
 0x9e1   :  { %8249 = vmatprep.subr.bf16.mxu1 %v8751_v0 }
 0x9e2   :  { %3525 = vmatmul.mubr.bf16.vlgmr.msra.gmra.mrb[68].mxu0 %v9617_v19 }
 0x9e3   :  { %3566 = vmatmul.mubr.bf16.vlgmr.msra.gmra.mrb[68].mxu1 %v9619_v20  ;;  %8245 = vmatprep.mubr.msk.bf16.mxu0 %vm8752_vm1, %v8751_v0 }
 0x9e4   :  { %8251 = vmatprep.mubr.msk.bf16.mxu1 %vm8752_vm1, %v8751_v0 }
 0xa55   :  { %v7740_v47 = vpop.f32.mrb[56].mxu0  ;;  %v7762_v49 = vpop.f32.mrb[56].mxu1 }
 0xa56   :  { %v7741_v54 = vpop.f32.mrb[57].mxu0  ;;  %v7763_v55 = vpop.f32.mrb[57].mxu1 }
 0xa57   :  { %v7742_v17 = vadd.f32 %v7741_v54, %v7740_v47  ;;  %v7764_v56 = vadd.f32 %v7763_v55, %v7762_v49  ;;  %v7743_v57 = vpop.f32.mrb[58].mxu0  ;;  %v7765_v19 = vpop.f32.mrb[58].mxu1 }
 0xa58   :  { %v7744_v58 = vpop.f32.mrb[59].mxu0  ;;  %v7766_v20 = vpop.f32.mrb[59].mxu1 }
 0xa59   :  { %v3281_v60 = vadd.f32 %v7742_v17, %v7043_v53  ;;  %v7745_v61 = vadd.f32 %v7744_v58, %v7743_v57  ;;  %v7767_v42 = vadd.f32 %v7766_v20, %v7765_v19 }
 0xa5b   :  { %v3322_v62 = vadd.f32 %v7764_v56, %v3281_v60  ;;  %v3284_v63 = vadd.f32 %v7745_v61, %v7043_v53 }
 0xa5d   :  { %v3325_v1 = vadd.f32 %v7767_v42, %v3284_v63 }
 0xa75   :  { %v7784_v3 = vpop.f32.mrb[60].mxu0  ;;  %v7806_v6 = vpop.f32.mrb[60].mxu1 }
 0xa76   :  { %v7785_v7 = vpop.f32.mrb[61].mxu0  ;;  %v7807_v9 = vpop.f32.mrb[61].mxu1 }
 0xa77   :  { %v7786_v10 = vadd.f32 %v7785_v7, %v7784_v3  ;;  %v7808_v8 = vadd.f32 %v7807_v9, %v7806_v6  ;;  %v7787_v12 = vpop.f32.mrb[62].mxu0  ;;  %v7809_v13 = vpop.f32.mrb[62].mxu1 }
 0xa78   :  { %v7788_v4 = vpop.f32.mrb[63].mxu0  ;;  %v7810_v14 = vpop.f32.mrb[63].mxu1 }
 0xa79   :  { %v3363_v18 = vadd.f32 %v7786_v10, %v3322_v62  ;;  %v7789_v23 = vadd.f32 %v7788_v4, %v7787_v12  ;;  %v7811_v25 = vadd.f32 %v7810_v14, %v7809_v13  ;;  %v8526_v14 = vld [vmem:[%s10782_s29 + $0x18] sm:$0xff]  }
 0xa7b   :  { %v3404_v16 = vadd.f32 %v7808_v8, %v3363_v18  ;;  %v3366_v26 = vadd.f32 %v7789_v23, %v3325_v1 }
 0xa7d   :  { %v3407_v24 = vadd.f32 %v7811_v25, %v3366_v26 }
 0xa95   :  { %v7828_v27 = vpop.f32.mrb[64].mxu0 }
 0xa96   :  { %v7850_v30 = vpop.f32.mrb[64].mxu1  ;;  %v7829_v2 = vpop.f32.mrb[65].mxu0 }
 0xa97   :  { %v7830_v48 = vadd.f32 %v7829_v2, %v7828_v27  ;;  %v7851_v32 = vpop.f32.mrb[65].mxu1  ;;  %v7831_v36 = vpop.f32.mrb[66].mxu0 }
 0xa98   :  { %v7852_v38 = vadd.f32 %v7851_v32, %v7850_v30  ;;  %v7853_v39 = vpop.f32.mrb[66].mxu1  ;;  %v7832_v40 = vpop.f32.mrb[67].mxu0  ;;  %v7172_v30 = vld [vmem:[%s10743_s16] ss:$0 sm:$0xff] }
 0xa99   :  { %v3445_v35 = vadd.f32 %v7830_v48, %v3404_v16  ;;  %v7833_v37 = vadd.f32 %v7832_v40, %v7831_v36  ;;  %v7854_v43 = vpop.f32.mrb[67].mxu1 }
 0xa9a   :  { %v7855_v50 = vadd.f32 %v7854_v43, %v7853_v39  ;;  %v7179_v43 = vld [vmem:[%s10734_s7 + $0x1] ss:$0 sm:$0xff]  ;;  %s10784_s7 = smov 112  }
 0xa9b   :  { %v3486_v51 = vadd.f32 %v7852_v38, %v3445_v35  ;;  %v3448_v52 = vadd.f32 %v7833_v37, %v3407_v24  ;;  %v7173_v38 = vld [vmem:[%s10744_s17] ss:$0 sm:$0xff] }
 0xa9d   :  { %v3489_v28 = vadd.f32 %v7855_v50, %v3448_v52 }
 0xab5   :  { %v7872_v44 = vpop.f32.mrb[68].mxu0 }
 0xab6   :  { %v7894_v45 = vpop.f32.mrb[68].mxu1  ;;  %v7873_v46 = vpop.f32.mrb[69].mxu0 }
 0xab7   :  { %v7874_v47 = vadd.f32 %v7873_v46, %v7872_v44  ;;  %v7895_v49 = vpop.f32.mrb[69].mxu1  ;;  %v7875_v53 = vpop.f32.mrb[70].mxu0 }
 0xab8   :  { %v7896_v54 = vadd.f32 %v7895_v49, %v7894_v45  ;;  %v7897_v55 = vpop.f32.mrb[70].mxu1  ;;  %v7876_v17 = vpop.f32.mrb[71].mxu0 }
 0xab9   :  { %v3527_v56 = vadd.f32 %v7874_v47, %v3486_v51  ;;  %v7877_v57 = vadd.f32 %v7876_v17, %v7875_v53  ;;  %v7898_v19 = vpop.f32.mrb[71].mxu1 }
 0xaba   :  { %v7899_v58 = vadd.f32 %v7898_v19, %v7897_v55 }
 0xabb   :  { %v3568_v20 = vadd.f32 %v7896_v54, %v3527_v56  ;;  %v3530_v60 = vadd.f32 %v7877_v57, %v3489_v28 }
 0xabd   :  { %v3571_v61 = vadd.f32 %v7899_v58, %v3530_v60  ;;  %v3574_v42 = vadd.f32 %v3568_v20, %v9304_v5 }
 0xabf   :  { %v3578_v62 = vsel %vm441_vm15, %v3574_v42, 0.0  ;;  %v3575_v63 = vadd.f32 %v3571_v61, %v9306_v59  ;;  %v8525_v59 = vld [vmem:[%s10782_s29 + $0x10] sm:$0xff]  }
 0xac0   :  { %3579 = vadd.xlane.f32.xlu0 %v3578_v62  ;;  %8242 = vmatpush3.bf16.msra.mxu0 %v8525_v59 }
 0xac1   :  { %v3581_v1 = vsel %vm441_vm15, %v3575_v63, 0.0  ;;  %8243 = vmatprep.subr.bf16.mxu0 %v8751_v0 }
 0xac2   :  { %3582 = vadd.xlane.f32.xlu1 %v3581_v1 }
 0xac4   :  { %8244 = vmatpush3.bf16.msra.mxu0 %v8526_v14 }
 0xac5   :  { %8255 = vmatprep.subr.bf16.mxu0 %v8751_v0 }
 0xb4d   :  { %v3580_v3 = vpop.xlane.xlu0 %3579 }
 0xb4e   :  { %v3584_v6 = vmul.f32 0.03125, %v3580_v3 }
 0xb4f   :  { %v3583_v7 = vpop.xlane.xlu1 %3582 }
 0xb50   :  { %v3586_v9 = vsub.f32 %v3574_v42, %v3584_v6  ;;  %v3585_v10 = vmul.f32 0.03125, %v3583_v7 }
 0xb52   :  { %v3587_v8 = vsub.f32 %v3575_v63, %v3585_v10  ;;  %v3588_v12 = vmul.f32 %v3586_v9, %v3586_v9 }
 0xb54   :  { %v3590_v13 = vsel %vm441_vm15, %v3588_v12, 0.0  ;;  %v3589_v4 = vmul.f32 %v3587_v8, %v3587_v8 }
 0xb55   :  { %3591 = vadd.xlane.f32.xlu0 %v3590_v13 }
 0xb56   :  { %v3593_v5 = vsel %vm441_vm15, %v3589_v4, 0.0 }
 0xb57   :  { %3594 = vadd.xlane.f32.xlu1 %v3593_v5 }
 0xbe2   :  { %v3592_v18 = vpop.xlane.xlu0 %3591 }
 0xbe3   :  { %v3596_v23 = vmul.f32 0.03125, %v3592_v18 }
 0xbe4   :  { %v3595_v25 = vpop.xlane.xlu1 %3594 }
 0xbe5   :  { %v3598_v16 = vadd.f32 1e-05, %v3596_v23  ;;  %v3597_v26 = vmul.f32 0.03125, %v3595_v25 }
 0xbe7   :  { %8703 = vrsqrt.f32 %v3598_v16  ;;  %v3599_v24 = vadd.f32 1e-05, %v3597_v26 }
 0xbe9   :  { %8705 = vrsqrt.f32 %v3599_v24 }
 0xbf1   :  { %v8704_v27 = vpop.eup %8703 }
 0xbf2   :  { %v3602_v2 = vmul.f32 %v8704_v27, %v3586_v9 }
 0xbf3   :  { %v8706_v48 = vpop.eup %8705 }
 0xbf4   :  { %v3610_v32 = vmul.f32 %v7172_v30, %v3602_v2  ;;  %v3603_v36 = vmul.f32 %v8706_v48, %v3587_v8 }
 0xbf6   :  { %v3611_v39 = vmul.f32 %v7172_v30, %v3603_v36  ;;  %v9874_v40 = vadd.f32 %v7173_v38, %v3610_v32 }
 0xbf8   :  { %v9876_v35 = vadd.f32 %v7173_v38, %v3611_v39 }
 0xbfa   :  { %v3625_v37 = vpack.c.bf16 %v9876_v35, %v9874_v40 }
 0xbfc   :  { %8246 = vmatmul.mubr.msk.bf16.vlgmr.msra.gmra.mrb[72].mxu0 %vm441_vm15, %v3625_v37 }
 0xbfd   :  { %8257 = vmatprep.mubr.msk.bf16.mxu0 %vm8752_vm1, %v8751_v0 }
 0xccf   :  { %v3683_v50 = vpop.f32.mrb[72].mxu0 }
 0xcd0   :  { %v3684_v51 = vadd.f32 %v7179_v43, %v3683_v50  ;;  %v8247_v52 = vpop.f32.mrb[73].mxu0 }
 0xcd1   :  { %v3686_v28 = vpop.f32.mrb[74].mxu0 }
 0xcd2   :  { %3690 = vst.msk [vmem:[#allocation3] sm:$0xff] %vm486_vm0, %v3684_v51  ;;  %v3687_v44 = vadd.f32 %v7179_v43, %v3686_v28  ;;  %v8248_v45 = vpop.f32.mrb[75].mxu0 }
 0xcd4   :  { %3691 = vst.msk [vmem:[#allocation3 + $0x8] sm:$0xff] %vm486_vm0, %v3687_v44 }
 0xcd9   :  { %v3804_v46 = vld [vmem:[#allocation3] sm:$0xff] }
 0xcda   :  { %v9888_v47 = vpack.c.bf16 %v3804_v46, %v3804_v46 }
 0xcdb   :  { %v4158_v49 = vld [vmem:[#allocation3 + $0x8] sm:$0xff] }
 0xcdc   :  { %3809 = vrot.lane.b32.xlu1 %v9888_v47, %s8760_s5  ;;  %3695 = vrot.lane.b32.xlu0 %v9888_v47, %s8761_s25  ;;  %v9902_v53 = vpack.c.bf16 %v4158_v49, %v4158_v49 }
 0xce0   :  { %3807 = vrot.lane.b32.xlu1 %v9888_v47, %s8762_s26  ;;  %3927 = vrot.lane.b32.xlu0 %v9888_v47, %s8763_s0 }
 0xce4   :  { %3925 = vrot.lane.b32.xlu1 %v9888_v47, %s10784_s7  ;;  %4045 = vrot.lane.b32.xlu0 %v9888_v47, %s10785_s23 }
 0xce8   :  { %4043 = vrot.lane.b32.xlu1 %v9888_v47, %s10786_s30  ;;  %4161 = vrot.lane.b32.xlu0 %v9902_v53, %s8761_s25  ;;  %s10788_s25 = smov 64  }
 0xcec   :  { %4275 = vrot.lane.b32.xlu1 %v9902_v53, %s8760_s5  ;;  %4273 = vrot.lane.b32.xlu0 %v9902_v53, %s8762_s26  ;;  %s10787_s5 = smov 56   ;;  %s10789_s26 = smov 48  }
 0xcf0   :  { %4393 = vrot.lane.b32.xlu1 %v9902_v53, %s8763_s0  ;;  %4391 = vrot.lane.b32.xlu0 %v9902_v53, %s10784_s7  ;;  %s10790_s0 = smov 40  }
 0xcf4   :  { %4511 = vrot.lane.b32.xlu1 %v9902_v53, %s10785_s23  ;;  %4509 = vrot.lane.b32.xlu0 %v9902_v53, %s10786_s30 }
 0xd4e   :  { %v3696_v54 = vpop.permute.xlu0 %3695  ;;  %v3810_v17 = vpop.permute.xlu1 %3809 }
 0xd4f   :  { %v3701_v55 = vsel %vm494_vm2, %v3696_v54, 0  ;;  %v3815_v56 = vsel %vm494_vm2, %v3810_v17, 0 }
 0xd50   :  { %8250 = vmatpush3.bf16.xpose.msra.mxu1 %v3701_v55 }
 0xd51   :  { %8261 = vmatprep.subr.bf16.mxu1 %v8751_v0 }
 0xd52   :  { %v3928_v57 = vpop.permute.xlu0 %3927  ;;  %v3808_v19 = vpop.permute.xlu1 %3807 }
 0xd53   :  { %v3933_v58 = vsel %vm494_vm2, %v3928_v57, 0 }
 0xd56   :  { %v4046_v20 = vpop.permute.xlu0 %4045  ;;  %v3926_v60 = vpop.permute.xlu1 %3925 }
 0xd57   :  { %8252 = vmatmul.mubr.msk.bf16.vlgmr.msra.gmra.mrb[72].mxu1 %vm494_vm2, %v9888_v47  ;;  %v4051_v61 = vsel %vm494_vm2, %v4046_v20, 0 }
 0xd58   :  { %8262 = vmatpush3.bf16.xpose.msra.mxu1 %v3815_v56  ;;  %8263 = vmatprep.mubr.msk.bf16.mxu1 %vm8752_vm1, %v8751_v0 }
 0xd59   :  { %8273 = vmatprep.subr.bf16.mxu1 %v8751_v0 }
 0xd5a   :  { %v4162_v42 = vpop.permute.xlu0 %4161  ;;  %v4044_v62 = vpop.permute.xlu1 %4043 }
 0xd5b   :  { %v4167_v63 = vsel %vm494_vm2, %v4162_v42, 0 }
 0xd5e   :  { %v4276_v1 = vpop.permute.xlu1 %4275  ;;  %v4274_v7 = vpop.permute.xlu0 %4273 }
 0xd5f   :  { %8264 = vmatmul.mubr.msk.bf16.vlgmr.msra.gmra.mrb[76].mxu1 %vm494_vm2, %v3808_v19  ;;  %v4281_v3 = vsel %vm494_vm2, %v4276_v1, 0 }
 0xd60   :  { %8274 = vmatpush3.bf16.xpose.msra.mxu1 %v3933_v58  ;;  %8275 = vmatprep.mubr.msk.bf16.mxu1 %vm8752_vm1, %v8751_v0 }
 0xd61   :  { %8285 = vmatprep.subr.bf16.mxu1 %v8751_v0 }
 0xd62   :  { %v4394_v6 = vpop.permute.xlu1 %4393  ;;  %v4392_v8 = vpop.permute.xlu0 %4391 }
 0xd63   :  { %v4399_v9 = vsel %vm494_vm2, %v4394_v6, 0 }
 0xd66   :  { %v4512_v10 = vpop.permute.xlu1 %4511  ;;  %v4510_v13 = vpop.permute.xlu0 %4509 }
 0xd67   :  { %8276 = vmatmul.mubr.msk.bf16.vlgmr.msra.gmra.mrb[80].mxu1 %vm494_vm2, %v3926_v60  ;;  %v4517_v12 = vsel %vm494_vm2, %v4512_v10, 0 }
 0xd68   :  { %8286 = vmatpush3.bf16.xpose.msra.mxu1 %v4051_v61  ;;  %8287 = vmatprep.mubr.msk.bf16.mxu1 %vm8752_vm1, %v8751_v0 }
 0xd69   :  { %8297 = vmatprep.subr.bf16.mxu1 %v8751_v0 }
 0xd6f   :  { %8288 = vmatmul.mubr.msk.bf16.vlgmr.msra.gmra.mrb[84].mxu1 %vm494_vm2, %v4044_v62 }
 0xd70   :  { %8298 = vmatpush3.bf16.xpose.msra.mxu1 %v4167_v63  ;;  %8299 = vmatprep.mubr.msk.bf16.mxu1 %vm8752_vm1, %v8751_v0 }
 0xd71   :  { %8309 = vmatprep.subr.bf16.mxu1 %v8751_v0 }
 0xd77   :  { %8300 = vmatmul.mubr.msk.bf16.vlgmr.msra.gmra.mrb[88].mxu1 %vm494_vm2, %v9902_v53 }
 0xd78   :  { %8310 = vmatpush3.bf16.xpose.msra.mxu1 %v4281_v3  ;;  %8311 = vmatprep.mubr.msk.bf16.mxu1 %vm8752_vm1, %v8751_v0 }
 0xd79   :  { %8321 = vmatprep.subr.bf16.mxu1 %v8751_v0 }
 0xd7f   :  { %8312 = vmatmul.mubr.msk.bf16.vlgmr.msra.gmra.mrb[92].mxu1 %vm494_vm2, %v4274_v7 }
 0xd80   :  { %8322 = vmatpush3.bf16.xpose.msra.mxu1 %v4399_v9  ;;  %8323 = vmatprep.mubr.msk.bf16.mxu1 %vm8752_vm1, %v8751_v0 }
 0xd81   :  { %8333 = vmatprep.subr.bf16.mxu1 %v8751_v0 }
 0xd87   :  { %8324 = vmatmul.mubr.msk.bf16.vlgmr.msra.gmra.mrb[96].mxu1 %vm494_vm2, %v4392_v8 }
 0xd88   :  { %8334 = vmatpush3.bf16.xpose.msra.mxu1 %v4517_v12  ;;  %8335 = vmatprep.mubr.msk.bf16.mxu1 %vm8752_vm1, %v8751_v0 }
 0xd89   :  { %8345 = vmatprep.subr.bf16.mxu1 %v8751_v0 }
 0xd8f   :  { %8336 = vmatmul.mubr.msk.bf16.vlgmr.msra.gmra.mrb[100].mxu1 %vm494_vm2, %v4510_v13 }
 0xd90   :  { %8349 = vmatprep.mubr.msk.bf16.mxu1 %vm8752_vm1, %v8751_v0 }
 0xe2a   :  { %v3737_v4 = vpop.f32.mrb[72].mxu1 }
 0xe2b   :  { %v8253_v5 = vpop.f32.mrb[73].mxu1  ;;  %v3743_v59 = vsel %vm494_vm2, %v3737_v4, -inf }
 0xe2c   :  { %v3740_v14 = vpop.f32.mrb[74].mxu1  ;;  %3744 = vmax.xlane.f32.xlu1 %v3743_v59 }
 0xe2d   :  { %v8254_v18 = vpop.f32.mrb[75].mxu1 }
 0xe32   :  { %v3851_v23 = vpop.f32.mrb[76].mxu1 }
 0xe33   :  { %v8265_v25 = vpop.f32.mrb[77].mxu1  ;;  %v3857_v16 = vsel %vm494_vm2, %v3851_v23, -inf }
 0xe34   :  { %v3854_v26 = vpop.f32.mrb[78].mxu1  ;;  %3858 = vmax.xlane.f32.xlu0 %v3857_v16 }
 0xe35   :  { %v8266_v24 = vpop.f32.mrb[79].mxu1 }
 0xe3a   :  { %v3969_v27 = vpop.f32.mrb[80].mxu1 }
 0xe3b   :  { %v8277_v30 = vpop.f32.mrb[81].mxu1  ;;  %v3975_v2 = vsel %vm494_vm2, %v3969_v27, -inf }
 0xe3c   :  { %v3972_v48 = vpop.f32.mrb[82].mxu1  ;;  %3976 = vmax.xlane.f32.xlu0 %v3975_v2 }
 0xe3d   :  { %v8278_v32 = vpop.f32.mrb[83].mxu1 }
 0xe42   :  { %v4087_v36 = vpop.f32.mrb[84].mxu1 }
 0xe43   :  { %v8289_v38 = vpop.f32.mrb[85].mxu1  ;;  %v4093_v39 = vsel %vm494_vm2, %v4087_v36, -inf }
 0xe44   :  { %v4090_v37 = vpop.f32.mrb[86].mxu1  ;;  %4094 = vmax.xlane.f32.xlu1 %v4093_v39 }
 0xe45   :  { %v8290_v43 = vpop.f32.mrb[87].mxu1 }
 0xe4a   :  { %v4203_v50 = vpop.f32.mrb[88].mxu1 }
 0xe4b   :  { %v8301_v51 = vpop.f32.mrb[89].mxu1  ;;  %v4209_v52 = vsel %vm494_vm2, %v4203_v50, -inf }
 0xe4c   :  { %4210 = vmax.xlane.f32.xlu0 %v4209_v52  ;;  %v4206_v28 = vpop.f32.mrb[90].mxu1 }
 0xe4d   :  { %v8302_v44 = vpop.f32.mrb[91].mxu1 }
 0xe52   :  { %v9967_v45 = vpop.f32.mrb[92].mxu1 }
 0xe53   :  { %v8313_v46 = vpop.f32.mrb[93].mxu1  ;;  %v4323_v49 = vsel %vm494_vm2, %v9967_v45, -inf }
 0xe54   :  { %4324 = vmax.xlane.f32.xlu1 %v4323_v49  ;;  %v4320_v54 = vpop.f32.mrb[94].mxu1 }
 0xe55   :  { %v8314_v55 = vpop.f32.mrb[95].mxu1 }
 0xe5a   :  { %v4435_v17 = vpop.f32.mrb[96].mxu1 }
 0xe5b   :  { %v8325_v56 = vpop.f32.mrb[97].mxu1  ;;  %v4441_v57 = vsel %vm494_vm2, %v4435_v17, -inf }
 0xe5c   :  { %4442 = vmax.xlane.f32.xlu0 %v4441_v57  ;;  %v4438_v19 = vpop.f32.mrb[98].mxu1 }
 0xe5d   :  { %v8326_v58 = vpop.f32.mrb[99].mxu1 }
 0xe62   :  { %v9972_v20 = vpop.f32.mrb[100].mxu1 }
 0xe63   :  { %v8337_v60 = vpop.f32.mrb[101].mxu1  ;;  %v4559_v62 = vsel %vm494_vm2, %v9972_v20, -inf }
 0xe64   :  { %v4556_v61 = vpop.f32.mrb[102].mxu1 }
 0xe65   :  { %3869 = vrot.lane.b32.xlu1 %v9888_v47, %s10787_s5  ;;  %v8338_v42 = vpop.f32.mrb[103].mxu1 }
 0xe72   :  { %3755 = vrot.lane.b32.xlu0 %v9888_v47, %s10788_s25 }
 0xe89   :  { %4560 = vmax.xlane.f32.xlu1 %v4559_v62 }
 0xe9a   :  { %3987 = vrot.lane.b32.xlu1 %v9888_v47, %s10789_s26 }
 0xeb9   :  { %v3745_v63 = vpop.xlane.xlu1 %3744 }
 0xeba   :  { %v3746_v1 = vsub.f32 %v3737_v4, %v3745_v63 }
 0xebc   :  { %v3747_v3 = vmul.f32 1.442695, %v3746_v1 }
 0xebe   :  { %8707 = vpow2.f32 %v3747_v3 }
 0xec1   :  { %v3859_v6 = vpop.xlane.xlu0 %3858 }
 0xec2   :  { %v3860_v7 = vsub.f32 %v3851_v23, %v3859_v6 }
 0xec4   :  { %v3861_v9 = vmul.f32 1.442695, %v3860_v7 }
 0xec6   :  { %8709 = vpow2.f32 %v3861_v9 }
 0xec8   :  { %v9982_v10 = vpop.eup %8707 }
 0xec9   :  { %v3977_v8 = vpop.xlane.xlu0 %3976  ;;  %v3749_v12 = vsel %vm494_vm2, %v9982_v10, 0.0 }
 0xeca   :  { %v3978_v13 = vsub.f32 %v3969_v27, %v3977_v8  ;;  %3750 = vadd.xlane.f32.xlu0 %v3749_v12 }
 0xecc   :  { %v3979_v5 = vmul.f32 1.442695, %v3978_v13 }
 0xece   :  { %8711 = vpow2.f32 %v3979_v5 }
 0xed0   :  { %v9986_v59 = vpop.eup %8709 }
 0xed1   :  { %v4095_v14 = vpop.xlane.xlu1 %4094  ;;  %v3863_v4 = vsel %vm494_vm2, %v9986_v59, 0.0 }
 0xed2   :  { %v4096_v18 = vsub.f32 %v4087_v36, %v4095_v14  ;;  %3864 = vadd.xlane.f32.xlu1 %v3863_v4 }
 0xed4   :  { %v4097_v23 = vmul.f32 1.442695, %v4096_v18 }
 0xed6   :  { %8713 = vpow2.f32 %v4097_v23 }
 0xed8   :  { %v9990_v25 = vpop.eup %8711 }
 0xed9   :  { %v4211_v16 = vpop.xlane.xlu0 %4210  ;;  %v3981_v26 = vsel %vm494_vm2, %v9990_v25, 0.0 }
 0xeda   :  { %v4212_v24 = vsub.f32 %v4203_v50, %v4211_v16  ;;  %3982 = vadd.xlane.f32.xlu0 %v3981_v26 }
 0xedc   :  { %v4213_v27 = vmul.f32 1.442695, %v4212_v24 }
 0xede   :  { %8715 = vpow2.f32 %v4213_v27 }
 0xee0   :  { %v9994_v30 = vpop.eup %8713 }
 0xee1   :  { %v4099_v2 = vsel %vm494_vm2, %v9994_v30, 0.0  ;;  %v4325_v50 = vpop.xlane.xlu1 %4324 }
 0xee2   :  { %4100 = vadd.xlane.f32.xlu1 %v4099_v2  ;;  %v4326_v52 = vsub.f32 %v9967_v45, %v4325_v50 }
 0xee4   :  { %v4327_v44 = vmul.f32 1.442695, %v4326_v52 }
 0xee8   :  { %v9998_v48 = vpop.eup %8715 }
 0xee9   :  { %v4443_v32 = vpop.xlane.xlu0 %4442  ;;  %v4215_v36 = vsel %vm494_vm2, %v9998_v48, 0.0 }
 0xeea   :  { %v4444_v38 = vsub.f32 %v4435_v17, %v4443_v32  ;;  %4216 = vadd.xlane.f32.xlu1 %v4215_v36 }
 0xeec   :  { %v4445_v39 = vmul.f32 1.442695, %v4444_v38 }
 0xeed   :  { %v3756_v37 = vpop.permute.xlu0 %3755 }
 0xeee   :  { %8717 = vpow2.f32 %v4445_v39  ;;  %v3761_v43 = vsel %vm558_vm3, %v3756_v37, 0 }
 0xeef   :  { %8256 = vmatpush3.bf16.msra.mxu0 %v3761_v43  ;;  %8719 = vpow2.f32 %v4327_v44 }
 0xef0   :  { %4105 = vrot.lane.b32.xlu0 %v9888_v47, %s10790_s0  ;;  %8267 = vmatprep.subr.bf16.mxu0 %v8751_v0  ;;  %v3870_v47 = vpop.permute.xlu1 %3869 }
 0xef1   :  { %v3875_v42 = vsel %vm558_vm3, %v3870_v47, 0 }
 0xef8   :  { %v10006_v51 = vpop.eup %8717 }
 0xef9   :  { %v4447_v28 = vsel %vm494_vm2, %v10006_v51, 0.0  ;;  %v10011_v46 = vpop.eup %8719 }
 0xefa   :  { %4448 = vadd.xlane.f32.xlu1 %v4447_v28  ;;  %v4329_v49 = vsel %vm494_vm2, %v10011_v46, 0.0 }
 0xf0f   :  { %4330 = vadd.xlane.f32.xlu0 %v4329_v49 }
 0xf16   :  { %v4561_v54 = vpop.xlane.xlu1 %4560 }
 0xf17   :  { %v4562_v55 = vsub.f32 %v9972_v20, %v4561_v54 }
 0xf19   :  { %v4563_v17 = vmul.f32 1.442695, %v4562_v55 }
 0xf1a   :  { %v3988_v19 = vpop.permute.xlu1 %3987 }
 0xf1b   :  { %8721 = vpow2.f32 %v4563_v17  ;;  %v3993_v3 = vsel %vm558_vm3, %v3988_v19, 0 }
 0xf25   :  { %v10016_v56 = vpop.eup %8721  ;;  %4335 = vrot.lane.b32.xlu0 %v9902_v53, %s10787_s5 }
 0xf26   :  { %v4565_v45 = vsel %vm494_vm2, %v10016_v56, 0.0 }
 0xf27   :  { %4566 = vadd.xlane.f32.xlu1 %v4565_v45 }
 0xf29   :  { %4453 = vrot.lane.b32.xlu0 %v9902_v53, %s10789_s26 }
 0xf2d   :  { %4571 = vrot.lane.b32.xlu0 %v9902_v53, %s10790_s0 }
 0xf38   :  { %4221 = vrot.lane.b32.xlu1 %v9902_v53, %s10788_s25 }
 0xf57   :  { %v3751_v57 = vpop.xlane.xlu0 %3750 }
 0xf58   :  { %8723 = vrcp.f32 %v3751_v57 }
 0xf5f   :  { %v3865_v58 = vpop.xlane.xlu1 %3864 }
 0xf60   :  { %8725 = vrcp.f32 %v3865_v58 }
 0xf62   :  { %v8724_v20 = vpop.eup %8723 }
 0xf63   :  { %v3753_v60 = vmul.f32 %v8724_v20, %v9982_v10 }
 0xf65   :  { %v3754_v61 = vpack.c.bf16 %v3753_v60, %v3753_v60 }
 0xf67   :  { %8258 = vmatmul.mubr.msk.bf16.vlgmr.msra.gmra.mrb[76].mxu0 %vm494_vm2, %v3754_v61  ;;  %v3983_v62 = vpop.xlane.xlu0 %3982 }
 0xf68   :  { %8268 = vmatpush3.bf16.msra.mxu0 %v3875_v42  ;;  %8727 = vrcp.f32 %v3983_v62  ;;  %8269 = vmatprep.mubr.msk.bf16.mxu0 %vm8752_vm1, %v8751_v0 }
 0xf69   :  { %8279 = vmatprep.subr.bf16.mxu0 %v8751_v0 }
 0xf6a   :  { %v8726_v53 = vpop.eup %8725 }
 0xf6b   :  { %v3867_v63 = vmul.f32 %v8726_v53, %v9986_v59  ;;  %v4106_v10 = vpop.permute.xlu0 %4105 }
 0xf6c   :  { %v4111_v12 = vsel %vm558_vm3, %v4106_v10, 0 }
 0xf6d   :  { %v3868_v1 = vpack.c.bf16 %v3867_v63, %v3867_v63 }
 0xf6f   :  { %v4101_v6 = vpop.xlane.xlu1 %4100  ;;  %8270 = vmatmul.mubr.msk.bf16.vlgmr.msra.gmra.mrb[80].mxu0 %vm494_vm2, %v3868_v1 }
 0xf70   :  { %8729 = vrcp.f32 %v4101_v6  ;;  %8280 = vmatpush3.bf16.msra.mxu0 %v3993_v3  ;;  %8281 = vmatprep.mubr.msk.bf16.mxu0 %vm8752_vm1, %v8751_v0 }
 0xf71   :  { %8291 = vmatprep.subr.bf16.mxu0 %v8751_v0 }
 0xf72   :  { %v8728_v7 = vpop.eup %8727 }
 0xf73   :  { %v3985_v9 = vmul.f32 %v8728_v7, %v9990_v25 }
 0xf75   :  { %v3986_v8 = vpack.c.bf16 %v3985_v9, %v3985_v9 }
 0xf77   :  { %8282 = vmatmul.mubr.msk.bf16.vlgmr.msra.gmra.mrb[84].mxu0 %vm494_vm2, %v3986_v8  ;;  %v4217_v14 = vpop.xlane.xlu1 %4216 }
 0xf78   :  { %8292 = vmatpush3.bf16.msra.mxu0 %v4111_v12  ;;  %8293 = vmatprep.mubr.msk.bf16.mxu0 %vm8752_vm1, %v8751_v0  ;;  %8731 = vrcp.f32 %v4217_v14  ;;  %v8527_v12 = vld [vmem:[%s10735_s8 + $0x10] sm:$0xff]  }
 0xf79   :  { %8303 = vmatprep.subr.bf16.mxu0 %v8751_v0  ;;  %8346 = vmatpush3.bf16.msra.mxu1 %v8527_v12 }
 0xf7a   :  { %v8730_v13 = vpop.eup %8729  ;;  %8347 = vmatprep.subr.bf16.mxu1 %v8751_v0 }
 0xf7b   :  { %v4103_v5 = vmul.f32 %v8730_v13, %v9994_v30  ;;  %v8528_v13 = vld [vmem:[%s10735_s8 + $0x18] sm:$0xff]  }
 0xf7d   :  { %v4104_v59 = vpack.c.bf16 %v4103_v5, %v4103_v5  ;;  %8348 = vmatpush3.bf16.msra.mxu1 %v8528_v13  ;;  %v7222_v13 = vld [vmem:[%s10737_s10 + $0x150] sm:$0xff] }
 0xf7f   :  { %8294 = vmatmul.mubr.msk.bf16.vlgmr.msra.gmra.mrb[88].mxu0 %vm494_vm2, %v4104_v59 }
 0xf80   :  { %8305 = vmatprep.mubr.msk.bf16.mxu0 %vm8752_vm1, %v8751_v0 }
 0xf82   :  { %v8732_v23 = vpop.eup %8731 }
 0xf83   :  { %v4219_v16 = vmul.f32 %v8732_v23, %v9998_v48 }
 0xf85   :  { %v4220_v30 = vpack.c.bf16 %v4219_v16, %v4219_v16 }
 0xf87   :  { %v4449_v18 = vpop.xlane.xlu1 %4448 }
 0xf9c   :  { %v4331_v4 = vpop.xlane.xlu0 %4330 }
 0xf9d   :  { %8733 = vrcp.f32 %v4331_v4 }
 0xf9e   :  { %8735 = vrcp.f32 %v4449_v18 }
 0xfa0   :  { %v4336_v27 = vpop.permute.xlu0 %4335 }
 0xfa1   :  { %v4341_v32 = vsel %vm558_vm3, %v4336_v27, 0 }
 0xfa4   :  { %v4454_v36 = vpop.permute.xlu0 %4453 }
 0xfa5   :  { %v4459_v37 = vsel %vm558_vm3, %v4454_v36, 0 }
 0xfa7   :  { %v8734_v2 = vpop.eup %8733 }
 0xfa8   :  { %v4333_v48 = vmul.f32 %v8734_v2, %v10011_v46  ;;  %v8736_v39 = vpop.eup %8735  ;;  %v4572_v50 = vpop.permute.xlu0 %4571 }
 0xfa9   :  { %v4451_v43 = vmul.f32 %v8736_v39, %v10006_v51  ;;  %v4577_v44 = vsel %vm558_vm3, %v4572_v50, 0  ;;  %v7204_v39 = vld [vmem:[%s10736_s9 + $0x1] ss:$0 sm:$0xff] }
 0xfaa   :  { %v4334_v38 = vpack.c.bf16 %v4333_v48, %v4333_v48 }
 0xfab   :  { %v4452_v52 = vpack.c.bf16 %v4451_v43, %v4451_v43 }
 0xfb4   :  { %v4567_v25 = vpop.xlane.xlu1 %4566 }
 0xfb5   :  { %8737 = vrcp.f32 %v4567_v25 }
 0xfb8   :  { %v4222_v26 = vpop.permute.xlu1 %4221 }
 0xfb9   :  { %v4227_v24 = vsel %vm558_vm3, %v4222_v26, 0 }
 0xfba   :  { %8304 = vmatpush3.bf16.msra.mxu0 %v4227_v24 }
 0xfbb   :  { %8315 = vmatprep.subr.bf16.mxu0 %v8751_v0 }
 0xfbd   :  { %8306 = vmatmul.mubr.msk.bf16.vlgmr.msra.gmra.mrb[92].mxu0 %vm494_vm2, %v4220_v30 }
 0xfbe   :  { %8316 = vmatpush3.bf16.msra.mxu0 %v4341_v32  ;;  %8317 = vmatprep.mubr.msk.bf16.mxu0 %vm8752_vm1, %v8751_v0 }
 0xfbf   :  { %8327 = vmatprep.subr.bf16.mxu0 %v8751_v0  ;;  %v8738_v28 = vpop.eup %8737 }
 0xfc0   :  { %v4569_v46 = vmul.f32 %v8738_v28, %v10016_v56 }
 0xfc2   :  { %v4570_v49 = vpack.c.bf16 %v4569_v46, %v4569_v46 }
 0xfc5   :  { %8318 = vmatmul.mubr.msk.bf16.vlgmr.msra.gmra.mrb[96].mxu0 %vm494_vm2, %v4334_v38 }
 0xfc6   :  { %8328 = vmatpush3.bf16.msra.mxu0 %v4459_v37  ;;  %8329 = vmatprep.mubr.msk.bf16.mxu0 %vm8752_vm1, %v8751_v0 }
 0xfc7   :  { %8339 = vmatprep.subr.bf16.mxu0 %v8751_v0 }
 0xfcd   :  { %8330 = vmatmul.mubr.msk.bf16.vlgmr.msra.gmra.mrb[100].mxu0 %vm494_vm2, %v4452_v52 }
 0xfce   :  { %8340 = vmatpush3.bf16.msra.mxu0 %v4577_v44  ;;  %8341 = vmatprep.mubr.msk.bf16.mxu0 %vm8752_vm1, %v8751_v0 }
 0xfd5   :  { %8342 = vmatmul.mubr.msk.bf16.vlgmr.msra.gmra.mrb[104].mxu0 %vm494_vm2, %v4570_v49 }
 0xfd6   :  { %5058 = vmatprep.mubr.bf16.mxu0 %v8774_v29 }
0x103a   :  { %v3797_v51 = vpop.f32.mrb[76].mxu0 }
0x103b   :  { %3803 = vst.msk [vmem:[#allocation2] sm:$0xff] %vm494_vm2, %v3797_v51  ;;  %v8259_v47 = vpop.f32.mrb[77].mxu0 }
0x103c   :  { %v3800_v54 = vpop.f32.mrb[78].mxu0 }
0x103d   :  { %v8260_v55 = vpop.f32.mrb[79].mxu0 }
0x1042   :  { %v3911_v17 = vpop.f32.mrb[80].mxu0 }
0x1043   :  { %3918 = vrot.lane.b32.xlu1 %v3911_v17, %s10791_s3  ;;  %v8271_v45 = vpop.f32.mrb[81].mxu0 }
0x1044   :  { %v3914_v57 = vpop.f32.mrb[82].mxu0 }
0x1045   :  { %v8272_v19 = vpop.f32.mrb[83].mxu0 }
0x104a   :  { %v4029_v58 = vpop.f32.mrb[84].mxu0 }
0x104b   :  { %4036 = vrot.lane.b32.xlu1 %v4029_v58, %s10792_s6  ;;  %v8283_v56 = vpop.f32.mrb[85].mxu0 }
0x104c   :  { %v4032_v20 = vpop.f32.mrb[86].mxu0 }
0x104d   :  { %v8284_v60 = vpop.f32.mrb[87].mxu0 }
0x104e   :  { %v7220_v60 = vld [vmem:[%s10737_s10 + $0x140] sm:$0xff] }
0x1052   :  { %v4147_v61 = vpop.f32.mrb[88].mxu0 }
0x1053   :  { %4154 = vrot.lane.b32.xlu1 %v4147_v61, %s10793_s24  ;;  %v8295_v42 = vpop.f32.mrb[89].mxu0  ;;  %v7213_v61 = vld [vmem:[%s10737_s10 + $0x108] sm:$0xff] }
0x1054   :  { %v4150_v62 = vpop.f32.mrb[90].mxu0 }
0x1055   :  { %v8296_v53 = vpop.f32.mrb[91].mxu0 }
0x1056   :  { %v7221_v53 = vld [vmem:[%s10737_s10 + $0x148] sm:$0xff] }
0x1090   :  { %v4263_v63 = vpop.f32.mrb[92].mxu0 }
0x1091   :  { %4269 = vst.msk [vmem:[#allocation2 + $0x8] sm:$0xff] %vm494_vm2, %v4263_v63  ;;  %v8307_v1 = vpop.f32.mrb[93].mxu0  ;;  %v7228_v63 = vld [vmem:[%s10737_s10 + $0x180] sm:$0xff] }
0x1092   :  { %v4266_v3 = vpop.f32.mrb[94].mxu0  ;;  %v7236_v1 = vld [vmem:[%s10737_s10 + $0x1c0] sm:$0xff] }
0x1093   :  { %v8308_v6 = vpop.f32.mrb[95].mxu0  ;;  %v7248_v3 = vcombine.low %v7213_v61, %v7221_v53 }
0x1094   :  { %v7249_v6 = vcombine.high %v7213_v61, %v7221_v53  ;;  %v7240_v61 = vld [vmem:[%s10737_s10 + $0x1e0] sm:$0xff] }
0x1096   :  { %5069 = vmatprep.subr.bf16.mxu1 %v7249_v6  ;;  %v7218_v6 = vld [vmem:[%s10737_s10 + $0x130] sm:$0xff] }
0x1098   :  { %v4377_v7 = vpop.f32.mrb[96].mxu0 }
0x1099   :  { %4384 = vrot.lane.b32.xlu0 %v4377_v7, %s10791_s3  ;;  %v8319_v9 = vpop.f32.mrb[97].mxu0  ;;  %v7263_v7 = vcombine.high %v7228_v63, %v7236_v1 }
0x109a   :  { %v4380_v10 = vpop.f32.mrb[98].mxu0  ;;  %v7229_v9 = vld [vmem:[%s10737_s10 + $0x188] sm:$0xff] }
0x109b   :  { %v8320_v8 = vpop.f32.mrb[99].mxu0  ;;  %v7237_v10 = vld [vmem:[%s10737_s10 + $0x1c8] sm:$0xff] }
0x109c   :  { %v7214_v8 = vld [vmem:[%s10737_s10 + $0x110] sm:$0xff]  ;;  %v7265_v12 = vcombine.high %v7229_v9, %v7237_v10 }
0x10a0   :  { %v4495_v5 = vpop.f32.mrb[100].mxu0 }
0x10a1   :  { %4502 = vrot.lane.b32.xlu0 %v4495_v5, %s10792_s6  ;;  %v8331_v59 = vpop.f32.mrb[101].mxu0  ;;  %v7215_v5 = vld [vmem:[%s10737_s10 + $0x118] sm:$0xff] }
0x10a2   :  { %v4498_v14 = vpop.f32.mrb[102].mxu0  ;;  %v7223_v59 = vld [vmem:[%s10737_s10 + $0x158] sm:$0xff] }
0x10a3   :  { %v8332_v4 = vpop.f32.mrb[103].mxu0  ;;  %v7262_v14 = vcombine.low %v7228_v63, %v7236_v1 }
0x10a4   :  { %v7250_v4 = vcombine.low %v7214_v8, %v7222_v13 }
0x10a8   :  { %v4613_v18 = vpop.f32.mrb[104].mxu0 }
0x10a9   :  { %4620 = vrot.lane.b32.xlu0 %v4613_v18, %s10793_s24  ;;  %v8343_v23 = vpop.f32.mrb[105].mxu0  ;;  %v7252_v18 = vcombine.low %v7215_v5, %v7223_v59 }
0x10aa   :  { %v4616_v25 = vpop.f32.mrb[106].mxu0  ;;  %v7264_v23 = vcombine.low %v7229_v9, %v7237_v10  ;;  %v7219_v9 = vld [vmem:[%s10737_s10 + $0x138] sm:$0xff] }
0x10ab   :  { %v8344_v16 = vpop.f32.mrb[107].mxu0  ;;  %v7251_v25 = vcombine.high %v7214_v8, %v7222_v13  ;;  %v7227_v10 = vld [vmem:[%s10737_s10 + $0x178] sm:$0xff] }
0x10ac   :  { %v7253_v16 = vcombine.high %v7215_v5, %v7223_v59  ;;  %v7261_v5 = vcombine.high %v7219_v9, %v7227_v10  ;;  %v7234_v59 = vld [vmem:[%s10737_s10 + $0x1b0] sm:$0xff] }
0x10b5   :  { %v3919_v26 = vpop.permute.xlu1 %3918 }
0x10b6   :  { %3921 = vst.msk [vmem:[#allocation2] sm:$0xff] %vm720_vm4, %v3919_v26 }
0x10bd   :  { %v4037_v24 = vpop.permute.xlu1 %4036 }
0x10be   :  { %4039 = vst.msk [vmem:[#allocation2] sm:$0xff] %vm839_vm5, %v4037_v24 }
0x10c5   :  { %v4155_v27 = vpop.permute.xlu1 %4154 }
0x10c6   :  { %4157 = vst.msk [vmem:[#allocation2] sm:$0xff] %vm958_vm6, %v4155_v27 }
0x10cd   :  { %v4624_v48 = vld [vmem:[#allocation2] sm:$0xff] }
0x110b   :  { %v4385_v30 = vpop.permute.xlu0 %4384 }
0x110c   :  { %4387 = vst.msk [vmem:[#allocation2 + $0x8] sm:$0xff] %vm720_vm4, %v4385_v30 }
0x1113   :  { %v4503_v2 = vpop.permute.xlu0 %4502 }
0x1114   :  { %4505 = vst.msk [vmem:[#allocation2 + $0x8] sm:$0xff] %vm839_vm5, %v4503_v2 }
0x111b   :  { %v4621_v32 = vpop.permute.xlu0 %4620 }
0x111c   :  { %4623 = vst.msk [vmem:[#allocation2 + $0x8] sm:$0xff] %vm958_vm6, %v4621_v32 }
0x1123   :  { %v4625_v36 = vld [vmem:[#allocation2 + $0x8] sm:$0xff] }
0x1124   :  { %v4631_v38 = vpack.c.bf16 %v4625_v36, %v4624_v48  ;;  %v7210_v36 = vld [vmem:[%s10739_s14 + $0x1] ss:$0 sm:$0xff] }
0x1126   :  { %8350 = vmatmul.mubr.msk.bf16.vlgmr.msra.gmra.mrb[104].mxu1 %vm441_vm15, %v4631_v38 }
0x1127   :  { %5101 = vmatprep.mubr.bf16.mxu1 %v8774_v29  ;;  %5070 = vmatpush1.bf16.msra.mxu1 %v7248_v3 }
0x1128   :  { %5071 = vmatprep.subr.bf16.mxu1 %v7265_v12 }
0x112b   :  { %5072 = vmatpush1.bf16.msra.mxu1 %v7264_v23 }
0x112c   :  { %5155 = vmatprep.subr.bf16.mxu1 %v7253_v16 }
0x11f9   :  { %v4689_v37 = vpop.f32.mrb[104].mxu1 }
0x11fa   :  { %v4690_v43 = vadd.f32 %v7204_v39, %v4689_v37  ;;  %v8351_v50 = vpop.f32.mrb[105].mxu1 }
0x11fb   :  { %v4692_v52 = vpop.f32.mrb[106].mxu1  ;;  %v7211_v50 = vld [vmem:[%s10740_s15 + $0x1] ss:$0 sm:$0xff] }
0x11fc   :  { %v4693_v28 = vadd.f32 %v7204_v39, %v4692_v52  ;;  %v8352_v44 = vpop.f32.mrb[107].mxu1  ;;  %v4696_v46 = vadd.f32 %v4690_v43, %v9874_v40 }
0x11fd   :  { %v7238_v44 = vld [vmem:[%s10737_s10 + $0x1d0] sm:$0xff] }
0x11fe   :  { %v4697_v49 = vadd.f32 %v4693_v28, %v9876_v35  ;;  %v4702_v51 = vsel %vm441_vm15, %v4696_v46, 0.0  ;;  %v7212_v35 = vld [vmem:[%s10737_s10 + $0x100] sm:$0xff]  ;;  %v7230_v28 = vld [vmem:[%s10737_s10 + $0x190] sm:$0xff] }
0x11ff   :  { %4703 = vadd.xlane.f32.xlu1 %v4702_v51  ;;  %v7246_v42 = vcombine.low %v7212_v35, %v7220_v60  ;;  %v7247_v62 = vcombine.high %v7212_v35, %v7220_v60  ;;  %v7232_v60 = vld [vmem:[%s10737_s10 + $0x1a0] sm:$0xff] }
0x1200   :  { %v4705_v47 = vsel %vm441_vm15, %v4697_v49, 0.0  ;;  %v7271_v1 = vcombine.high %v7232_v60, %v7240_v61  ;;  %v7270_v8 = vcombine.low %v7232_v60, %v7240_v61  ;;  %v8556_v60 = vld [vmem:[%s10738_s12 + $0x4b0] sm:$0xff]   ;;  %v8557_v61 = vld [vmem:[%s10738_s12 + $0x478] sm:$0xff]  }
0x1201   :  { %4706 = vadd.xlane.f32.xlu0 %v4705_v47  ;;  %5026 = vmatprep.subr.bf16.mxu0 %v7247_v62  ;;  %v7241_v62 = vld [vmem:[%s10737_s10 + $0x1e8] sm:$0xff] }
0x1202   :  { %5027 = vmatpush1.bf16.msra.mxu0 %v7246_v42  ;;  %v7233_v42 = vld [vmem:[%s10737_s10 + $0x1a8] sm:$0xff] }
0x1203   :  { %5028 = vmatprep.subr.bf16.mxu0 %v7263_v7  ;;  %v7273_v3 = vcombine.high %v7233_v42, %v7241_v62  ;;  %v7226_v7 = vld [vmem:[%s10737_s10 + $0x170] sm:$0xff]  ;;  %v7272_v12 = vcombine.low %v7233_v42, %v7241_v62  ;;  %v8558_v42 = vld [vmem:[%s10738_s12 + $0x4f8] sm:$0xff]  }
0x1204   :  { %v7259_v13 = vcombine.high %v7218_v6, %v7226_v7  ;;  %v7258_v23 = vcombine.low %v7218_v6, %v7226_v7  ;;  %v8559_v62 = vld [vmem:[%s10738_s12 + $0x438] sm:$0xff]  }
0x1206   :  { %5029 = vmatpush1.bf16.msra.mxu0 %v7262_v14  ;;  %v7242_v14 = vld [vmem:[%s10737_s10 + $0x1f0] sm:$0xff] }
0x1207   :  { %5112 = vmatprep.subr.bf16.mxu0 %v7251_v25  ;;  %v7260_v25 = vcombine.low %v7219_v9, %v7227_v10  ;;  %v7275_v16 = vcombine.high %v7234_v59, %v7242_v14 }
0x128c   :  { %v4704_v54 = vpop.xlane.xlu1 %4703 }
0x128d   :  { %v4708_v55 = vmul.f32 0.03125, %v4704_v54 }
0x128e   :  { %v4707_v17 = vpop.xlane.xlu0 %4706 }
0x128f   :  { %v4710_v45 = vsub.f32 %v4696_v46, %v4708_v55  ;;  %v4709_v57 = vmul.f32 0.03125, %v4707_v17  ;;  %v7231_v46 = vld [vmem:[%s10737_s10 + $0x198] sm:$0xff]  ;;  %v7267_v55 = vcombine.high %v7230_v28, %v7238_v44 }
0x1291   :  { %v4711_v19 = vsub.f32 %v4697_v49, %v4709_v57  ;;  %v4712_v58 = vmul.f32 %v4710_v45, %v4710_v45  ;;  %v7239_v49 = vld [vmem:[%s10737_s10 + $0x1d8] sm:$0xff]  ;;  %v7224_v57 = vld [vmem:[%s10737_s10 + $0x160] sm:$0xff] }
0x1292   :  { %v7269_v17 = vcombine.high %v7231_v46, %v7239_v49 }
0x1293   :  { %v4714_v56 = vsel %vm441_vm15, %v4712_v58, 0.0  ;;  %v4713_v20 = vmul.f32 %v4711_v19, %v4711_v19  ;;  %v7225_v58 = vld [vmem:[%s10737_s10 + $0x168] sm:$0xff] }
0x1294   :  { %4715 = vadd.xlane.f32.xlu0 %v4714_v56  ;;  %v7266_v56 = vcombine.low %v7230_v28, %v7238_v44  ;;  %v8541_v28 = vld [vmem:[%s10738_s12 + $0x458] sm:$0xff]  }
0x1295   :  { %v4717_v40 = vsel %vm441_vm15, %v4713_v20, 0.0  ;;  %v7268_v20 = vcombine.low %v7231_v46, %v7239_v49  ;;  %v8542_v44 = vld [vmem:[%s10738_s12 + $0x4d8] sm:$0xff]  }
0x1296   :  { %4718 = vadd.xlane.f32.xlu1 %v4717_v40  ;;  %v8543_v46 = vld [vmem:[%s10738_s12 + $0x418] sm:$0xff]  }
0x1297   :  { %v8544_v49 = vld [vmem:[%s10738_s12 + $0x498] sm:$0xff]  }
0x1321   :  { %v4716_v26 = vpop.xlane.xlu0 %4715 }
0x1322   :  { %v4720_v24 = vmul.f32 0.03125, %v4716_v26 }
0x1323   :  { %v4719_v27 = vpop.xlane.xlu1 %4718 }
0x1324   :  { %v4722_v30 = vadd.f32 1e-05, %v4720_v24  ;;  %v4721_v2 = vmul.f32 0.03125, %v4719_v27  ;;  %v7274_v24 = vcombine.low %v7234_v59, %v7242_v14 }
0x1326   :  { %8739 = vrsqrt.f32 %v4722_v30  ;;  %v4723_v32 = vadd.f32 1e-05, %v4721_v2  ;;  %v8529_v30 = vld [vmem:[%s10738_s12 + $0x440] sm:$0xff]  }
0x1327   :  { %v8530_v2 = vld [vmem:[%s10738_s12 + $0x4c0] sm:$0xff]  }
0x1328   :  { %8741 = vrsqrt.f32 %v4723_v32  ;;  %v8531_v32 = vld [vmem:[%s10738_s12 + $0x400] sm:$0xff]  }
0x1330   :  { %v8740_v48 = vpop.eup %8739 }
0x1331   :  { %v4726_v38 = vmul.f32 %v8740_v48, %v4710_v45  ;;  %v7216_v45 = vld [vmem:[%s10737_s10 + $0x120] sm:$0xff] }
0x1332   :  { %v8742_v39 = vpop.eup %8741  ;;  %v7255_v40 = vcombine.high %v7216_v45, %v7224_v57  ;;  %v7254_v53 = vcombine.low %v7216_v45, %v7224_v57  ;;  %v8532_v48 = vld [vmem:[%s10738_s12 + $0x480] sm:$0xff]   ;;  %v8549_v57 = vld [vmem:[%s10738_s12 + $0x468] sm:$0xff]  }
0x1333   :  { %v4734_v37 = vmul.f32 %v7210_v36, %v4726_v38  ;;  %v4727_v43 = vmul.f32 %v8742_v39, %v4711_v19  ;;  %v7217_v19 = vld [vmem:[%s10737_s10 + $0x128] sm:$0xff]  ;;  %v8548_v45 = vld [vmem:[%s10738_s12 + $0x4a0] sm:$0xff]  }
0x1334   :  { %v7257_v35 = vcombine.high %v7217_v19, %v7225_v58  ;;  %v7256_v63 = vcombine.low %v7217_v19, %v7225_v58  ;;  %v8535_v38 = vld [vmem:[%s10738_s12 + $0x408] sm:$0xff]  }
0x1335   :  { %v4735_v52 = vmul.f32 %v7210_v36, %v4727_v43  ;;  %v10158_v51 = vadd.f32 %v7211_v50, %v4734_v37  ;;  %v8533_v36 = vld [vmem:[%s10738_s12 + $0x448] sm:$0xff]   ;;  %v8537_v37 = vld [vmem:[%s10738_s12 + $0x450] sm:$0xff]  }
0x1336   :  { %v8536_v39 = vld [vmem:[%s10738_s12 + $0x488] sm:$0xff]   ;;  %v8538_v43 = vld [vmem:[%s10738_s12 + $0x4d0] sm:$0xff]  }
0x1337   :  { %v10160_v47 = vadd.f32 %v7211_v50, %v4735_v52  ;;  %v8539_v50 = vld [vmem:[%s10738_s12 + $0x410] sm:$0xff]   ;;  %v8550_v19 = vld [vmem:[%s10738_s12 + $0x4e8] sm:$0xff]  }
0x1338   :  { %v8540_v52 = vld [vmem:[%s10738_s12 + $0x490] sm:$0xff]   ;;  %v8551_v58 = vld [vmem:[%s10738_s12 + $0x428] sm:$0xff]  }
0x1339   :  { %v10164_v54 = vpack.c.bf16 %v10160_v47, %v10158_v51 }
0x133b   :  { %7278 = vmatmul.mubr.msk.bf16.vlgmr.msra.gmra.mrb[108].mxu0 %vm441_vm15, %v10164_v54  ;;  %7279 = vmatmul.mubr.msk.bf16.vlgmr.msra.gmra.mrb[108].mxu1 %vm441_vm15, %v10164_v54 }
0x133c   :  { %5113 = vmatpush1.bf16.msra.mxu0 %v7250_v4  ;;  %5156 = vmatpush1.bf16.msra.mxu1 %v7252_v18  ;;  %v7235_v4 = vld [vmem:[%s10737_s10 + $0x1b8] sm:$0xff] }
0x133d   :  { %5114 = vmatprep.subr.bf16.mxu0 %v7267_v55  ;;  %5157 = vmatprep.subr.bf16.mxu1 %v7269_v17  ;;  %v7243_v18 = vld [vmem:[%s10737_s10 + $0x1f8] sm:$0xff]  ;;  %v8546_v55 = vld [vmem:[%s10738_s12 + $0x4e0] sm:$0xff]  }
0x133e   :  { %5144 = vmatprep.mubr.bf16.mxu0 %v8774_v29  ;;  %5187 = vmatprep.mubr.bf16.mxu1 %v8774_v29  ;;  %v7277_v26 = vcombine.high %v7235_v4, %v7243_v18  ;;  %v7276_v27 = vcombine.low %v7235_v4, %v7243_v18  ;;  %v8547_v17 = vld [vmem:[%s10738_s12 + $0x420] sm:$0xff]  }
0x1340   :  { %5115 = vmatpush1.bf16.msra.mxu0 %v7266_v56  ;;  %5158 = vmatpush1.bf16.msra.mxu1 %v7268_v20  ;;  %v8552_v56 = vld [vmem:[%s10738_s12 + $0x4a8] sm:$0xff]   ;;  %v8553_v20 = vld [vmem:[%s10738_s12 + $0x470] sm:$0xff]  }
0x1341   :  { %5198 = vmatprep.subr.bf16.mxu0 %v7255_v40  ;;  %5241 = vmatprep.subr.bf16.mxu1 %v7257_v35  ;;  %v8554_v40 = vld [vmem:[%s10738_s12 + $0x4f0] sm:$0xff]  }
0x1342   :  { %v8555_v35 = vld [vmem:[%s10738_s12 + $0x430] sm:$0xff]  }
0x1343   :  { %7280 = vmatmul.mubr.msk.bf16.vlgmr.msra.gmra.mrb[112].mxu0 %vm441_vm15, %v10164_v54  ;;  %7281 = vmatmul.mubr.msk.bf16.vlgmr.msra.gmra.mrb[112].mxu1 %vm441_vm15, %v10164_v54 }
0x1344   :  { %5199 = vmatpush1.bf16.msra.mxu0 %v7254_v53  ;;  %5242 = vmatpush1.bf16.msra.mxu1 %v7256_v63  ;;  %v8560_v53 = vld [vmem:[%s10738_s12 + $0x4b8] sm:$0xff]   ;;  %v8561_v63 = vld [vmem:[%s10738_s12 + $0x540] sm:$0xff]  }
0x1345   :  { %5200 = vmatprep.subr.bf16.mxu0 %v7271_v1  ;;  %5243 = vmatprep.subr.bf16.mxu1 %v7273_v3  ;;  %v8562_v1 = vld [vmem:[%s10738_s12 + $0x5c0] sm:$0xff]   ;;  %v7244_v3 = vld [vmem:[%s10741_s11 + $0x10] sm:$0xff] }
0x1346   :  { %5230 = vmatprep.mubr.bf16.mxu0 %v8774_v29  ;;  %5273 = vmatprep.mubr.bf16.mxu1 %v8774_v29  ;;  %v4786_v6 = vrot.slane %v7244_v3, %v9485_v21  ;;  %v4794_v7 = vrot.slane %v7244_v3, %v9487_v22  ;;  %v4790_v9 = vrot.slane %v7244_v3, %v9492_v41 }
0x1347   :  { %v4798_v10 = vrot.slane %v7244_v3, %v9494_v15 }
0x1348   :  { %5201 = vmatpush1.bf16.msra.mxu0 %v7270_v8  ;;  %5244 = vmatpush1.bf16.msra.mxu1 %v7272_v12 }
0x1349   :  { %5284 = vmatprep.subr.bf16.mxu0 %v7259_v13  ;;  %5327 = vmatprep.subr.bf16.mxu1 %v7261_v5 }
0x134b   :  { %7282 = vmatmul.mubr.msk.bf16.vlgmr.msra.gmra.mrb[116].mxu0 %vm441_vm15, %v10164_v54  ;;  %7283 = vmatmul.mubr.msk.bf16.vlgmr.msra.gmra.mrb[116].mxu1 %vm441_vm15, %v10164_v54 }
0x134c   :  { %5285 = vmatpush1.bf16.msra.mxu0 %v7258_v23  ;;  %5328 = vmatpush1.bf16.msra.mxu1 %v7260_v25 }
0x134d   :  { %5286 = vmatprep.subr.bf16.mxu0 %v7275_v16  ;;  %5329 = vmatprep.subr.bf16.mxu1 %v7277_v26 }
0x134e   :  { %5316 = vmatprep.mubr.bf16.mxu0 %v8774_v29  ;;  %5359 = vmatprep.mubr.bf16.mxu1 %v8774_v29  ;;  %v8534_v29 = vld [vmem:[%s10738_s12 + $0x4c8] sm:$0xff]  }
0x1350   :  { %5287 = vmatpush1.bf16.msra.mxu0 %v7274_v24  ;;  %5330 = vmatpush1.bf16.msra.mxu1 %v7276_v27 }
0x1351   :  { %7938 = vmatprep.subr.bf16.mxu0 %v8529_v30  ;;  %7960 = vmatprep.subr.bf16.mxu1 %v8530_v2  ;;  %v4802_v30 = vrot.slane %v7244_v3, %v9500_v31  ;;  %v4810_v2 = vrot.slane %v7244_v3, %v9502_v33 }
0x1353   :  { %7284 = vmatmul.mubr.msk.bf16.vlgmr.msra.gmra.mrb[120].mxu0 %vm441_vm15, %v10164_v54  ;;  %7285 = vmatmul.mubr.msk.bf16.vlgmr.msra.gmra.mrb[120].mxu1 %vm441_vm15, %v10164_v54  ;;  %v8545_v54 = vld [vmem:[%s10738_s12 + $0x460] sm:$0xff]  }
0x1354   :  { %7939 = vmatpush3.bf16.msra.mxu0 %v8531_v32  ;;  %7961 = vmatpush3.bf16.msra.mxu1 %v8532_v48 }
0x1355   :  { %7940 = vmatprep.subr.bf16.mxu0 %v8533_v36  ;;  %7962 = vmatprep.subr.bf16.mxu1 %v8534_v29  ;;  %v4806_v36 = vrot.slane %v7244_v3, %v9504_v34  ;;  %v4814_v29 = vrot.slane %v7244_v3, %v9506_v11 }
0x1358   :  { %7941 = vmatpush3.bf16.msra.mxu0 %v8535_v38  ;;  %7963 = vmatpush3.bf16.msra.mxu1 %v8536_v39 }
0x1359   :  { %7942 = vmatprep.subr.bf16.mxu0 %v8537_v37  ;;  %7964 = vmatprep.subr.bf16.mxu1 %v8538_v43 }
0x135c   :  { %7943 = vmatpush3.bf16.msra.mxu0 %v8539_v50  ;;  %7965 = vmatpush3.bf16.msra.mxu1 %v8540_v52 }
0x135d   :  { %7944 = vmatprep.subr.bf16.mxu0 %v8541_v28  ;;  %7966 = vmatprep.subr.bf16.mxu1 %v8542_v44 }
0x1360   :  { %7945 = vmatpush3.bf16.msra.mxu0 %v8543_v46  ;;  %7967 = vmatpush3.bf16.msra.mxu1 %v8544_v49  ;;  %v10352_v46 = vld [vmem:[%s10741_s11 + $0x18] sm:$0xff] }
0x1361   :  { %7946 = vmatprep.subr.bf16.mxu0 %v8545_v54  ;;  %7968 = vmatprep.subr.bf16.mxu1 %v8546_v55  ;;  %v4826_v3 = vrot.slane %v10352_v46, %v9487_v22  ;;  %v8568_v22 = vld [vmem:[%s10738_s12 + $0x588] sm:$0xff]  }
0x1364   :  { %7947 = vmatpush3.bf16.msra.mxu0 %v8547_v17  ;;  %7969 = vmatpush3.bf16.msra.mxu1 %v8548_v45 }
0x1365   :  { %7948 = vmatprep.subr.bf16.mxu0 %v8549_v57  ;;  %7970 = vmatprep.subr.bf16.mxu1 %v8550_v19  ;;  %v8563_v19 = vld [vmem:[%s10738_s12 + $0x500] sm:$0xff]  }
0x1368   :  { %7949 = vmatpush3.bf16.msra.mxu0 %v8551_v58  ;;  %7971 = vmatpush3.bf16.msra.mxu1 %v8552_v56  ;;  %v8564_v58 = vld [vmem:[%s10738_s12 + $0x580] sm:$0xff]  }
0x1369   :  { %7950 = vmatprep.subr.bf16.mxu0 %v8553_v20  ;;  %7972 = vmatprep.subr.bf16.mxu1 %v8554_v40 }
0x136c   :  { %7951 = vmatpush3.bf16.msra.mxu0 %v8555_v35  ;;  %7973 = vmatpush3.bf16.msra.mxu1 %v8556_v60  ;;  %v8565_v60 = vld [vmem:[%s10738_s12 + $0x548] sm:$0xff]  }
0x136d   :  { %7952 = vmatprep.subr.bf16.mxu0 %v8557_v61  ;;  %7974 = vmatprep.subr.bf16.mxu1 %v8558_v42  ;;  %v8566_v61 = vld [vmem:[%s10738_s12 + $0x5c8] sm:$0xff]   ;;  %v4818_v42 = vrot.slane %v10352_v46, %v9485_v21 }
0x1370   :  { %7953 = vmatpush3.bf16.msra.mxu0 %v8559_v62  ;;  %7975 = vmatpush3.bf16.msra.mxu1 %v8560_v53 }
0x1371   :  { %7982 = vmatprep.subr.bf16.mxu0 %v8561_v63  ;;  %8004 = vmatprep.subr.bf16.mxu1 %v8562_v1 }
0x140e   :  { %v5060_v8 = vpop.f32.mrb[108].mxu0  ;;  %v5103_v12 = vpop.f32.mrb[108].mxu1 }
0x140f   :  { %v5061_v13 = vadd.f32 %v5060_v8, %v4786_v6  ;;  %v5104_v5 = vadd.f32 %v5103_v12, %v4794_v7  ;;  %v5062_v59 = vpop.f32.mrb[109].mxu0  ;;  %v5105_v14 = vpop.f32.mrb[109].mxu1  ;;  %v4822_v8 = vrot.slane %v10352_v46, %v9492_v41  ;;  %v8569_v41 = vld [vmem:[%s10738_s12 + $0x550] sm:$0xff]  }
0x1410   :  { %v5063_v4 = vadd.f32 %v5062_v59, %v4790_v9  ;;  %v5106_v18 = vadd.f32 %v5105_v14, %v4798_v10  ;;  %v5064_v23 = vpop.f32.mrb[110].mxu0  ;;  %v5107_v25 = vpop.f32.mrb[110].mxu1 }
0x1411   :  { %v5065_v16 = vadd.f32 %v5064_v23, %v4786_v6  ;;  %v5108_v26 = vadd.f32 %v5107_v25, %v4794_v7  ;;  %v5066_v24 = vpop.f32.mrb[111].mxu0  ;;  %v5109_v27 = vpop.f32.mrb[111].mxu1  ;;  %v5370_v38 = vmax.f32 %v5061_v13, 0.0  ;;  %v5372_v39 = vmax.f32 %v5104_v5, 0.0  ;;  %v8567_v13 = vld [vmem:[%s10738_s12 + $0x508] sm:$0xff]   ;;  %v8570_v23 = vld [vmem:[%s10738_s12 + $0x5d0] sm:$0xff]  }
0x1412   :  { %v5067_v32 = vadd.f32 %v5066_v24, %v4790_v9  ;;  %v5110_v48 = vadd.f32 %v5109_v27, %v4798_v10  ;;  %v5371_v50 = vmax.f32 %v5063_v4, 0.0  ;;  %v5373_v52 = vmax.f32 %v5106_v18, 0.0 }
0x1413   :  { %v5386_v37 = vmax.f32 %v5065_v16, 0.0  ;;  %v5388_v43 = vmax.f32 %v5108_v26, 0.0  ;;  %v4830_v5 = vrot.slane %v10352_v46, %v9494_v15 }
0x1414   :  { %v5387_v28 = vmax.f32 %v5067_v32, 0.0  ;;  %v5389_v44 = vmax.f32 %v5110_v48, 0.0 }
0x1415   :  { %v5659_v49 = vpack.c.bf16 %v5386_v37, %v5370_v38  ;;  %v5661_v54 = vpack.c.bf16 %v5388_v43, %v5372_v39 }
0x1416   :  { %v5660_v55 = vpack.c.bf16 %v5387_v28, %v5371_v50  ;;  %v5662_v17 = vpack.c.bf16 %v5389_v44, %v5373_v52  ;;  %v5146_v45 = vpop.f32.mrb[112].mxu0  ;;  %v5189_v57 = vpop.f32.mrb[112].mxu1  ;;  %v8573_v50 = vld [vmem:[%s10738_s12 + $0x558] sm:$0xff]  }
0x1417   :  { %v5147_v56 = vadd.f32 %v5146_v45, %v4802_v30  ;;  %v5190_v20 = vadd.f32 %v5189_v57, %v4810_v2  ;;  %v5148_v40 = vpop.f32.mrb[113].mxu0  ;;  %v5191_v35 = vpop.f32.mrb[113].mxu1  ;;  %v8574_v52 = vld [vmem:[%s10738_s12 + $0x5d8] sm:$0xff]  }
0x1418   :  { %v5149_v62 = vadd.f32 %v5148_v40, %v4806_v36  ;;  %v5192_v53 = vadd.f32 %v5191_v35, %v4814_v29  ;;  %v5150_v63 = vpop.f32.mrb[114].mxu0  ;;  %v5193_v1 = vpop.f32.mrb[114].mxu1  ;;  %6483 = vmatprep.mubr.bf16.mxu0 %v5660_v55  ;;  %6524 = vmatprep.mubr.bf16.mxu1 %v5662_v17  ;;  %v4834_v55 = vrot.slane %v10352_v46, %v9500_v31  ;;  %v8575_v35 = vld [vmem:[%s10738_s12 + $0x518] sm:$0xff]  }
0x1419   :  { %v5151_v6 = vadd.f32 %v5150_v63, %v4802_v30  ;;  %v5194_v7 = vadd.f32 %v5193_v1, %v4810_v2  ;;  %v5152_v9 = vpop.f32.mrb[115].mxu0  ;;  %v5195_v10 = vpop.f32.mrb[115].mxu1  ;;  %6484 = vmatmul.mubr.bf16.vlgmr.msra.gmra.mrb[124].mxu0 %v5659_v49  ;;  %6525 = vmatmul.mubr.bf16.vlgmr.msra.gmra.mrb[124].mxu1 %v5661_v54  ;;  %v5374_v59 = vmax.f32 %v5147_v56, 0.0  ;;  %v5376_v14 = vmax.f32 %v5190_v20, 0.0  ;;  %v8576_v31 = vld [vmem:[%s10738_s12 + $0x598] sm:$0xff]  }
0x141a   :  { %v5153_v12 = vadd.f32 %v5152_v9, %v4806_v36  ;;  %v5196_v21 = vadd.f32 %v5195_v10, %v4814_v29  ;;  %7983 = vmatpush3.bf16.msra.mxu0 %v8563_v19  ;;  %8005 = vmatpush3.bf16.msra.mxu1 %v8564_v58  ;;  %v5375_v25 = vmax.f32 %v5149_v62, 0.0  ;;  %v5377_v16 = vmax.f32 %v5192_v53, 0.0  ;;  %v8571_v36 = vld [vmem:[%s10738_s12 + $0x510] sm:$0xff]   ;;  %v8578_v53 = vld [vmem:[%s10738_s12 + $0x5e0] sm:$0xff]  }
0x141b   :  { %v5390_v4 = vmax.f32 %v5151_v6, 0.0  ;;  %v5392_v18 = vmax.f32 %v5194_v7, 0.0  ;;  %7984 = vmatprep.subr.bf16.mxu0 %v8565_v60  ;;  %8006 = vmatprep.subr.bf16.mxu1 %v8566_v61  ;;  %v8572_v29 = vld [vmem:[%s10738_s12 + $0x590] sm:$0xff]   ;;  %v4842_v58 = vrot.slane %v10352_v46, %v9502_v33  ;;  %v4838_v56 = vrot.slane %v10352_v46, %v9504_v34  ;;  %v8577_v34 = vld [vmem:[%s10738_s12 + $0x560] sm:$0xff]  }
0x141c   :  { %v5391_v26 = vmax.f32 %v5153_v12, 0.0  ;;  %v5393_v24 = vmax.f32 %v5196_v21, 0.0  ;;  %v4846_v60 = vrot.slane %v10352_v46, %v9506_v11  ;;  %v8579_v12 = vld [vmem:[%s10738_s12 + $0x520] sm:$0xff]  }
0x141d   :  { %v10386_v27 = vpack.c.bf16 %v5390_v4, %v5374_v59  ;;  %v10388_v15 = vpack.c.bf16 %v5392_v18, %v5376_v14  ;;  %v8580_v21 = vld [vmem:[%s10738_s12 + $0x5a0] sm:$0xff]   ;;  %v8581_v14 = vld [vmem:[%s10738_s12 + $0x568] sm:$0xff]  }
0x141e   :  { %v5664_v30 = vpack.c.bf16 %v5391_v26, %v5375_v25  ;;  %v5666_v2 = vpack.c.bf16 %v5393_v24, %v5377_v16  ;;  %7985 = vmatpush3.bf16.msra.mxu0 %v8567_v13  ;;  %8007 = vmatpush3.bf16.msra.mxu1 %v8568_v22  ;;  %v5232_v32 = vpop.f32.mrb[116].mxu0  ;;  %v5275_v48 = vpop.f32.mrb[116].mxu1  ;;  %v8582_v4 = vld [vmem:[%s10738_s12 + $0x5e8] sm:$0xff]  }
0x141f   :  { %v5233_v38 = vadd.f32 %v5232_v32, %v4818_v42  ;;  %v5276_v39 = vadd.f32 %v5275_v48, %v4826_v3  ;;  %v5234_v37 = vpop.f32.mrb[117].mxu0  ;;  %v5277_v43 = vpop.f32.mrb[117].mxu1  ;;  %7986 = vmatprep.subr.bf16.mxu0 %v8569_v41  ;;  %8008 = vmatprep.subr.bf16.mxu1 %v8570_v23  ;;  %v8583_v48 = vld [vmem:[%s10738_s12 + $0x528] sm:$0xff]  }
0x1420   :  { %v5235_v28 = vadd.f32 %v5234_v37, %v4822_v8  ;;  %v5278_v44 = vadd.f32 %v5277_v43, %v4830_v5  ;;  %v5236_v49 = vpop.f32.mrb[118].mxu0  ;;  %v5279_v54 = vpop.f32.mrb[118].mxu1  ;;  %6565 = vmatprep.mubr.bf16.mxu0 %v5664_v30  ;;  %6606 = vmatprep.mubr.bf16.mxu1 %v5666_v2  ;;  %v8585_v43 = vld [vmem:[%s10738_s12 + $0x570] sm:$0xff]  }
0x1421   :  { %v5237_v17 = vadd.f32 %v5236_v49, %v4818_v42  ;;  %v5280_v45 = vadd.f32 %v5279_v54, %v4826_v3  ;;  %v5238_v57 = vpop.f32.mrb[119].mxu0  ;;  %v5281_v19 = vpop.f32.mrb[119].mxu1  ;;  %v5378_v61 = vmax.f32 %v5233_v38, 0.0  ;;  %v5380_v33 = vmax.f32 %v5276_v39, 0.0 }
0x1422   :  { %v5239_v20 = vadd.f32 %v5238_v57, %v4822_v8  ;;  %v5282_v40 = vadd.f32 %v5281_v19, %v4830_v5  ;;  %7987 = vmatpush3.bf16.msra.mxu0 %v8571_v36  ;;  %8009 = vmatpush3.bf16.msra.mxu1 %v8572_v29  ;;  %v5379_v63 = vmax.f32 %v5235_v28, 0.0  ;;  %v5381_v1 = vmax.f32 %v5278_v44, 0.0  ;;  %v8584_v36 = vld [vmem:[%s10738_s12 + $0x5a8] sm:$0xff]   ;;  %v8587_v57 = vld [vmem:[%s10738_s12 + $0x530] sm:$0xff]  }
0x1423   :  { %v5394_v42 = vmax.f32 %v5237_v17, 0.0  ;;  %v5396_v62 = vmax.f32 %v5280_v45, 0.0  ;;  %7988 = vmatprep.subr.bf16.mxu0 %v8573_v50  ;;  %8010 = vmatprep.subr.bf16.mxu1 %v8574_v52  ;;  %v8586_v50 = vld [vmem:[%s10738_s12 + $0x5f0] sm:$0xff]  }
0x1424   :  { %v5395_v3 = vmax.f32 %v5239_v20, 0.0  ;;  %v5397_v6 = vmax.f32 %v5282_v40, 0.0  ;;  %v8588_v19 = vld [vmem:[%s10738_s12 + $0x5b0] sm:$0xff]   ;;  %v8591_v20 = vld [vmem:[%s10738_s12 + $0x538] sm:$0xff]  }
0x1425   :  { %v10422_v7 = vpack.c.bf16 %v5394_v42, %v5378_v61  ;;  %v10424_v11 = vpack.c.bf16 %v5396_v62, %v5380_v33  ;;  %v8592_v40 = vld [vmem:[%s10738_s12 + $0x5b8] sm:$0xff]   ;;  %v8596_v61 = vld [vmem:[%s10738_s12 + $0x680] sm:$0xff]   ;;  %v8597_v33 = vld [vmem:[%s10738_s12 + $0x648] sm:$0xff]  }
0x1426   :  { %v10426_v46 = vpack.c.bf16 %v5395_v3, %v5379_v63  ;;  %v10428_v9 = vpack.c.bf16 %v5397_v6, %v5381_v1  ;;  %7989 = vmatpush3.bf16.msra.mxu0 %v8575_v35  ;;  %8011 = vmatpush3.bf16.msra.mxu1 %v8576_v31  ;;  %v5318_v10 = vpop.f32.mrb[120].mxu0  ;;  %v5361_v8 = vpop.f32.mrb[120].mxu1  ;;  %v8593_v35 = vld [vmem:[%s10738_s12 + $0x640] sm:$0xff]   ;;  %v8598_v42 = vld [vmem:[%s10738_s12 + $0x6c8] sm:$0xff]   ;;  %v8604_v63 = vld [vmem:[%s10738_s12 + $0x690] sm:$0xff]  }
0x1427   :  { %v5319_v13 = vadd.f32 %v5318_v10, %v4834_v55  ;;  %v5362_v22 = vadd.f32 %v5361_v8, %v4842_v58  ;;  %v5320_v5 = vpop.f32.mrb[121].mxu0  ;;  %v5363_v59 = vpop.f32.mrb[121].mxu1  ;;  %7990 = vmatprep.subr.bf16.mxu0 %v8577_v34  ;;  %8012 = vmatprep.subr.bf16.mxu1 %v8578_v53  ;;  %v8594_v31 = vld [vmem:[%s10738_s12 + $0x6c0] sm:$0xff]   ;;  %v8599_v62 = vld [vmem:[%s10738_s12 + $0x608] sm:$0xff]   ;;  %v8603_v53 = vld [vmem:[%s10738_s12 + $0x610] sm:$0xff]  }
0x1428   :  { %v5321_v18 = vadd.f32 %v5320_v5, %v4838_v56  ;;  %v5364_v41 = vadd.f32 %v5363_v59, %v4846_v60  ;;  %v5322_v23 = vpop.f32.mrb[122].mxu0  ;;  %v5365_v25 = vpop.f32.mrb[122].mxu1  ;;  %v8600_v34 = vld [vmem:[%s10738_s12 + $0x688] sm:$0xff]   ;;  %v8605_v1 = vld [vmem:[%s10738_s12 + $0x658] sm:$0xff]   ;;  %v8610_v10 = vld [vmem:[%s10738_s12 + $0x6e0] sm:$0xff]  }
0x1429   :  { %v5323_v16 = vadd.f32 %v5322_v23, %v4834_v55  ;;  %v5366_v26 = vadd.f32 %v5365_v25, %v4842_v58  ;;  %v5324_v24 = vpop.f32.mrb[123].mxu0  ;;  %v5367_v30 = vpop.f32.mrb[123].mxu1  ;;  %v5382_v29 = vmax.f32 %v5319_v13, 0.0  ;;  %v5384_v38 = vmax.f32 %v5362_v22, 0.0  ;;  %v8589_v58 = vld [vmem:[%s10738_s12 + $0x578] sm:$0xff]   ;;  %v8611_v8 = vld [vmem:[%s10738_s12 + $0x620] sm:$0xff]  }
0x142a   :  { %v5325_v2 = vadd.f32 %v5324_v24, %v4838_v56  ;;  %v5368_v32 = vadd.f32 %v5367_v30, %v4846_v60  ;;  %7991 = vmatpush3.bf16.msra.mxu0 %v8579_v12  ;;  %8013 = vmatpush3.bf16.msra.mxu1 %v8580_v21  ;;  %v5383_v52 = vmax.f32 %v5321_v18, 0.0  ;;  %v5385_v28 = vmax.f32 %v5364_v41, 0.0  ;;  %v8590_v56 = vld [vmem:[%s10738_s12 + $0x5f8] sm:$0xff]   ;;  %v8595_v60 = vld [vmem:[%s10738_s12 + $0x600] sm:$0xff]   ;;  %v8613_v21 = vld [vmem:[%s10738_s12 + $0x668] sm:$0xff]  }
0x142b   :  { %v5398_v39 = vmax.f32 %v5323_v16, 0.0  ;;  %v5400_v37 = vmax.f32 %v5366_v26, 0.0  ;;  %7992 = vmatprep.subr.bf16.mxu0 %v8581_v14  ;;  %8014 = vmatprep.subr.bf16.mxu1 %v8582_v4  ;;  %v8606_v3 = vld [vmem:[%s10738_s12 + $0x6d8] sm:$0xff]   ;;  %v8612_v12 = vld [vmem:[%s10738_s12 + $0x6a0] sm:$0xff]   ;;  %v8614_v13 = vld [vmem:[%s10738_s12 + $0x6e8] sm:$0xff]  }
0x142c   :  { %v5399_v44 = vmax.f32 %v5325_v2, 0.0  ;;  %v5401_v49 = vmax.f32 %v5368_v32, 0.0  ;;  %v8607_v6 = vld [vmem:[%s10738_s12 + $0x618] sm:$0xff]   ;;  %v8615_v22 = vld [vmem:[%s10738_s12 + $0x628] sm:$0xff]   ;;  %v8617_v59 = vld [vmem:[%s10738_s12 + $0x670] sm:$0xff]  }
0x142d   :  { %v10454_v54 = vpack.c.bf16 %v5398_v39, %v5382_v29  ;;  %v10456_v55 = vpack.c.bf16 %v5400_v37, %v5384_v38  ;;  %v8616_v5 = vld [vmem:[%s10738_s12 + $0x6a8] sm:$0xff]   ;;  %v8618_v14 = vld [vmem:[%s10738_s12 + $0x6f0] sm:$0xff]   ;;  %v8621_v41 = vld [vmem:[%s10738_s12 + $0x678] sm:$0xff]  }
0x142e   :  { %v10458_v17 = vpack.c.bf16 %v5399_v44, %v5383_v52  ;;  %v10460_v45 = vpack.c.bf16 %v5401_v49, %v5385_v28  ;;  %7993 = vmatpush3.bf16.msra.mxu0 %v8583_v48  ;;  %8015 = vmatpush3.bf16.msra.mxu1 %v8584_v36  ;;  %v8619_v4 = vld [vmem:[%s10738_s12 + $0x630] sm:$0xff]   ;;  %v8622_v23 = vld [vmem:[%s10738_s12 + $0x6f8] sm:$0xff]   ;;  %v8625_v26 = vld [vmem:[%s10738_s12 + $0x740] sm:$0xff]  }
0x142f   :  { %7994 = vmatprep.subr.bf16.mxu0 %v8585_v43  ;;  %8016 = vmatprep.subr.bf16.mxu1 %v8586_v50  ;;  %v8620_v18 = vld [vmem:[%s10738_s12 + $0x6b0] sm:$0xff]   ;;  %v8623_v25 = vld [vmem:[%s10738_s12 + $0x638] sm:$0xff]   ;;  %v8626_v24 = vld [vmem:[%s10738_s12 + $0x7c0] sm:$0xff]  }
0x1430   :  { %v8624_v16 = vld [vmem:[%s10738_s12 + $0x6b8] sm:$0xff]   ;;  %v8627_v30 = vld [vmem:[%s10738_s12 + $0x700] sm:$0xff]   ;;  %v8629_v32 = vld [vmem:[%s10738_s12 + $0x748] sm:$0xff]  }
0x1431   :  { %v8628_v2 = vld [vmem:[%s10738_s12 + $0x780] sm:$0xff]   ;;  %v8630_v48 = vld [vmem:[%s10738_s12 + $0x7c8] sm:$0xff]   ;;  %v8635_v38 = vld [vmem:[%s10738_s12 + $0x710] sm:$0xff]  }
0x1432   :  { %7995 = vmatpush3.bf16.msra.mxu0 %v8587_v57  ;;  %8017 = vmatpush3.bf16.msra.mxu1 %v8588_v19  ;;  %v8631_v36 = vld [vmem:[%s10738_s12 + $0x708] sm:$0xff]   ;;  %v8636_v39 = vld [vmem:[%s10738_s12 + $0x790] sm:$0xff]   ;;  %v8637_v37 = vld [vmem:[%s10738_s12 + $0x758] sm:$0xff]  }
0x1433   :  { %7996 = vmatprep.subr.bf16.mxu0 %v8589_v58  ;;  %8018 = vmatprep.subr.bf16.mxu1 %v8590_v56  ;;  %v8632_v29 = vld [vmem:[%s10738_s12 + $0x788] sm:$0xff]   ;;  %v8638_v43 = vld [vmem:[%s10738_s12 + $0x7d8] sm:$0xff]   ;;  %v8641_v28 = vld [vmem:[%s10738_s12 + $0x760] sm:$0xff]  }
0x1434   :  { %v8639_v50 = vld [vmem:[%s10738_s12 + $0x718] sm:$0xff]   ;;  %v8642_v44 = vld [vmem:[%s10738_s12 + $0x7e0] sm:$0xff]   ;;  %v8646_v57 = vld [vmem:[%s10738_s12 + $0x7e8] sm:$0xff]  }
0x1435   :  { %v8640_v52 = vld [vmem:[%s10738_s12 + $0x798] sm:$0xff]   ;;  %v8643_v49 = vld [vmem:[%s10738_s12 + $0x720] sm:$0xff]   ;;  %v8647_v19 = vld [vmem:[%s10738_s12 + $0x728] sm:$0xff]  }
0x1436   :  { %7997 = vmatpush3.bf16.msra.mxu0 %v8591_v20  ;;  %8019 = vmatpush3.bf16.msra.mxu1 %v8592_v40  ;;  %v8648_v58 = vld [vmem:[%s10738_s12 + $0x7a8] sm:$0xff]   ;;  %v8649_v56 = vld [vmem:[%s10738_s12 + $0x770] sm:$0xff]  }
0x1437   :  { %8026 = vmatprep.subr.bf16.mxu0 %v8593_v35  ;;  %8048 = vmatprep.subr.bf16.mxu1 %v8594_v31  ;;  %v8650_v20 = vld [vmem:[%s10738_s12 + $0x7f0] sm:$0xff]   ;;  %v8653_v31 = vld [vmem:[%s10738_s12 + $0x778] sm:$0xff]  }
0x1438   :  { %v8651_v40 = vld [vmem:[%s10738_s12 + $0x730] sm:$0xff]  }
0x1439   :  { %6566 = vmatmul.mubr.bf16.vlgmr.msra.gmra.mrb[128].mxu0 %v10386_v27  ;;  %6607 = vmatmul.mubr.bf16.vlgmr.msra.gmra.mrb[128].mxu1 %v10388_v15  ;;  %v8601_v27 = vld [vmem:[%s10738_s12 + $0x650] sm:$0xff]  }
0x143a   :  { %8027 = vmatpush3.bf16.msra.mxu0 %v8595_v60  ;;  %6647 = vmatprep.mubr.bf16.mxu0 %v10426_v46  ;;  %v8602_v15 = vld [vmem:[%s10738_s12 + $0x6d0] sm:$0xff]   ;;  %v8608_v46 = vld [vmem:[%s10738_s12 + $0x698] sm:$0xff]  }
0x143b   :  { %8049 = vmatpush3.bf16.msra.mxu1 %v8596_v61  ;;  %6688 = vmatprep.mubr.bf16.mxu1 %v10428_v9  ;;  %v8609_v9 = vld [vmem:[%s10738_s12 + $0x660] sm:$0xff]   ;;  %v8652_v35 = vld [vmem:[%s10738_s12 + $0x7b0] sm:$0xff]   ;;  %v8654_v60 = vld [vmem:[%s10738_s12 + $0x7f8] sm:$0xff]  }
0x143c   :  { %8028 = vmatprep.subr.bf16.mxu0 %v8597_v33  ;;  %8050 = vmatprep.subr.bf16.mxu1 %v8598_v42  ;;  %v8655_v61 = vld [vmem:[%s10738_s12 + $0x738] sm:$0xff]  }
0x143d   :  { %v8656_v33 = vld [vmem:[%s10738_s12 + $0x7b8] sm:$0xff]  }
0x143e   :  { %8029 = vmatpush3.bf16.msra.mxu0 %v8599_v62 }
0x143f   :  { %8051 = vmatpush3.bf16.msra.mxu1 %v8600_v34  ;;  %8030 = vmatprep.subr.bf16.mxu0 %v8601_v27  ;;  %v7543_v34 = vld [vmem:[%s10742_s13 + $0x1] ss:$0 sm:$0xff] }
0x1440   :  { %8052 = vmatprep.subr.bf16.mxu1 %v8602_v15 }
0x1442   :  { %8031 = vmatpush3.bf16.msra.mxu0 %v8603_v53 }
0x1443   :  { %8053 = vmatpush3.bf16.msra.mxu1 %v8604_v63  ;;  %8032 = vmatprep.subr.bf16.mxu0 %v8605_v1 }
0x1444   :  { %8054 = vmatprep.subr.bf16.mxu1 %v8606_v3 }
0x1446   :  { %8033 = vmatpush3.bf16.msra.mxu0 %v8607_v6 }
0x1447   :  { %8055 = vmatpush3.bf16.msra.mxu1 %v8608_v46  ;;  %8034 = vmatprep.subr.bf16.mxu0 %v8609_v9 }
0x1448   :  { %8056 = vmatprep.subr.bf16.mxu1 %v8610_v10 }
0x144a   :  { %8035 = vmatpush3.bf16.msra.mxu0 %v8611_v8 }
0x144b   :  { %8057 = vmatpush3.bf16.msra.mxu1 %v8612_v12  ;;  %8036 = vmatprep.subr.bf16.mxu0 %v8613_v21 }
0x144c   :  { %8058 = vmatprep.subr.bf16.mxu1 %v8614_v13 }
0x144e   :  { %8037 = vmatpush3.bf16.msra.mxu0 %v8615_v22 }
0x144f   :  { %8059 = vmatpush3.bf16.msra.mxu1 %v8616_v5  ;;  %8038 = vmatprep.subr.bf16.mxu0 %v8617_v59 }
0x1450   :  { %8060 = vmatprep.subr.bf16.mxu1 %v8618_v14 }
0x1452   :  { %8039 = vmatpush3.bf16.msra.mxu0 %v8619_v4 }
0x1453   :  { %8061 = vmatpush3.bf16.msra.mxu1 %v8620_v18  ;;  %8040 = vmatprep.subr.bf16.mxu0 %v8621_v41 }
0x1454   :  { %8062 = vmatprep.subr.bf16.mxu1 %v8622_v23 }
0x1456   :  { %8041 = vmatpush3.bf16.msra.mxu0 %v8623_v25 }
0x1457   :  { %8063 = vmatpush3.bf16.msra.mxu1 %v8624_v16  ;;  %8070 = vmatprep.subr.bf16.mxu0 %v8625_v26 }
0x1458   :  { %8092 = vmatprep.subr.bf16.mxu1 %v8626_v24 }
0x1459   :  { %6648 = vmatmul.mubr.bf16.vlgmr.msra.gmra.mrb[132].mxu0 %v10422_v7  ;;  %v8633_v7 = vld [vmem:[%s10738_s12 + $0x750] sm:$0xff]  }
0x145a   :  { %6689 = vmatmul.mubr.bf16.vlgmr.msra.gmra.mrb[132].mxu1 %v10424_v11  ;;  %8071 = vmatpush3.bf16.msra.mxu0 %v8627_v30  ;;  %v8634_v11 = vld [vmem:[%s10738_s12 + $0x7d0] sm:$0xff]  }
0x145b   :  { %6729 = vmatprep.mubr.bf16.mxu0 %v10458_v17  ;;  %8093 = vmatpush3.bf16.msra.mxu1 %v8628_v2  ;;  %v8644_v17 = vld [vmem:[%s10738_s12 + $0x7a0] sm:$0xff]  }
0x145c   :  { %6770 = vmatprep.mubr.bf16.mxu1 %v10460_v45  ;;  %8072 = vmatprep.subr.bf16.mxu0 %v8629_v32  ;;  %v8645_v45 = vld [vmem:[%s10738_s12 + $0x768] sm:$0xff]  }
0x145d   :  { %8094 = vmatprep.subr.bf16.mxu1 %v8630_v48 }
0x145e   :  { %8073 = vmatpush3.bf16.msra.mxu0 %v8631_v36 }
0x145f   :  { %8095 = vmatpush3.bf16.msra.mxu1 %v8632_v29  ;;  %8074 = vmatprep.subr.bf16.mxu0 %v8633_v7 }
0x1460   :  { %8096 = vmatprep.subr.bf16.mxu1 %v8634_v11 }
0x1462   :  { %8075 = vmatpush3.bf16.msra.mxu0 %v8635_v38 }
0x1463   :  { %8097 = vmatpush3.bf16.msra.mxu1 %v8636_v39  ;;  %8076 = vmatprep.subr.bf16.mxu0 %v8637_v37 }
0x1464   :  { %8098 = vmatprep.subr.bf16.mxu1 %v8638_v43 }
0x1466   :  { %8077 = vmatpush3.bf16.msra.mxu0 %v8639_v50 }
0x1467   :  { %8099 = vmatpush3.bf16.msra.mxu1 %v8640_v52  ;;  %8078 = vmatprep.subr.bf16.mxu0 %v8641_v28 }
0x1468   :  { %8100 = vmatprep.subr.bf16.mxu1 %v8642_v44 }
0x146a   :  { %8079 = vmatpush3.bf16.msra.mxu0 %v8643_v49 }
0x146b   :  { %8101 = vmatpush3.bf16.msra.mxu1 %v8644_v17  ;;  %8080 = vmatprep.subr.bf16.mxu0 %v8645_v45 }
0x146c   :  { %8102 = vmatprep.subr.bf16.mxu1 %v8646_v57 }
0x146e   :  { %8081 = vmatpush3.bf16.msra.mxu0 %v8647_v19 }
0x146f   :  { %8103 = vmatpush3.bf16.msra.mxu1 %v8648_v58  ;;  %8082 = vmatprep.subr.bf16.mxu0 %v8649_v56 }
0x1470   :  { %8104 = vmatprep.subr.bf16.mxu1 %v8650_v20 }
0x1472   :  { %8083 = vmatpush3.bf16.msra.mxu0 %v8651_v40 }
0x1473   :  { %8105 = vmatpush3.bf16.msra.mxu1 %v8652_v35  ;;  %8084 = vmatprep.subr.bf16.mxu0 %v8653_v31 }
0x1474   :  { %8106 = vmatprep.subr.bf16.mxu1 %v8654_v60 }
0x1476   :  { %8085 = vmatpush3.bf16.msra.mxu0 %v8655_v61 }
0x1477   :  { %8107 = vmatpush3.bf16.msra.mxu1 %v8656_v33  ;;  %8353 = vmatprep.subr.bf16.mxu0 %v8751_v0 }
0x1479   :  { %6730 = vmatmul.mubr.bf16.vlgmr.msra.gmra.mrb[136].mxu0 %v10454_v54 }
0x147a   :  { %6771 = vmatmul.mubr.bf16.vlgmr.msra.gmra.mrb[136].mxu1 %v10456_v55  ;;  %8357 = vmatprep.mubr.msk.bf16.mxu0 %vm8752_vm1, %v8751_v0 }
0x14ec   :  { %v7954_v42 = vpop.f32.mrb[124].mxu0  ;;  %v7976_v62 = vpop.f32.mrb[124].mxu1 }
0x14ed   :  { %v7955_v27 = vpop.f32.mrb[125].mxu0  ;;  %v7977_v15 = vpop.f32.mrb[125].mxu1 }
0x14ee   :  { %v7956_v53 = vadd.f32 %v7955_v27, %v7954_v42  ;;  %v7978_v63 = vadd.f32 %v7977_v15, %v7976_v62  ;;  %v7957_v1 = vpop.f32.mrb[126].mxu0  ;;  %v7979_v3 = vpop.f32.mrb[126].mxu1 }
0x14ef   :  { %v7958_v6 = vpop.f32.mrb[127].mxu0  ;;  %v7980_v46 = vpop.f32.mrb[127].mxu1 }
0x14f0   :  { %v6486_v54 = vadd.f32 %v7956_v53, %v7543_v34  ;;  %v7959_v9 = vadd.f32 %v7958_v6, %v7957_v1  ;;  %v7981_v55 = vadd.f32 %v7980_v46, %v7979_v3 }
0x14f2   :  { %v6527_v10 = vadd.f32 %v7978_v63, %v6486_v54  ;;  %v6489_v8 = vadd.f32 %v7959_v9, %v7543_v34 }
0x14f4   :  { %v6530_v12 = vadd.f32 %v7981_v55, %v6489_v8 }
0x150c   :  { %v7998_v21 = vpop.f32.mrb[128].mxu0  ;;  %v8020_v13 = vpop.f32.mrb[128].mxu1 }
0x150d   :  { %v7999_v22 = vpop.f32.mrb[129].mxu0  ;;  %v8021_v5 = vpop.f32.mrb[129].mxu1 }
0x150e   :  { %v8000_v59 = vadd.f32 %v7999_v22, %v7998_v21  ;;  %v8022_v14 = vadd.f32 %v8021_v5, %v8020_v13  ;;  %v8001_v4 = vpop.f32.mrb[130].mxu0  ;;  %v8023_v18 = vpop.f32.mrb[130].mxu1 }
0x150f   :  { %v8002_v41 = vpop.f32.mrb[131].mxu0  ;;  %v8024_v23 = vpop.f32.mrb[131].mxu1 }
0x1510   :  { %v6568_v25 = vadd.f32 %v8000_v59, %v6527_v10  ;;  %v8003_v16 = vadd.f32 %v8002_v41, %v8001_v4  ;;  %v8025_v26 = vadd.f32 %v8024_v23, %v8023_v18  ;;  %v7674_v4 = vld [vmem:[%s10743_s16 + $0x1] ss:$0 sm:$0xff] }
0x1511   :  { %v7675_v23 = vld [vmem:[%s10744_s17 + $0x1] ss:$0 sm:$0xff] }
0x1512   :  { %v6609_v24 = vadd.f32 %v8022_v14, %v6568_v25  ;;  %v6571_v30 = vadd.f32 %v8003_v16, %v6530_v12 }
0x1514   :  { %v6612_v2 = vadd.f32 %v8025_v26, %v6571_v30 }
0x152c   :  { %v8042_v32 = vpop.f32.mrb[132].mxu0 }
0x152d   :  { %v8064_v48 = vpop.f32.mrb[132].mxu1  ;;  %v8043_v36 = vpop.f32.mrb[133].mxu0 }
0x152e   :  { %v8044_v29 = vadd.f32 %v8043_v36, %v8042_v32  ;;  %v8065_v7 = vpop.f32.mrb[133].mxu1  ;;  %v8045_v11 = vpop.f32.mrb[134].mxu0 }
0x152f   :  { %v8066_v38 = vadd.f32 %v8065_v7, %v8064_v48  ;;  %v8067_v39 = vpop.f32.mrb[134].mxu1  ;;  %v8046_v37 = vpop.f32.mrb[135].mxu0 }
0x1530   :  { %v6650_v43 = vadd.f32 %v8044_v29, %v6609_v24  ;;  %v8047_v50 = vadd.f32 %v8046_v37, %v8045_v11  ;;  %v8068_v52 = vpop.f32.mrb[135].mxu1 }
0x1531   :  { %v8069_v28 = vadd.f32 %v8068_v52, %v8067_v39  ;;  %v8657_v52 = vld [vmem:[%s10745_s20] sm:$0xff]  }
0x1532   :  { %v6691_v44 = vadd.f32 %v8066_v38, %v6650_v43  ;;  %v6653_v49 = vadd.f32 %v8047_v50, %v6612_v2  ;;  %8354 = vmatpush3.bf16.msra.mxu0 %v8657_v52 }
0x1533   :  { %8355 = vmatprep.subr.bf16.mxu0 %v8751_v0  ;;  %v7677_v0 = vld [vmem:[%s10747_s19] ss:$0 sm:$0xff] }
0x1534   :  { %v6694_v17 = vadd.f32 %v8069_v28, %v6653_v49  ;;  %v8658_v28 = vld [vmem:[%s10745_s20 + $0x8] sm:$0xff]  }
0x1536   :  { %8356 = vmatpush3.bf16.msra.mxu0 %v8658_v28 }
0x154c   :  { %v8086_v45 = vpop.f32.mrb[136].mxu0 }
0x154d   :  { %v8108_v57 = vpop.f32.mrb[136].mxu1  ;;  %v8087_v19 = vpop.f32.mrb[137].mxu0 }
0x154e   :  { %v8088_v58 = vadd.f32 %v8087_v19, %v8086_v45  ;;  %v8109_v56 = vpop.f32.mrb[137].mxu1  ;;  %v8089_v20 = vpop.f32.mrb[138].mxu0 }
0x154f   :  { %v8110_v40 = vadd.f32 %v8109_v56, %v8108_v57  ;;  %v8111_v35 = vpop.f32.mrb[138].mxu1  ;;  %v8090_v31 = vpop.f32.mrb[139].mxu0  ;;  %v7676_v56 = vld [vmem:[%s10746_s18] ss:$0 sm:$0xff] }
0x1550   :  { %v6732_v60 = vadd.f32 %v8088_v58, %v6691_v44  ;;  %v8091_v61 = vadd.f32 %v8090_v31, %v8089_v20  ;;  %v8112_v33 = vpop.f32.mrb[139].mxu1 }
0x1551   :  { %v8113_v42 = vadd.f32 %v8112_v33, %v8111_v35 }
0x1552   :  { %v6773_v62 = vadd.f32 %v8110_v40, %v6732_v60  ;;  %v6735_v34 = vadd.f32 %v8091_v61, %v6694_v17 }
0x1554   :  { %v6776_v27 = vadd.f32 %v8113_v42, %v6735_v34  ;;  %v6779_v15 = vadd.f32 %v6773_v62, %v10158_v51 }
0x1556   :  { %v6785_v53 = vsel %vm441_vm15, %v6779_v15, 0.0  ;;  %v6780_v63 = vadd.f32 %v6776_v27, %v10160_v47 }
0x1557   :  { %6786 = vadd.xlane.f32.xlu0 %v6785_v53 }
0x1558   :  { %v6788_v1 = vsel %vm441_vm15, %v6780_v63, 0.0 }
0x1559   :  { %6789 = vadd.xlane.f32.xlu1 %v6788_v1 }
0x15e4   :  { %v6787_v3 = vpop.xlane.xlu0 %6786 }
0x15e5   :  { %v6791_v6 = vmul.f32 0.03125, %v6787_v3 }
0x15e6   :  { %v6790_v46 = vpop.xlane.xlu1 %6789 }
0x15e7   :  { %v6793_v54 = vsub.f32 %v6779_v15, %v6791_v6  ;;  %v6792_v9 = vmul.f32 0.03125, %v6790_v46 }
0x15e9   :  { %v6794_v55 = vsub.f32 %v6780_v63, %v6792_v9  ;;  %v6795_v10 = vmul.f32 %v6793_v54, %v6793_v54 }
0x15eb   :  { %v6797_v8 = vsel %vm441_vm15, %v6795_v10, 0.0  ;;  %v6796_v12 = vmul.f32 %v6794_v55, %v6794_v55 }
0x15ec   :  { %6798 = vadd.xlane.f32.xlu0 %v6797_v8 }
0x15ed   :  { %v6800_v51 = vsel %vm441_vm15, %v6796_v12, 0.0 }
0x15ee   :  { %6801 = vadd.xlane.f32.xlu1 %v6800_v51 }
0x1679   :  { %v6799_v21 = vpop.xlane.xlu0 %6798 }
0x167a   :  { %v6803_v47 = vmul.f32 0.03125, %v6799_v21 }
0x167b   :  { %v6802_v13 = vpop.xlane.xlu1 %6801 }
0x167c   :  { %v6805_v22 = vadd.f32 1e-05, %v6803_v47  ;;  %v6804_v5 = vmul.f32 0.03125, %v6802_v13 }
0x167e   :  { %8743 = vrsqrt.f32 %v6805_v22  ;;  %v6806_v59 = vadd.f32 1e-05, %v6804_v5  ;;  %v7678_v22 = vld [vmem:[%s10748_s21] ss:$0 sm:$0xff] }
0x1680   :  { %8745 = vrsqrt.f32 %v6806_v59 }
0x1688   :  { %v8744_v14 = vpop.eup %8743 }
0x1689   :  { %v6809_v18 = vmul.f32 %v8744_v14, %v6793_v54 }
0x168a   :  { %v8746_v41 = vpop.eup %8745 }
0x168b   :  { %v6817_v25 = vmul.f32 %v7674_v4, %v6809_v18  ;;  %v6810_v16 = vmul.f32 %v8746_v41, %v6794_v55 }
0x168d   :  { %v6825_v26 = vadd.f32 %v7675_v23, %v6817_v25  ;;  %v6818_v24 = vmul.f32 %v7674_v4, %v6810_v16 }
0x168f   :  { %v6829_v30 = vsel %vm441_vm15, %v6825_v26, 0.0  ;;  %v6826_v2 = vadd.f32 %v7675_v23, %v6818_v24 }
0x1690   :  { %6830 = vadd.xlane.f32.xlu0 %v6829_v30 }
0x1691   :  { %v6832_v32 = vsel %vm441_vm15, %v6826_v2, 0.0 }
0x1692   :  { %6833 = vadd.xlane.f32.xlu1 %v6832_v32 }
0x171d   :  { %v6831_v48 = vpop.xlane.xlu0 %6830 }
0x171e   :  { %v6835_v36 = vmul.f32 0.03125, %v6831_v48 }
0x171f   :  { %v6834_v29 = vpop.xlane.xlu1 %6833 }
0x1720   :  { %v6837_v7 = vsub.f32 %v6825_v26, %v6835_v36  ;;  %v6836_v11 = vmul.f32 0.03125, %v6834_v29 }
0x1722   :  { %v6838_v38 = vsub.f32 %v6826_v2, %v6836_v11  ;;  %v6839_v39 = vmul.f32 %v6837_v7, %v6837_v7 }
0x1724   :  { %v6841_v37 = vsel %vm441_vm15, %v6839_v39, 0.0  ;;  %v6840_v43 = vmul.f32 %v6838_v38, %v6838_v38 }
0x1725   :  { %6842 = vadd.xlane.f32.xlu0 %v6841_v37 }
0x1726   :  { %v6844_v50 = vsel %vm441_vm15, %v6840_v43, 0.0 }
0x1727   :  { %6845 = vadd.xlane.f32.xlu1 %v6844_v50 }
0x17b2   :  { %v6843_v44 = vpop.xlane.xlu0 %6842 }
0x17b3   :  { %v6847_v49 = vmul.f32 0.03125, %v6843_v44 }
0x17b4   :  { %v6846_v17 = vpop.xlane.xlu1 %6845 }
0x17b5   :  { %v6849_v45 = vadd.f32 1e-05, %v6847_v49  ;;  %v6848_v57 = vmul.f32 0.03125, %v6846_v17 }
0x17b7   :  { %8747 = vrsqrt.f32 %v6849_v45  ;;  %v6850_v19 = vadd.f32 1e-05, %v6848_v57 }
0x17b9   :  { %8749 = vrsqrt.f32 %v6850_v19 }
0x17c1   :  { %v8748_v58 = vpop.eup %8747 }
0x17c2   :  { %v6853_v20 = vmul.f32 %v8748_v58, %v6837_v7 }
0x17c3   :  { %v8750_v40 = vpop.eup %8749 }
0x17c4   :  { %v6861_v35 = vmul.f32 %v7676_v56, %v6853_v20  ;;  %v6854_v31 = vmul.f32 %v8750_v40, %v6838_v38 }
0x17c6   :  { %v6869_v60 = vadd.f32 %v7677_v0, %v6861_v35  ;;  %v6862_v61 = vmul.f32 %v7676_v56, %v6854_v31 }
0x17c8   :  { %v6871_v33 = vadd.f32 3.0, %v6869_v60  ;;  %v6870_v42 = vadd.f32 %v7677_v0, %v6862_v61 }
0x17ca   :  { %v6873_v62 = vmax.f32 %v6871_v33, 0.0  ;;  %v6872_v34 = vadd.f32 3.0, %v6870_v42 }
0x17cc   :  { %v6875_v27 = vmin.f32 %v6873_v62, 6.0  ;;  %v6874_v15 = vmax.f32 %v6872_v34, 0.0 }
0x17ce   :  { %v6876_v53 = vmin.f32 %v6874_v15, 6.0  ;;  %v6877_v63 = vmul.f32 %v6875_v27, %v6869_v60 }
0x17d0   :  { %v6878_v1 = vmul.f32 %v6876_v53, %v6870_v42  ;;  %v6879_v3 = vmul.f32 0.16666667, %v6877_v63 }
0x17d2   :  { %v6880_v6 = vmul.f32 0.16666667, %v6878_v1  ;;  %v6881_v46 = vadd.f32 3.0, %v6879_v3 }
0x17d4   :  { %v6882_v54 = vadd.f32 3.0, %v6880_v6  ;;  %v6883_v9 = vmax.f32 %v6881_v46, 0.0 }
0x17d6   :  { %v6884_v55 = vmax.f32 %v6882_v54, 0.0  ;;  %v6885_v10 = vmin.f32 %v6883_v9, 6.0 }
0x17d8   :  { %v6886_v8 = vmin.f32 %v6884_v55, 6.0  ;;  %v6887_v12 = vmul.f32 %v6885_v10, %v6879_v3 }
0x17da   :  { %v6888_v51 = vmul.f32 %v6886_v8, %v6880_v6  ;;  %v6889_v21 = vmul.f32 0.16666667, %v6887_v12 }
0x17dc   :  { %v6890_v47 = vmul.f32 0.16666667, %v6888_v51 }
0x17de   :  { %v6895_v13 = vpack.c.bf16 %v6890_v47, %v6889_v21 }
0x17e0   :  { %8358 = vmatmul.mubr.msk.bf16.vlgmr.msra.gmra.mrb[140].mxu0 %vm441_vm15, %v6895_v13 }
0x18b3   :  { %v6952_v5 = vpop.f32.mrb[140].mxu0 }
0x18b4   :  { %v6953_v59 = vadd.f32 %v7678_v22, %v6952_v5  ;;  %v8359_v14 = vpop.f32.mrb[141].mxu0 }
0x18b5   :  { %v6955_v4 = vpop.f32.mrb[142].mxu0 }
0x18b6   :  { %6959 = vst [vmem:[%s10749_s22] sm:$0xff] %v6953_v59  ;;  %v6956_v18 = vadd.f32 %v7678_v22, %v6955_v4  ;;  %v8360_v41 = vpop.f32.mrb[143].mxu0 }
0x18b8   :  { %6960 = vst [vmem:[%s10749_s22 + $0x8] sm:$0xff] %v6956_v18 }

</bundles_post_ra>
